<compile_context>
chip_gen: v5e
topology: v5e:2x2
jax: 0.10.0
libtpu: 0.0.40
codegen_flags: <defaults>
</compile_context>

<pallas_src>
import functools

import jax
import jax.numpy as jnp
from jax.experimental import pallas as pl
from jax.experimental.pallas import tpu as pltpu


def _round_up(x, m):
    return (x + m - 1) // m * m


# ----------------------------- Pallas kernels -----------------------------

def _matmul_bias_act_kernel(a_ref, w_ref, b_ref, o_ref, *, act):
    # a: (tm, K) bf16, w: (K, Np) bf16 (resident), b: (1, Np) f32 (resident)
    acc = jnp.dot(a_ref[...], w_ref[...], preferred_element_type=jnp.float32)
    acc = acc + b_ref[...]                       # f32 epilogue (v5e-friendly)
    if act == "relu":
        acc = jnp.maximum(acc, 0.0)
    elif act == "sigmoid":
        acc = jax.nn.sigmoid(acc)
    o_ref[...] = acc.astype(o_ref.dtype)


def matmul_bias_act(a, w, b, act="none", tm_cap=512):
    """(M,K) @ (K,N) + b with fused activation.

    Tiled over M with double-buffered pipelining; N is padded to a multiple of
    128 for lane-dense stores; operands are fed to the MXU in bf16 with f32
    accumulation.
    """
    M, K = a.shape
    K2, N = w.shape
    assert K == K2
    Np = _round_up(N, 128)
    tm = min(tm_cap, _round_up(max(M, 8), 8))
    Mp = _round_up(M, tm)

    a_bf = a.astype(jnp.bfloat16)
    if Mp != M:
        a_bf = jnp.pad(a_bf, ((0, Mp - M), (0, 0)))
    w_bf = w.astype(jnp.bfloat16)
    bias = b
    if Np != N:
        w_bf = jnp.pad(w_bf, ((0, 0), (0, Np - N)))
        bias = jnp.pad(bias, (0, Np - N))
    bias = bias.reshape(1, Np).astype(jnp.float32)

    kernel = functools.partial(_matmul_bias_act_kernel, act=act)
    out = pl.pallas_call(
        kernel,
        out_shape=jax.ShapeDtypeStruct((Mp, Np), jnp.float32),
        grid=(Mp // tm,),
        in_specs=[
            pl.BlockSpec((tm, K), lambda i: (i, 0)),    # A tile, pipelined
            pl.BlockSpec((K, Np), lambda i: (0, 0)),    # weight resident
            pl.BlockSpec((1, Np), lambda i: (0, 0)),    # bias resident
        ],
        out_specs=pl.BlockSpec((tm, Np), lambda i: (i, 0)),
        compiler_params=pltpu.CompilerParams(
            dimension_semantics=("parallel",)),
    )(a_bf, w_bf, bias)

    if Mp != M or Np != N:
        out = out[:M, :N]
    return out


def _bn_relu_res_kernel(x_ref, s_ref, t_ref, o_ref):
    # y + relu(y * scale + shift) on a (tm, N) tile; scale/shift resident (1,N)
    x = x_ref[...]
    o_ref[...] = (x + jnp.maximum(x * s_ref[...] + t_ref[...], 0.0)
                  ).astype(o_ref.dtype)


def bn_relu_residual_tiled(x, scale_row, shift_row, tm_cap=512):
    M, N = x.shape
    tm = min(tm_cap, _round_up(max(M, 8), 8))
    Mp = _round_up(M, tm)
    xp = jnp.pad(x, ((0, Mp - M), (0, 0))) if Mp != M else x
    out = pl.pallas_call(
        _bn_relu_res_kernel,
        out_shape=jax.ShapeDtypeStruct((Mp, N), jnp.float32),
        grid=(Mp // tm,),
        in_specs=[
            pl.BlockSpec((tm, N), lambda i: (i, 0)),
            pl.BlockSpec((1, N), lambda i: (0, 0)),
            pl.BlockSpec((1, N), lambda i: (0, 0)),
        ],
        out_specs=pl.BlockSpec((tm, N), lambda i: (i, 0)),
        compiler_params=pltpu.CompilerParams(
            dimension_semantics=("parallel",)),
    )(xp, scale_row, shift_row)
    return out[:M] if Mp != M else out


def _enc_bn_reparam_kernel(y_ref, g_ref, b_ref, e_ref, z_ref, *, eps_bn, latent):
    # Fused: BatchNorm (train-mode batch stats) + chunk(mu, logvar) + reparam.
    y = y_ref[...]                                   # (M, 2*latent)
    mean = jnp.mean(y, axis=0, keepdims=True)
    var = jnp.mean((y - mean) ** 2, axis=0, keepdims=True)   # biased, as torch
    yn = (y - mean) * jax.lax.rsqrt(var + eps_bn) * g_ref[...] + b_ref[...]
    mu = yn[:, :latent]
    logvar = yn[:, latent:]
    z_ref[...] = mu + e_ref[...] * jnp.exp(0.5 * logvar)


def enc_bn_reparam(y_mc, gamma, beta, eps_noise, latent_dim, eps_bn=1e-5):
    """Tiny latent slab -> single fused whole-slab kernel (one launch, one
    HBM round-trip) per the perf review's 'fold BN+split+reparam' suggestion."""
    M, C = y_mc.shape
    kernel = functools.partial(_enc_bn_reparam_kernel,
                               eps_bn=eps_bn, latent=latent_dim)
    return pl.pallas_call(
        kernel,
        out_shape=jax.ShapeDtypeStruct((M, latent_dim), jnp.float32),
        grid=(1,),
        in_specs=[
            pl.BlockSpec((M, C), lambda i: (0, 0)),
            pl.BlockSpec((1, C), lambda i: (0, 0)),
            pl.BlockSpec((1, C), lambda i: (0, 0)),
            pl.BlockSpec((M, latent_dim), lambda i: (0, 0)),
        ],
        out_specs=pl.BlockSpec((M, latent_dim), lambda i: (0, 0)),
    )(y_mc, gamma.reshape(1, C), beta.reshape(1, C), eps_noise)


# ------------------------------- JAX glue ---------------------------------

def _im2col(xp, k, stride, Ho, Wo):
    """padded NHWC -> (B*Ho*Wo, k*k*C) patches, tap order (i, j), then c."""
    B, _, _, C = xp.shape
    cols = []
    for i in range(k):
        for j in range(k):
            cols.append(xp[:, i:i + stride * (Ho - 1) + 1:stride,
                           j:j + stride * (Wo - 1) + 1:stride, :])
    patches = jnp.stack(cols, axis=3)            # (B, Ho, Wo, k*k, C)
    return patches.reshape(B * Ho * Wo, k * k * C)


def conv2d_nhwc(x, w_pt, b, *, stride, pad, act):
    # TODO(synk): build im2col patches in-kernel (halo BlockSpecs) to avoid the
    # k^2-expanded patch matrix in HBM; encoder layers are small so JAX-side
    # im2col is kept here, the hot decoder path uses the phase decomposition.
    Cout, Cin, k, _ = w_pt.shape
    B, Hin, Win, _ = x.shape
    Ho = (Hin + 2 * pad - k) // stride + 1
    Wo = (Win + 2 * pad - k) // stride + 1
    xp = jnp.pad(x, ((0, 0), (pad, pad), (pad, pad), (0, 0)))
    patches = _im2col(xp, k, stride, Ho, Wo)
    wm = jnp.transpose(w_pt, (2, 3, 1, 0)).reshape(k * k * Cin, Cout)
    out = matmul_bias_act(patches, wm, b, act)
    return out.reshape(B, Ho, Wo, Cout)


def _phase_weight_convT_s2(w_pt):
    """ConvTranspose2d(k=3, stride=2) weight -> combined (4*Cin, 4*Cout)
    sub-pixel matrix.  Row blocks = taps (r,c),(r,c+1),(r+1,c),(r+1,c+1);
    column blocks = output phases (0,0),(0,1),(1,0),(1,1)."""
    Cin, Cout, k, _ = w_pt.shape
    assert k == 3
    zeros = jnp.zeros((Cin, Cout), w_pt.dtype)
    rows = []
    for dr in range(2):
        for dc in range(2):
            cols = []
            for pr in range(2):
                for pc in range(2):
                    a = 2 * dr + 1 - pr          # flipped-kernel row index
                    bb = 2 * dc + 1 - pc         # flipped-kernel col index
                    if 0 <= a < 3 and 0 <= bb < 3:
                        # w_eq[cout,cin,a,b] = w_pt[cin,cout,2-a,2-b]
                        cols.append(w_pt[:, :, 2 - a, 2 - bb])
                    else:
                        cols.append(zeros)
            rows.append(jnp.concatenate(cols, axis=1))   # (Cin, 4*Cout)
    return jnp.concatenate(rows, axis=0)                  # (4*Cin, 4*Cout)


def conv_transpose_phases(x, w_pt, b, *, act):
    """ConvTranspose2d(k=3, s=2, p=1, op=1) via sub-pixel decomposition.

    Returns the phase-layout output (B*H*W, 4*Cout) plus dims; interleave with
    phase_interleave() to get the (B, 2H, 2W, Cout) NHWC tensor.
    """
    B, H, W, Cin = x.shape
    Cin2, Cout, k, _ = w_pt.shape
    assert Cin2 == Cin and k == 3
    # 2x2 neighbour taps (zero beyond the bottom/right edge)
    x_r = jnp.pad(x, ((0, 0), (0, 0), (0, 1), (0, 0)))[:, :, 1:, :]
    x_d = jnp.pad(x, ((0, 0), (0, 1), (0, 0), (0, 0)))[:, 1:, :, :]
    x_rd = jnp.pad(x, ((0, 0), (0, 1), (0, 1), (0, 0)))[:, 1:, 1:, :]
    patches = jnp.concatenate([x, x_r, x_d, x_rd], axis=-1)
    patches = patches.reshape(B * H * W, 4 * Cin)
    wm = _phase_weight_convT_s2(w_pt)            # (4*Cin, 4*Cout)
    bm = jnp.tile(b, 4)                          # bias per phase block
    ph = matmul_bias_act(patches, wm, bm, act)   # (B*H*W, 4*Cout)
    return ph, (B, H, W, Cout)


def phase_interleave(ph, B, H, W, Cout):
    """Depth-to-space: phase p = 2*pr + pc -> output pixel (2r+pr, 2c+pc)."""
    out = ph.reshape(B, H, W, 2, 2, Cout)
    out = jnp.transpose(out, (0, 1, 3, 2, 4, 5))
    return out.reshape(B, 2 * H, 2 * W, Cout)


def bn_relu_residual_phase(ph, gamma, beta, n_phase=4, eps=1e-5):
    """y + relu(BatchNorm(y)) applied on the lane-dense phase-layout tensor.

    Per-channel batch statistics (a tiny reduction) are computed in plain JAX;
    the bandwidth-bound normalize+relu+residual pass runs as a tiled Pallas
    kernel.
    """
    M, N = ph.shape
    C = N // n_phase
    xr = ph.reshape(M, n_phase, C)
    mean = jnp.mean(xr, axis=(0, 1))                       # (C,)
    var = jnp.mean(jnp.square(xr - mean), axis=(0, 1))     # biased, as torch
    scale = gamma * jax.lax.rsqrt(var + eps)
    shift = beta - mean * scale
    scale_row = jnp.tile(scale, n_phase).reshape(1, N)
    shift_row = jnp.tile(shift, n_phase).reshape(1, N)
    # TODO(synk): partial sum/sumsq could be emitted from the matmul epilogue
    # to skip this extra read pass of the conv output.
    return bn_relu_residual_tiled(ph, scale_row, shift_row)


# ------------------------- model parameters / forward ----------------------

def init_params(key, rgb=3, n_embd=64, latent_dim=4):
    ks = jax.random.split(key, 10)

    def w(k, shape, scale=0.05):
        return scale * jax.random.normal(k, shape, jnp.float32)

    return {
        # encoder (Conv2d weights are (Cout, Cin, kH, kW))
        "enc_conv1_w": w(ks[0], (n_embd, rgb, 3, 3)),
        "enc_conv1_b": w(ks[1], (n_embd,), 0.01),
        "enc_conv2_w": w(ks[2], (2 * latent_dim, n_embd, 3, 3)),
        "enc_conv2_b": w(ks[3], (2 * latent_dim,), 0.01),
        "enc_norm_g": jnp.ones((2 * latent_dim,), jnp.float32),
        "enc_norm_b": jnp.zeros((2 * latent_dim,), jnp.float32),
        # decoder (ConvTranspose2d weights are (Cin, Cout, kH, kW))
        "dec_conv2_w": w(ks[4], (latent_dim, 2 * n_embd, 3, 3)),
        "dec_conv2_b": w(ks[5], (2 * n_embd,), 0.01),
        "dec_norm2_g": jnp.ones((2 * n_embd,), jnp.float32),
        "dec_norm2_b": jnp.zeros((2 * n_embd,), jnp.float32),
        "dec_conv1_w": w(ks[6], (2 * n_embd, n_embd, 3, 3)),
        "dec_conv1_b": w(ks[7], (n_embd,), 0.01),
        "dec_norm1_g": jnp.ones((n_embd,), jnp.float32),
        "dec_norm1_b": jnp.zeros((n_embd,), jnp.float32),
        "dec_conv0_w": w(ks[8], (n_embd, rgb, 3, 3)),
        "dec_conv0_b": w(ks[9], (rgb,), 0.01),
    }


def vae_forward(params, x_nchw, rng_key, latent_dim=4):
    B, _, H, W = x_nchw.shape
    x = jnp.transpose(x_nchw, (0, 2, 3, 1))                      # NCHW -> NHWC

    # ---- encoder ----
    y = conv2d_nhwc(x, params["enc_conv1_w"], params["enc_conv1_b"],
                    stride=2, pad=1, act="relu")                 # (B,H/2,W/2,64)
    y = conv2d_nhwc(y, params["enc_conv2_w"], params["enc_conv2_b"],
                    stride=2, pad=1, act="none")                 # (B,H/4,W/4,8)
    Bq, Hq, Wq, Cq = y.shape

    # fused BatchNorm + chunk(mu, logvar) + reparameterize on the latent slab
    eps = jax.random.normal(rng_key, (Bq * Hq * Wq, latent_dim), jnp.float32)
    z = enc_bn_reparam(y.reshape(Bq * Hq * Wq, Cq),
                       params["enc_norm_g"], params["enc_norm_b"],
                       eps, latent_dim)
    z = z.reshape(Bq, Hq, Wq, latent_dim)                        # NHWC latent

    # ---- decoder (sub-pixel ConvTranspose, BN+residual in phase layout) ----
    ph, dims = conv_transpose_phases(z, params["dec_conv2_w"],
                                     params["dec_conv2_b"], act="none")
    ph = bn_relu_residual_phase(ph, params["dec_norm2_g"], params["dec_norm2_b"])
    y = phase_interleave(ph, *dims)                              # (B,H/2,W/2,128)

    ph, dims = conv_transpose_phases(y, params["dec_conv1_w"],
                                     params["dec_conv1_b"], act="none")
    ph = bn_relu_residual_phase(ph, params["dec_norm1_g"], params["dec_norm1_b"])
    y = phase_interleave(ph, *dims)                              # (B,H,W,64)

    ph, dims = conv_transpose_phases(y, params["dec_conv0_w"],
                                     params["dec_conv0_b"], act="sigmoid")
    y = phase_interleave(ph, *dims)                              # (B,2H,2W,3)

    return jnp.transpose(y, (0, 3, 1, 2))                        # back to NCHW


# ---------------------------------- main -----------------------------------

if __name__ == "__main__":
    key = jax.random.PRNGKey(0)
    pkey, xkey, ekey = jax.random.split(key, 3)

    params = init_params(pkey, rgb=3, n_embd=64, latent_dim=4)
    x = jax.random.uniform(xkey, (2, 3, 16, 16), jnp.float32)    # NCHW input

    fwd = jax.jit(vae_forward)
    y = jax.block_until_ready(fwd(params, x, ekey))

    assert y.shape == (2, 3, 32, 32), y.shape                    # 2x super-resolution
    assert bool(jnp.isfinite(y).all())
    assert bool((y >= 0.0).all() and (y <= 1.0).all())           # sigmoid output
    print("KERNEL_OK")
</pallas_src>

<mosaic_0001>
module attributes {stable_mosaic.version = 11 : i64} {
  func.func @_matmul_bias_act_kernel(%arg0: i32, %arg1: memref<128x27xbf16, #tpu.memory_space<vmem>>, %arg2: memref<27x128xbf16, #tpu.memory_space<vmem>>, %arg3: memref<1x128xf32, #tpu.memory_space<vmem>>, %arg4: memref<128x128xf32, #tpu.memory_space<vmem>>) attributes {dimension_semantics = [#tpu.dimension_semantics<parallel>], iteration_bounds = array<i64: 1>, scalar_prefetch = 0 : i64, scratch_operands = 0 : i64, tpu.core_type = #tpu.core_type<tc>, window_params = [{transform_indices = @transform_0, window_bounds = array<i64: 128, 27>}, {pipeline_mode = #tpu.pipeline_mode<synchronous>, transform_indices = @transform_1, window_bounds = array<i64: 27, 128>}, {pipeline_mode = #tpu.pipeline_mode<synchronous>, transform_indices = @transform_2, window_bounds = array<i64: 1, 128>}, {transform_indices = @transform_3, window_bounds = array<i64: 128, 128>}]} {
    %c0 = arith.constant 0 : index
    %c0_0 = arith.constant 0 : index
    %0 = vector.load %arg1[%c0, %c0_0] : memref<128x27xbf16, #tpu.memory_space<vmem>>, vector<128x27xbf16>
    %c0_1 = arith.constant 0 : index
    %c0_2 = arith.constant 0 : index
    %1 = vector.load %arg2[%c0_1, %c0_2] : memref<27x128xbf16, #tpu.memory_space<vmem>>, vector<27x128xbf16>
    %cst = arith.constant dense<0.000000e+00> : vector<128x128xf32>
    %2 = tpu.matmul %0, %1, %cst {dimension_numbers = #tpu.dot_dimension_numbers<[1], [0], [0], [1], [0, 0, 1, 1], [], []>} : vector<128x27xbf16>, vector<27x128xbf16>, vector<128x128xf32> -> vector<128x128xf32>
    %c0_3 = arith.constant 0 : index
    %c0_4 = arith.constant 0 : index
    %3 = vector.load %arg3[%c0_3, %c0_4] : memref<1x128xf32, #tpu.memory_space<vmem>>, vector<1x128xf32>
    %4 = vector.broadcast %3 : vector<1x128xf32> to vector<128x128xf32>
    %5 = arith.addf %2, %4 : vector<128x128xf32>
    %cst_5 = arith.constant 0.000000e+00 : f32
    %6 = vector.broadcast %cst_5 : f32 to vector<128x128xf32>
    %7 = arith.maximumf %5, %6 : vector<128x128xf32>
    %c0_6 = arith.constant 0 : index
    %c0_7 = arith.constant 0 : index
    %8 = vector.load %arg4[%c0_6, %c0_7] : memref<128x128xf32, #tpu.memory_space<vmem>>, vector<128x128xf32>
    tpu.vector_store %arg4[%c0_6, %c0_7], %7 {strides = array<i32>} : memref<128x128xf32, #tpu.memory_space<vmem>>, vector<128x128xf32>,
    return
  }
  func.func @transform_0(%arg0: i32) -> (i32, i32) {
    %c0_i32 = arith.constant 0 : i32
    %c0_i32_0 = arith.constant 0 : i32
    return %arg0, %c0_i32 : i32, i32
  }
  func.func @transform_1(%arg0: i32) -> (i32, i32) {
    %c0_i32 = arith.constant 0 : i32
    %c0_i32_0 = arith.constant 0 : i32
    %c0_i32_1 = arith.constant 0 : i32
    return %c0_i32, %c0_i32_0 : i32, i32
  }
  func.func @transform_2(%arg0: i32) -> (i32, i32) {
    %c0_i32 = arith.constant 0 : i32
    %c0_i32_0 = arith.constant 0 : i32
    %c0_i32_1 = arith.constant 0 : i32
    return %c0_i32, %c0_i32_0 : i32, i32
  }
  func.func @transform_3(%arg0: i32) -> (i32, i32) {
    %c0_i32 = arith.constant 0 : i32
    %c0_i32_0 = arith.constant 0 : i32
    return %arg0, %c0_i32 : i32, i32
  }
}

module attributes {stable_mosaic.version = 11 : i64} {
  func.func @_matmul_bias_act_kernel(%arg0: i32, %arg1: memref<32x576xbf16, #tpu.memory_space<vmem>>, %arg2: memref<576x128xbf16, #tpu.memory_space<vmem>>, %arg3: memref<1x128xf32, #tpu.memory_space<vmem>>, %arg4: memref<32x128xf32, #tpu.memory_space<vmem>>) attributes {dimension_semantics = [#tpu.dimension_semantics<parallel>], iteration_bounds = array<i64: 1>, scalar_prefetch = 0 : i64, scratch_operands = 0 : i64, tpu.core_type = #tpu.core_type<tc>, window_params = [{transform_indices = @transform_0, window_bounds = array<i64: 32, 576>}, {pipeline_mode = #tpu.pipeline_mode<synchronous>, transform_indices = @transform_1, window_bounds = array<i64: 576, 128>}, {pipeline_mode = #tpu.pipeline_mode<synchronous>, transform_indices = @transform_2, window_bounds = array<i64: 1, 128>}, {transform_indices = @transform_3, window_bounds = array<i64: 32, 128>}]} {
    %c0 = arith.constant 0 : index
    %c0_0 = arith.constant 0 : index
    %0 = vector.load %arg1[%c0, %c0_0] : memref<32x576xbf16, #tpu.memory_space<vmem>>, vector<32x576xbf16>
    %c0_1 = arith.constant 0 : index
    %c0_2 = arith.constant 0 : index
    %1 = vector.load %arg2[%c0_1, %c0_2] : memref<576x128xbf16, #tpu.memory_space<vmem>>, vector<576x128xbf16>
    %cst = arith.constant dense<0.000000e+00> : vector<32x128xf32>
    %2 = tpu.matmul %0, %1, %cst {dimension_numbers = #tpu.dot_dimension_numbers<[1], [0], [0], [1], [0, 0, 1, 1], [], []>} : vector<32x576xbf16>, vector<576x128xbf16>, vector<32x128xf32> -> vector<32x128xf32>
    %c0_3 = arith.constant 0 : index
    %c0_4 = arith.constant 0 : index
    %3 = vector.load %arg3[%c0_3, %c0_4] : memref<1x128xf32, #tpu.memory_space<vmem>>, vector<1x128xf32>
    %4 = vector.broadcast %3 : vector<1x128xf32> to vector<32x128xf32>
    %5 = arith.addf %2, %4 : vector<32x128xf32>
    %c0_5 = arith.constant 0 : index
    %c0_6 = arith.constant 0 : index
    %6 = vector.load %arg4[%c0_5, %c0_6] : memref<32x128xf32, #tpu.memory_space<vmem>>, vector<32x128xf32>
    tpu.vector_store %arg4[%c0_5, %c0_6], %5 {strides = array<i32>} : memref<32x128xf32, #tpu.memory_space<vmem>>, vector<32x128xf32>,
    return
  }
  func.func @transform_0(%arg0: i32) -> (i32, i32) {
    %c0_i32 = arith.constant 0 : i32
    %c0_i32_0 = arith.constant 0 : i32
    return %arg0, %c0_i32 : i32, i32
  }
  func.func @transform_1(%arg0: i32) -> (i32, i32) {
    %c0_i32 = arith.constant 0 : i32
    %c0_i32_0 = arith.constant 0 : i32
    %c0_i32_1 = arith.constant 0 : i32
    return %c0_i32, %c0_i32_0 : i32, i32
  }
  func.func @transform_2(%arg0: i32) -> (i32, i32) {
    %c0_i32 = arith.constant 0 : i32
    %c0_i32_0 = arith.constant 0 : i32
    %c0_i32_1 = arith.constant 0 : i32
    return %c0_i32, %c0_i32_0 : i32, i32
  }
  func.func @transform_3(%arg0: i32) -> (i32, i32) {
    %c0_i32 = arith.constant 0 : i32
    %c0_i32_0 = arith.constant 0 : i32
    return %arg0, %c0_i32 : i32, i32
  }
}

module attributes {stable_mosaic.version = 11 : i64} {
  func.func @_enc_bn_reparam_kernel(%arg0: i32, %arg1: memref<32x8xf32, #tpu.memory_space<vmem>>, %arg2: memref<1x8xf32, #tpu.memory_space<vmem>>, %arg3: memref<1x8xf32, #tpu.memory_space<vmem>>, %arg4: memref<32x4xf32, #tpu.memory_space<vmem>>, %arg5: memref<32x4xf32, #tpu.memory_space<vmem>>) attributes {dimension_semantics = [#tpu.dimension_semantics<arbitrary>], iteration_bounds = array<i64: 1>, scalar_prefetch = 0 : i64, scratch_operands = 0 : i64, tpu.core_type = #tpu.core_type<tc>, window_params = [{pipeline_mode = #tpu.pipeline_mode<synchronous>, transform_indices = @transform_0, window_bounds = array<i64: 32, 8>}, {pipeline_mode = #tpu.pipeline_mode<synchronous>, transform_indices = @transform_1, window_bounds = array<i64: 1, 8>}, {pipeline_mode = #tpu.pipeline_mode<synchronous>, transform_indices = @transform_2, window_bounds = array<i64: 1, 8>}, {pipeline_mode = #tpu.pipeline_mode<synchronous>, transform_indices = @transform_3, window_bounds = array<i64: 32, 4>}, {pipeline_mode = #tpu.pipeline_mode<synchronous>, transform_indices = @transform_4, window_bounds = array<i64: 32, 4>}]} {
    %c0 = arith.constant 0 : index
    %c0_0 = arith.constant 0 : index
    %0 = vector.load %arg1[%c0, %c0_0] : memref<32x8xf32, #tpu.memory_space<vmem>>, vector<32x8xf32>
    %cst = arith.constant dense<0.000000e+00> : vector<8xf32>
    %1 = vector.multi_reduction <add>, %0, %cst [0] : vector<32x8xf32> to vector<8xf32>
    %2 = vector.shape_cast %1 : vector<8xf32> to vector<1x8xf32>
    %cst_1 = arith.constant 3.200000e+01 : f32
    %3 = vector.broadcast %cst_1 : f32 to vector<1x8xf32>
    %4 = arith.divf %2, %3 : vector<1x8xf32>
    %5 = vector.broadcast %4 : vector<1x8xf32> to vector<32x8xf32>
    %6 = arith.subf %0, %5 : vector<32x8xf32>
    %7 = arith.mulf %6, %6 : vector<32x8xf32>
    %cst_2 = arith.constant dense<0.000000e+00> : vector<8xf32>
    %8 = vector.multi_reduction <add>, %7, %cst_2 [0] : vector<32x8xf32> to vector<8xf32>
    %9 = vector.shape_cast %8 : vector<8xf32> to vector<1x8xf32>
    %cst_3 = arith.constant 3.200000e+01 : f32
    %10 = vector.broadcast %cst_3 : f32 to vector<1x8xf32>
    %11 = arith.divf %9, %10 : vector<1x8xf32>
    %12 = vector.broadcast %4 : vector<1x8xf32> to vector<32x8xf32>
    %13 = arith.subf %0, %12 : vector<32x8xf32>
    %cst_4 = arith.constant 9.99999974E-6 : f32
    %14 = vector.broadcast %cst_4 : f32 to vector<1x8xf32>
    %15 = arith.addf %11, %14 : vector<1x8xf32>
    %16 = math.rsqrt %15 : vector<1x8xf32>
    %17 = vector.broadcast %16 : vector<1x8xf32> to vector<32x8xf32>
    %18 = arith.mulf %13, %17 : vector<32x8xf32>
    %c0_5 = arith.constant 0 : index
    %c0_6 = arith.constant 0 : index
    %19 = vector.load %arg2[%c0_5, %c0_6] : memref<1x8xf32, #tpu.memory_space<vmem>>, vector<1x8xf32>
    %20 = vector.broadcast %19 : vector<1x8xf32> to vector<32x8xf32>
    %21 = arith.mulf %18, %20 : vector<32x8xf32>
    %c0_7 = arith.constant 0 : index
    %c0_8 = arith.constant 0 : index
    %22 = vector.load %arg3[%c0_7, %c0_8] : memref<1x8xf32, #tpu.memory_space<vmem>>, vector<1x8xf32>
    %23 = vector.broadcast %22 : vector<1x8xf32> to vector<32x8xf32>
    %24 = arith.addf %21, %23 : vector<32x8xf32>
    %25 = vector.extract_strided_slice %24 {offsets = [0, 0], sizes = [32, 4], strides = [1, 1]} : vector<32x8xf32> to vector<32x4xf32>
    %26 = vector.extract_strided_slice %24 {offsets = [0, 4], sizes = [32, 4], strides = [1, 1]} : vector<32x8xf32> to vector<32x4xf32>
    %c0_9 = arith.constant 0 : index
    %c0_10 = arith.constant 0 : index
    %27 = vector.load %arg4[%c0_9, %c0_10] : memref<32x4xf32, #tpu.memory_space<vmem>>, vector<32x4xf32>
    %cst_11 = arith.constant 5.000000e-01 : f32
    %28 = vector.broadcast %cst_11 : f32 to vector<32x4xf32>
    %29 = arith.mulf %28, %26 : vector<32x4xf32>
    %30 = math.exp %29 : vector<32x4xf32>
    %31 = arith.mulf %27, %30 : vector<32x4xf32>
    %32 = arith.addf %25, %31 : vector<32x4xf32>
    %c0_12 = arith.constant 0 : index
    %c0_13 = arith.constant 0 : index
    %33 = vector.load %arg5[%c0_12, %c0_13] : memref<32x4xf32, #tpu.memory_space<vmem>>, vector<32x4xf32>
    tpu.vector_store %arg5[%c0_12, %c0_13], %32 {strides = array<i32>} : memref<32x4xf32, #tpu.memory_space<vmem>>, vector<32x4xf32>,
    return
  }
  func.func @transform_0(%arg0: i32) -> (i32, i32) {
    %c0_i32 = arith.constant 0 : i32
    %c0_i32_0 = arith.constant 0 : i32
    %c0_i32_1 = arith.constant 0 : i32
    return %c0_i32, %c0_i32_0 : i32, i32
  }
  func.func @transform_1(%arg0: i32) -> (i32, i32) {
    %c0_i32 = arith.constant 0 : i32
    %c0_i32_0 = arith.constant 0 : i32
    %c0_i32_1 = arith.constant 0 : i32
    return %c0_i32, %c0_i32_0 : i32, i32
  }
  func.func @transform_2(%arg0: i32) -> (i32, i32) {
    %c0_i32 = arith.constant 0 : i32
    %c0_i32_0 = arith.constant 0 : i32
    %c0_i32_1 = arith.constant 0 : i32
    return %c0_i32, %c0_i32_0 : i32, i32
  }
  func.func @transform_3(%arg0: i32) -> (i32, i32) {
    %c0_i32 = arith.constant 0 : i32
    %c0_i32_0 = arith.constant 0 : i32
    %c0_i32_1 = arith.constant 0 : i32
    return %c0_i32, %c0_i32_0 : i32, i32
  }
  func.func @transform_4(%arg0: i32) -> (i32, i32) {
    %c0_i32 = arith.constant 0 : i32
    %c0_i32_0 = arith.constant 0 : i32
    %c0_i32_1 = arith.constant 0 : i32
    return %c0_i32, %c0_i32_0 : i32, i32
  }
}

module attributes {stable_mosaic.version = 11 : i64} {
  func.func @_matmul_bias_act_kernel(%arg0: i32, %arg1: memref<32x16xbf16, #tpu.memory_space<vmem>>, %arg2: memref<16x512xbf16, #tpu.memory_space<vmem>>, %arg3: memref<1x512xf32, #tpu.memory_space<vmem>>, %arg4: memref<32x512xf32, #tpu.memory_space<vmem>>) attributes {dimension_semantics = [#tpu.dimension_semantics<parallel>], iteration_bounds = array<i64: 1>, scalar_prefetch = 0 : i64, scratch_operands = 0 : i64, tpu.core_type = #tpu.core_type<tc>, window_params = [{transform_indices = @transform_0, window_bounds = array<i64: 32, 16>}, {pipeline_mode = #tpu.pipeline_mode<synchronous>, transform_indices = @transform_1, window_bounds = array<i64: 16, 512>}, {pipeline_mode = #tpu.pipeline_mode<synchronous>, transform_indices = @transform_2, window_bounds = array<i64: 1, 512>}, {transform_indices = @transform_3, window_bounds = array<i64: 32, 512>}]} {
    %c0 = arith.constant 0 : index
    %c0_0 = arith.constant 0 : index
    %0 = vector.load %arg1[%c0, %c0_0] : memref<32x16xbf16, #tpu.memory_space<vmem>>, vector<32x16xbf16>
    %c0_1 = arith.constant 0 : index
    %c0_2 = arith.constant 0 : index
    %1 = vector.load %arg2[%c0_1, %c0_2] : memref<16x512xbf16, #tpu.memory_space<vmem>>, vector<16x512xbf16>
    %cst = arith.constant dense<0.000000e+00> : vector<32x512xf32>
    %2 = tpu.matmul %0, %1, %cst {dimension_numbers = #tpu.dot_dimension_numbers<[1], [0], [0], [1], [0, 0, 1, 1], [], []>} : vector<32x16xbf16>, vector<16x512xbf16>, vector<32x512xf32> -> vector<32x512xf32>
    %c0_3 = arith.constant 0 : index
    %c0_4 = arith.constant 0 : index
    %3 = vector.load %arg3[%c0_3, %c0_4] : memref<1x512xf32, #tpu.memory_space<vmem>>, vector<1x512xf32>
    %4 = vector.broadcast %3 : vector<1x512xf32> to vector<32x512xf32>
    %5 = arith.addf %2, %4 : vector<32x512xf32>
    %c0_5 = arith.constant 0 : index
    %c0_6 = arith.constant 0 : index
    %6 = vector.load %arg4[%c0_5, %c0_6] : memref<32x512xf32, #tpu.memory_space<vmem>>, vector<32x512xf32>
    tpu.vector_store %arg4[%c0_5, %c0_6], %5 {strides = array<i32>} : memref<32x512xf32, #tpu.memory_space<vmem>>, vector<32x512xf32>,
    return
  }
  func.func @transform_0(%arg0: i32) -> (i32, i32) {
    %c0_i32 = arith.constant 0 : i32
    %c0_i32_0 = arith.constant 0 : i32
    return %arg0, %c0_i32 : i32, i32
  }
  func.func @transform_1(%arg0: i32) -> (i32, i32) {
    %c0_i32 = arith.constant 0 : i32
    %c0_i32_0 = arith.constant 0 : i32
    %c0_i32_1 = arith.constant 0 : i32
    return %c0_i32, %c0_i32_0 : i32, i32
  }
  func.func @transform_2(%arg0: i32) -> (i32, i32) {
    %c0_i32 = arith.constant 0 : i32
    %c0_i32_0 = arith.constant 0 : i32
    %c0_i32_1 = arith.constant 0 : i32
    return %c0_i32, %c0_i32_0 : i32, i32
  }
  func.func @transform_3(%arg0: i32) -> (i32, i32) {
    %c0_i32 = arith.constant 0 : i32
    %c0_i32_0 = arith.constant 0 : i32
    return %arg0, %c0_i32 : i32, i32
  }
}

module attributes {stable_mosaic.version = 11 : i64} {
  func.func @_bn_relu_res_kernel(%arg0: i32, %arg1: memref<32x512xf32, #tpu.memory_space<vmem>>, %arg2: memref<1x512xf32, #tpu.memory_space<vmem>>, %arg3: memref<1x512xf32, #tpu.memory_space<vmem>>, %arg4: memref<32x512xf32, #tpu.memory_space<vmem>>) attributes {dimension_semantics = [#tpu.dimension_semantics<parallel>], iteration_bounds = array<i64: 1>, scalar_prefetch = 0 : i64, scratch_operands = 0 : i64, tpu.core_type = #tpu.core_type<tc>, window_params = [{transform_indices = @transform_0, window_bounds = array<i64: 32, 512>}, {pipeline_mode = #tpu.pipeline_mode<synchronous>, transform_indices = @transform_1, window_bounds = array<i64: 1, 512>}, {pipeline_mode = #tpu.pipeline_mode<synchronous>, transform_indices = @transform_2, window_bounds = array<i64: 1, 512>}, {transform_indices = @transform_3, window_bounds = array<i64: 32, 512>}]} {
    %c0 = arith.constant 0 : index
    %c0_0 = arith.constant 0 : index
    %0 = vector.load %arg1[%c0, %c0_0] : memref<32x512xf32, #tpu.memory_space<vmem>>, vector<32x512xf32>
    %c0_1 = arith.constant 0 : index
    %c0_2 = arith.constant 0 : index
    %1 = vector.load %arg2[%c0_1, %c0_2] : memref<1x512xf32, #tpu.memory_space<vmem>>, vector<1x512xf32>
    %2 = vector.broadcast %1 : vector<1x512xf32> to vector<32x512xf32>
    %3 = arith.mulf %0, %2 : vector<32x512xf32>
    %c0_3 = arith.constant 0 : index
    %c0_4 = arith.constant 0 : index
    %4 = vector.load %arg3[%c0_3, %c0_4] : memref<1x512xf32, #tpu.memory_space<vmem>>, vector<1x512xf32>
    %5 = vector.broadcast %4 : vector<1x512xf32> to vector<32x512xf32>
    %6 = arith.addf %3, %5 : vector<32x512xf32>
    %cst = arith.constant 0.000000e+00 : f32
    %7 = vector.broadcast %cst : f32 to vector<32x512xf32>
    %8 = arith.maximumf %6, %7 : vector<32x512xf32>
    %9 = arith.addf %0, %8 : vector<32x512xf32>
    %c0_5 = arith.constant 0 : index
    %c0_6 = arith.constant 0 : index
    %10 = vector.load %arg4[%c0_5, %c0_6] : memref<32x512xf32, #tpu.memory_space<vmem>>, vector<32x512xf32>
    tpu.vector_store %arg4[%c0_5, %c0_6], %9 {strides = array<i32>} : memref<32x512xf32, #tpu.memory_space<vmem>>, vector<32x512xf32>,
    return
  }
  func.func @transform_0(%arg0: i32) -> (i32, i32) {
    %c0_i32 = arith.constant 0 : i32
    %c0_i32_0 = arith.constant 0 : i32
    return %arg0, %c0_i32 : i32, i32
  }
  func.func @transform_1(%arg0: i32) -> (i32, i32) {
    %c0_i32 = arith.constant 0 : i32
    %c0_i32_0 = arith.constant 0 : i32
    %c0_i32_1 = arith.constant 0 : i32
    return %c0_i32, %c0_i32_0 : i32, i32
  }
  func.func @transform_2(%arg0: i32) -> (i32, i32) {
    %c0_i32 = arith.constant 0 : i32
    %c0_i32_0 = arith.constant 0 : i32
    %c0_i32_1 = arith.constant 0 : i32
    return %c0_i32, %c0_i32_0 : i32, i32
  }
  func.func @transform_3(%arg0: i32) -> (i32, i32) {
    %c0_i32 = arith.constant 0 : i32
    %c0_i32_0 = arith.constant 0 : i32
    return %arg0, %c0_i32 : i32, i32
  }
}

module attributes {stable_mosaic.version = 11 : i64} {
  func.func @_matmul_bias_act_kernel(%arg0: i32, %arg1: memref<128x512xbf16, #tpu.memory_space<vmem>>, %arg2: memref<512x256xbf16, #tpu.memory_space<vmem>>, %arg3: memref<1x256xf32, #tpu.memory_space<vmem>>, %arg4: memref<128x256xf32, #tpu.memory_space<vmem>>) attributes {dimension_semantics = [#tpu.dimension_semantics<parallel>], iteration_bounds = array<i64: 1>, scalar_prefetch = 0 : i64, scratch_operands = 0 : i64, tpu.core_type = #tpu.core_type<tc>, window_params = [{transform_indices = @transform_0, window_bounds = array<i64: 128, 512>}, {pipeline_mode = #tpu.pipeline_mode<synchronous>, transform_indices = @transform_1, window_bounds = array<i64: 512, 256>}, {pipeline_mode = #tpu.pipeline_mode<synchronous>, transform_indices = @transform_2, window_bounds = array<i64: 1, 256>}, {transform_indices = @transform_3, window_bounds = array<i64: 128, 256>}]} {
    %c0 = arith.constant 0 : index
    %c0_0 = arith.constant 0 : index
    %0 = vector.load %arg1[%c0, %c0_0] : memref<128x512xbf16, #tpu.memory_space<vmem>>, vector<128x512xbf16>
    %c0_1 = arith.constant 0 : index
    %c0_2 = arith.constant 0 : index
    %1 = vector.load %arg2[%c0_1, %c0_2] : memref<512x256xbf16, #tpu.memory_space<vmem>>, vector<512x256xbf16>
    %cst = arith.constant dense<0.000000e+00> : vector<128x256xf32>
    %2 = tpu.matmul %0, %1, %cst {dimension_numbers = #tpu.dot_dimension_numbers<[1], [0], [0], [1], [0, 0, 1, 1], [], []>} : vector<128x512xbf16>, vector<512x256xbf16>, vector<128x256xf32> -> vector<128x256xf32>
    %c0_3 = arith.constant 0 : index
    %c0_4 = arith.constant 0 : index
    %3 = vector.load %arg3[%c0_3, %c0_4] : memref<1x256xf32, #tpu.memory_space<vmem>>, vector<1x256xf32>
    %4 = vector.broadcast %3 : vector<1x256xf32> to vector<128x256xf32>
    %5 = arith.addf %2, %4 : vector<128x256xf32>
    %c0_5 = arith.constant 0 : index
    %c0_6 = arith.constant 0 : index
    %6 = vector.load %arg4[%c0_5, %c0_6] : memref<128x256xf32, #tpu.memory_space<vmem>>, vector<128x256xf32>
    tpu.vector_store %arg4[%c0_5, %c0_6], %5 {strides = array<i32>} : memref<128x256xf32, #tpu.memory_space<vmem>>, vector<128x256xf32>,
    return
  }
  func.func @transform_0(%arg0: i32) -> (i32, i32) {
    %c0_i32 = arith.constant 0 : i32
    %c0_i32_0 = arith.constant 0 : i32
    return %arg0, %c0_i32 : i32, i32
  }
  func.func @transform_1(%arg0: i32) -> (i32, i32) {
    %c0_i32 = arith.constant 0 : i32
    %c0_i32_0 = arith.constant 0 : i32
    %c0_i32_1 = arith.constant 0 : i32
    return %c0_i32, %c0_i32_0 : i32, i32
  }
  func.func @transform_2(%arg0: i32) -> (i32, i32) {
    %c0_i32 = arith.constant 0 : i32
    %c0_i32_0 = arith.constant 0 : i32
    %c0_i32_1 = arith.constant 0 : i32
    return %c0_i32, %c0_i32_0 : i32, i32
  }
  func.func @transform_3(%arg0: i32) -> (i32, i32) {
    %c0_i32 = arith.constant 0 : i32
    %c0_i32_0 = arith.constant 0 : i32
    return %arg0, %c0_i32 : i32, i32
  }
}

module attributes {stable_mosaic.version = 11 : i64} {
  func.func @_bn_relu_res_kernel(%arg0: i32, %arg1: memref<128x256xf32, #tpu.memory_space<vmem>>, %arg2: memref<1x256xf32, #tpu.memory_space<vmem>>, %arg3: memref<1x256xf32, #tpu.memory_space<vmem>>, %arg4: memref<128x256xf32, #tpu.memory_space<vmem>>) attributes {dimension_semantics = [#tpu.dimension_semantics<parallel>], iteration_bounds = array<i64: 1>, scalar_prefetch = 0 : i64, scratch_operands = 0 : i64, tpu.core_type = #tpu.core_type<tc>, window_params = [{transform_indices = @transform_0, window_bounds = array<i64: 128, 256>}, {pipeline_mode = #tpu.pipeline_mode<synchronous>, transform_indices = @transform_1, window_bounds = array<i64: 1, 256>}, {pipeline_mode = #tpu.pipeline_mode<synchronous>, transform_indices = @transform_2, window_bounds = array<i64: 1, 256>}, {transform_indices = @transform_3, window_bounds = array<i64: 128, 256>}]} {
    %c0 = arith.constant 0 : index
    %c0_0 = arith.constant 0 : index
    %0 = vector.load %arg1[%c0, %c0_0] : memref<128x256xf32, #tpu.memory_space<vmem>>, vector<128x256xf32>
    %c0_1 = arith.constant 0 : index
    %c0_2 = arith.constant 0 : index
    %1 = vector.load %arg2[%c0_1, %c0_2] : memref<1x256xf32, #tpu.memory_space<vmem>>, vector<1x256xf32>
    %2 = vector.broadcast %1 : vector<1x256xf32> to vector<128x256xf32>
    %3 = arith.mulf %0, %2 : vector<128x256xf32>
    %c0_3 = arith.constant 0 : index
    %c0_4 = arith.constant 0 : index
    %4 = vector.load %arg3[%c0_3, %c0_4] : memref<1x256xf32, #tpu.memory_space<vmem>>, vector<1x256xf32>
    %5 = vector.broadcast %4 : vector<1x256xf32> to vector<128x256xf32>
    %6 = arith.addf %3, %5 : vector<128x256xf32>
    %cst = arith.constant 0.000000e+00 : f32
    %7 = vector.broadcast %cst : f32 to vector<128x256xf32>
    %8 = arith.maximumf %6, %7 : vector<128x256xf32>
    %9 = arith.addf %0, %8 : vector<128x256xf32>
    %c0_5 = arith.constant 0 : index
    %c0_6 = arith.constant 0 : index
    %10 = vector.load %arg4[%c0_5, %c0_6] : memref<128x256xf32, #tpu.memory_space<vmem>>, vector<128x256xf32>
    tpu.vector_store %arg4[%c0_5, %c0_6], %9 {strides = array<i32>} : memref<128x256xf32, #tpu.memory_space<vmem>>, vector<128x256xf32>,
    return
  }
  func.func @transform_0(%arg0: i32) -> (i32, i32) {
    %c0_i32 = arith.constant 0 : i32
    %c0_i32_0 = arith.constant 0 : i32
    return %arg0, %c0_i32 : i32, i32
  }
  func.func @transform_1(%arg0: i32) -> (i32, i32) {
    %c0_i32 = arith.constant 0 : i32
    %c0_i32_0 = arith.constant 0 : i32
    %c0_i32_1 = arith.constant 0 : i32
    return %c0_i32, %c0_i32_0 : i32, i32
  }
  func.func @transform_2(%arg0: i32) -> (i32, i32) {
    %c0_i32 = arith.constant 0 : i32
    %c0_i32_0 = arith.constant 0 : i32
    %c0_i32_1 = arith.constant 0 : i32
    return %c0_i32, %c0_i32_0 : i32, i32
  }
  func.func @transform_3(%arg0: i32) -> (i32, i32) {
    %c0_i32 = arith.constant 0 : i32
    %c0_i32_0 = arith.constant 0 : i32
    return %arg0, %c0_i32 : i32, i32
  }
}

module attributes {stable_mosaic.version = 11 : i64} {
  func.func @_matmul_bias_act_kernel(%arg0: i32, %arg1: memref<512x256xbf16, #tpu.memory_space<vmem>>, %arg2: memref<256x128xbf16, #tpu.memory_space<vmem>>, %arg3: memref<1x128xf32, #tpu.memory_space<vmem>>, %arg4: memref<512x128xf32, #tpu.memory_space<vmem>>) attributes {dimension_semantics = [#tpu.dimension_semantics<parallel>], iteration_bounds = array<i64: 1>, scalar_prefetch = 0 : i64, scratch_operands = 0 : i64, tpu.core_type = #tpu.core_type<tc>, window_params = [{transform_indices = @transform_0, window_bounds = array<i64: 512, 256>}, {pipeline_mode = #tpu.pipeline_mode<synchronous>, transform_indices = @transform_1, window_bounds = array<i64: 256, 128>}, {pipeline_mode = #tpu.pipeline_mode<synchronous>, transform_indices = @transform_2, window_bounds = array<i64: 1, 128>}, {transform_indices = @transform_3, window_bounds = array<i64: 512, 128>}]} {
    %c0 = arith.constant 0 : index
    %c0_0 = arith.constant 0 : index
    %0 = vector.load %arg1[%c0, %c0_0] : memref<512x256xbf16, #tpu.memory_space<vmem>>, vector<512x256xbf16>
    %c0_1 = arith.constant 0 : index
    %c0_2 = arith.constant 0 : index
    %1 = vector.load %arg2[%c0_1, %c0_2] : memref<256x128xbf16, #tpu.memory_space<vmem>>, vector<256x128xbf16>
    %cst = arith.constant dense<0.000000e+00> : vector<512x128xf32>
    %2 = tpu.matmul %0, %1, %cst {dimension_numbers = #tpu.dot_dimension_numbers<[1], [0], [0], [1], [0, 0, 1, 1], [], []>} : vector<512x256xbf16>, vector<256x128xbf16>, vector<512x128xf32> -> vector<512x128xf32>
    %c0_3 = arith.constant 0 : index
    %c0_4 = arith.constant 0 : index
    %3 = vector.load %arg3[%c0_3, %c0_4] : memref<1x128xf32, #tpu.memory_space<vmem>>, vector<1x128xf32>
    %4 = vector.broadcast %3 : vector<1x128xf32> to vector<512x128xf32>
    %5 = arith.addf %2, %4 : vector<512x128xf32>
    %6 = arith.negf %5 : vector<512x128xf32>
    %7 = math.exp %6 : vector<512x128xf32>
    %cst_5 = arith.constant 1.000000e+00 : f32
    %8 = vector.broadcast %cst_5 : f32 to vector<512x128xf32>
    %9 = arith.addf %8, %7 : vector<512x128xf32>
    %10 = arith.divf %8, %9 : vector<512x128xf32>
    %c0_6 = arith.constant 0 : index
    %c0_7 = arith.constant 0 : index
    %11 = vector.load %arg4[%c0_6, %c0_7] : memref<512x128xf32, #tpu.memory_space<vmem>>, vector<512x128xf32>
    tpu.vector_store %arg4[%c0_6, %c0_7], %10 {strides = array<i32>} : memref<512x128xf32, #tpu.memory_space<vmem>>, vector<512x128xf32>,
    return
  }
  func.func @transform_0(%arg0: i32) -> (i32, i32) {
    %c0_i32 = arith.constant 0 : i32
    %c0_i32_0 = arith.constant 0 : i32
    return %arg0, %c0_i32 : i32, i32
  }
  func.func @transform_1(%arg0: i32) -> (i32, i32) {
    %c0_i32 = arith.constant 0 : i32
    %c0_i32_0 = arith.constant 0 : i32
    %c0_i32_1 = arith.constant 0 : i32
    return %c0_i32, %c0_i32_0 : i32, i32
  }
  func.func @transform_2(%arg0: i32) -> (i32, i32) {
    %c0_i32 = arith.constant 0 : i32
    %c0_i32_0 = arith.constant 0 : i32
    %c0_i32_1 = arith.constant 0 : i32
    return %c0_i32, %c0_i32_0 : i32, i32
  }
  func.func @transform_3(%arg0: i32) -> (i32, i32) {
    %c0_i32 = arith.constant 0 : i32
    %c0_i32_0 = arith.constant 0 : i32
    return %arg0, %c0_i32 : i32, i32
  }
}

</mosaic_0001>

<bundles_post_ra>
// kernel: tile.38
= control target key start
LH: loop header
LB: loop body
LE: loop exit
PB: predicated region body
PF: predicated region fallthrough
CT: control target
= control target key end

     0   :  { %2 = vsyncpa [#allocation1], 0  ;;  %s48_s8 = smov [#allocation0]   ;;  %s65_s0 = inlined_call_operand.hbm [shape: f32[128], index: 0, kind: input, shape index: {}]   ;;  %s66_s1 = inlined_call_operand.vmem [shape: f32[4,128], index: 1, kind: output, shape index: {}]  }
   0x1   :  { %s8_s0 = sshll.u32 %s65_s0, 4  ;;  %s10_s9 = sshll.u32 %s48_s8, 4  ;;  %s9_s0 = int_to_ptr.hbm [resolvable:$true] %s8_s0  ;;  %s11_s9 = int_to_ptr.vmem [resolvable:$true] %s10_s9 }
   0x2   :  { %13 = dma.hbm_to_vmem [thread:$0]  %s9_s0, 16, %s11_s9, [#allocation1]  }
   0x3   :  { %46 = dma.done.wait [#allocation1], 16  }
   0x4   :  { %47 = vsyncadd [#allocation1], 4294967280  ;;  %v18_v0 = vld [vmem:[#allocation0] ss:$0 sm:$0xff] }
   0x5   :  { %19 = vst [vmem:[%s66_s1] sm:$0xf] %v18_v0 }
   0x6   :  { %20 = vsyncpa [#allocation1], 1 }

// kernel: tile.53
= control target key start
LH: loop header
LB: loop body
LE: loop exit
PB: predicated region body
PF: predicated region fallthrough
CT: control target
= control target key end

     0   :  { %2 = vsyncpa [#allocation1], 0  ;;  %s48_s8 = smov [#allocation0]   ;;  %s65_s0 = inlined_call_operand.hbm [shape: f32[64], index: 0, kind: input, shape index: {}]   ;;  %s66_s1 = inlined_call_operand.vmem [shape: f32[4,64], index: 1, kind: output, shape index: {}]  }
   0x1   :  { %s8_s0 = sshll.u32 %s65_s0, 4  ;;  %s10_s9 = sshll.u32 %s48_s8, 4  ;;  %s9_s0 = int_to_ptr.hbm [resolvable:$true] %s8_s0  ;;  %s11_s9 = int_to_ptr.vmem [resolvable:$true] %s10_s9 }
   0x2   :  { %13 = dma.hbm_to_vmem [thread:$0]  %s9_s0, 16, %s11_s9, [#allocation1]  }
   0x3   :  { %46 = dma.done.wait [#allocation1], 16  }
   0x4   :  { %47 = vsyncadd [#allocation1], 4294967280  ;;  %v18_v0 = vld [vmem:[#allocation0] ss:$0 sm:$0xff] }
   0x5   :  { %19 = vst [vmem:[%s66_s1] sm:$0xf] %v18_v0 }
   0x6   :  { %20 = vsyncpa [#allocation1], 1 }

// kernel: tile.54
= control target key start
LH: loop header
LB: loop body
LE: loop exit
PB: predicated region body
PF: predicated region fallthrough
CT: control target
= control target key end

     0   :  { %s6_s8 = smov 3  ;;  %vm8_vm0 = vcmask 523264   ;;  %s31_s9 = smov 64   ;;  %vm15_vm1 = vcmask 1048064   ;;  %s51_s0 = inlined_call_operand.vmem [shape: f32[4,64], index: 0, kind: input, shape index: {}]   ;;  %s52_s1 = inlined_call_operand.vmem [shape: f32[1,256], index: 1, kind: output, shape index: {}]  }
   0x1   :  { %v4_v0 = vld [vmem:[%s51_s0] sm:$0xf]  ;;  %s11_s0 = smov 3 }
   0x2   :  { %5 = vst [vmem:[#allocation1] sm:$0xf] %v4_v0 }
   0x9   :  { %v12_v1 = vld [vmem:[#allocation1 + $0x1] ss:$2 sm:%s11_s0]   ;;  %v7_v2 = vld [vmem:[#allocation1] ss:$2 sm:%s6_s8]  }
   0xa   :  { %13 = vrot.lane.b32.xlu0 %v12_v1, %s31_s9  ;;  %9 = vst.msk [vmem:[#allocation0] ss:$8 sm:$0x3] %vm8_vm0, %v7_v2  }
  0x7c   :  { %v14_v3 = vpop.permute.xlu0 %13  }
  0x7d   :  { %16 = vst.msk [vmem:[#allocation0] ss:$8 sm:$0x3] %vm15_vm1, %v14_v3  }
  0x84   :  { %v19_v4 = vld [vmem:[#allocation0] sm:$0x1]  ;;  %v24_v5 = vld [vmem:[#allocation0 + $0x8] sm:$0x1] }
  0x85   :  { %22 = vst [vmem:[%s52_s1] sm:$0x1] %v19_v4 }
  0x86   :  { %29 = vst [vmem:[%s52_s1 + $0x1] sm:$0x1] %v24_v5 }

// kernel: tile.68
= control target key start
LH: loop header
LB: loop body
LE: loop exit
PB: predicated region body
PF: predicated region fallthrough
CT: control target
= control target key end

     0   :  { %2 = vsyncpa [#allocation1], 0  ;;  %s48_s8 = smov [#allocation0]   ;;  %s65_s0 = inlined_call_operand.hbm [shape: f32[3], index: 0, kind: input, shape index: {}]   ;;  %s66_s1 = inlined_call_operand.vmem [shape: f32[4,3], index: 1, kind: output, shape index: {}]  }
   0x1   :  { %s8_s0 = sshll.u32 %s65_s0, 4  ;;  %s10_s9 = sshll.u32 %s48_s8, 4  ;;  %s9_s0 = int_to_ptr.hbm [resolvable:$true] %s8_s0  ;;  %s11_s9 = int_to_ptr.vmem [resolvable:$true] %s10_s9 }
   0x2   :  { %13 = dma.hbm_to_vmem [thread:$0]  %s9_s0, 16, %s11_s9, [#allocation1]  }
   0x3   :  { %46 = dma.done.wait [#allocation1], 16  }
   0x4   :  { %47 = vsyncadd [#allocation1], 4294967280  ;;  %v18_v0 = vld [vmem:[#allocation0] ss:$0 sm:$0xff] }
   0x5   :  { %19 = vst [vmem:[%s66_s1] sm:$0xf] %v18_v0 }
   0x6   :  { %20 = vsyncpa [#allocation1], 1 }

// kernel: tile.69
= control target key start
LH: loop header
LB: loop body
LE: loop exit
PB: predicated region body
PF: predicated region fallthrough
CT: control target
= control target key end

     0   :  { %s37_s8 = smov 3   ;;  %s38_s9 = smov 6   ;;  %vm7_vm0 = vcmask 23552   ;;  %vm13_vm1 = vcmask 97352   ;;  %vm19_vm2 = vcmask 72752   ;;  %vm25_vm3 = vcmask 48152   ;;  %s55_s0 = inlined_call_operand.vmem [shape: f32[4,3], index: 0, kind: input, shape index: {}]   ;;  %s56_s1 = inlined_call_operand.vmem [shape: f32[12], index: 1, kind: output, shape index: {}]  }
   0x1   :  { %v4_v0 = vld [vmem:[%s55_s0] sm:$0xf]  ;;  %s36_s0 = smov 9  }
   0x2   :  { %5 = vst [vmem:[#allocation1] sm:$0xf] %v4_v0 }
   0x9   :  { %v10_v1 = vld [vmem:[#allocation1 + $0x3] sm:$0x1]   ;;  %v22_v2 = vld [vmem:[#allocation1 + $0x1] sm:$0x1]   ;;  %v16_v3 = vld [vmem:[#allocation1 + $0x2] sm:$0x1]  }
   0xa   :  { %11 = vrot.lane.b32.xlu0 %v10_v1, %s36_s0  ;;  %23 = vrot.lane.b32.xlu1 %v22_v2, %s37_s8  ;;  %v6_v4 = vld [vmem:[#allocation1] sm:$0x1]  }
   0xb   :  { %8 = vst.msk [vmem:[#allocation0] sm:$0x1] %vm7_vm0, %v6_v4  }
  0x12   :  { %17 = vrot.lane.b32.xlu0 %v16_v3, %s38_s9 }
  0x7c   :  { %v12_v5 = vpop.permute.xlu0 %11   ;;  %v24_v6 = vpop.permute.xlu1 %23  }
  0x7d   :  { %14 = vst.msk [vmem:[#allocation0] sm:$0x1] %vm13_vm1, %v12_v5  }
  0x84   :  { %v18_v7 = vpop.permute.xlu0 %17  }
  0x85   :  { %20 = vst.msk [vmem:[#allocation0] sm:$0x1] %vm19_vm2, %v18_v7  }
  0x86   :  { %26 = vst.msk [vmem:[#allocation0] sm:$0x1] %vm25_vm3, %v24_v6  }
  0x8d   :  { %v29_v8 = vld [vmem:[#allocation0] sm:$0x1] }
  0x8e   :  { %32 = vst [vmem:[%s56_s1] sm:$0x1] %v29_v8 }

// kernel: vae_forward.8
= control target key start
LH: loop header
LB: loop body
LE: loop exit
PB: predicated region body
PF: predicated region fallthrough
CT: control target
= control target key end

     0   :  { %vm115_vm0 = vcmask 1044480   ;;  %vm116_vm1 = vcmask 1045504   ;;  %v273_v2 = vmov 65535   ;;  %vm90_vm2 = vcmask 220160   ;;  %s386_s1 = inlined_call_operand.vmem [shape: bf16[27,128], index: 1, kind: input, shape index: {}]   ;;  %s387_s2 = inlined_call_operand.vmem [shape: f32[1,128], index: 2, kind: input, shape index: {}]   ;;  %s388_s0 = inlined_call_operand.vmem [shape: bf16[128,27], index: 0, kind: input, shape index: {}]   ;;  %s389_s3 = inlined_call_operand.vmem [shape: f32[128,128], index: 3, kind: output, shape index: {}]  }
   0x1   :  { %v245_v0 = vld [vmem:[%s386_s1 + $0x8] sm:$0xf]  ;;  %v264_v1 = vld [vmem:[%s386_s1 + $0x8] sm:$0x30]  ;;  %v117_v3 = vsel %vm115_vm0, 4294967295, %v273_v2  ;;  %v263_v7 = vld [vmem:[%s386_s1] sm:$0xff] }
   0x2   :  { %v246_v4 = vor.u32 %v264_v1, %v245_v0  ;;  %v118_v5 = vsel %vm116_vm1, %v117_v3, 0  ;;  %v255_v8 = vld [vmem:[%s388_s0] sm:$0xff]  ;;  %v257_v9 = vld [vmem:[%s388_s0 + $0x10] sm:$0xff]  ;;  %v256_v12 = vld [vmem:[%s388_s0 + $0x8] sm:$0xff] }
   0x3   :  { %v259_v10 = vld [vmem:[%s388_s0 + $0x20] sm:$0xff]  ;;  %v261_v11 = vld [vmem:[%s388_s0 + $0x30] sm:$0xff]  ;;  %v258_v13 = vld [vmem:[%s388_s0 + $0x18] sm:$0xff] }
   0x4   :  { %v120_v6 = vand.u32 %v246_v4, %v118_v5  ;;  %v260_v14 = vld [vmem:[%s388_s0 + $0x28] sm:$0xff]  ;;  %v262_v15 = vld [vmem:[%s388_s0 + $0x38] sm:$0xff]  ;;  %v272_v16 = vld [vmem:[%s387_s2] ss:$0 sm:$0xff] }
   0x6   :  { %128 = vmatpush.bf16.msra.mxu0 %v120_v6  ;;  %265 = vmatpush.bf16.msra.mxu1 %v120_v6 }
   0x7   :  { %266 = vmatpush.bf16.msra.mxu2 %v120_v6  ;;  %267 = vmatpush.bf16.msra.mxu3 %v120_v6 }
   0xa   :  { %129 = vmatpush.bf16.msra.mxu0 %v263_v7  ;;  %268 = vmatpush.bf16.msra.mxu1 %v263_v7 }
   0xb   :  { %269 = vmatpush.bf16.msra.mxu2 %v263_v7  ;;  %270 = vmatpush.bf16.msra.mxu3 %v263_v7 }
   0xd   :  { %247 = vmatmul.msk.bf16.vlgmr.msra.gmra.mxu0 %vm90_vm2, %v255_v8  ;;  %249 = vmatmul.msk.bf16.vlgmr.msra.gmra.mxu1 %vm90_vm2, %v257_v9 }
   0xe   :  { %251 = vmatmul.msk.bf16.vlgmr.msra.gmra.mxu2 %vm90_vm2, %v259_v10  ;;  %253 = vmatmul.msk.bf16.vlgmr.msra.gmra.mxu3 %vm90_vm2, %v261_v11 }
  0x1d   :  { %248 = vmatmul.msk.bf16.gmra.mxu0 %vm90_vm2, %v256_v12  ;;  %250 = vmatmul.msk.bf16.gmra.mxu1 %vm90_vm2, %v258_v13 }
  0x1e   :  { %252 = vmatmul.msk.bf16.gmra.mxu2 %vm90_vm2, %v260_v14  ;;  %254 = vmatmul.msk.bf16.gmra.mxu3 %vm90_vm2, %v262_v15 }
  0x8a   :  { %v131_v17 = vpop.f32.mrf.mxu0  ;;  %v141_v18 = vpop.f32.mrf.mxu1 }
  0x8b   :  { %v132_v19 = vadd.f32 %v272_v16, %v131_v17  ;;  %v142_v20 = vadd.f32 %v272_v16, %v141_v18 }
  0x8d   :  { %v171_v21 = vmax.f32 %v132_v19, 0.0  ;;  %v175_v22 = vmax.f32 %v142_v20, 0.0 }
  0x8f   :  { %187 = vst [vmem:[%s389_s3] sm:$0xff] %v171_v21 }
  0x90   :  { %191 = vst [vmem:[%s389_s3 + $0x20] sm:$0xff] %v175_v22 }
  0x91   :  { %v151_v23 = vpop.f32.mrf.mxu2  ;;  %v161_v24 = vpop.f32.mrf.mxu3 }
  0x92   :  { %v152_v25 = vadd.f32 %v272_v16, %v151_v23  ;;  %v162_v26 = vadd.f32 %v272_v16, %v161_v24  ;;  %v133_v27 = vpop.f32.mrf.mxu0  ;;  %v143_v28 = vpop.f32.mrf.mxu1 }
  0x93   :  { %v134_v29 = vadd.f32 %v272_v16, %v133_v27  ;;  %v144_v30 = vadd.f32 %v272_v16, %v143_v28 }
  0x94   :  { %v179_v31 = vmax.f32 %v152_v25, 0.0  ;;  %v183_v32 = vmax.f32 %v162_v26, 0.0 }
  0x95   :  { %v172_v33 = vmax.f32 %v134_v29, 0.0  ;;  %v176_v34 = vmax.f32 %v144_v30, 0.0 }
  0x96   :  { %195 = vst [vmem:[%s389_s3 + $0x40] sm:$0xff] %v179_v31 }
  0x97   :  { %199 = vst [vmem:[%s389_s3 + $0x60] sm:$0xff] %v183_v32 }
  0x98   :  { %188 = vst [vmem:[%s389_s3 + $0x8] sm:$0xff] %v172_v33 }
  0x99   :  { %192 = vst [vmem:[%s389_s3 + $0x28] sm:$0xff] %v176_v34  ;;  %v153_v35 = vpop.f32.mrf.mxu2  ;;  %v163_v36 = vpop.f32.mrf.mxu3 }
  0x9a   :  { %v154_v37 = vadd.f32 %v272_v16, %v153_v35  ;;  %v164_v38 = vadd.f32 %v272_v16, %v163_v36  ;;  %v136_v39 = vpop.f32.mrf.mxu0  ;;  %v146_v40 = vpop.f32.mrf.mxu1 }
  0x9b   :  { %v137_v41 = vadd.f32 %v272_v16, %v136_v39  ;;  %v147_v42 = vadd.f32 %v272_v16, %v146_v40 }
  0x9c   :  { %v180_v43 = vmax.f32 %v154_v37, 0.0  ;;  %v184_v44 = vmax.f32 %v164_v38, 0.0 }
  0x9d   :  { %v173_v45 = vmax.f32 %v137_v41, 0.0  ;;  %v177_v46 = vmax.f32 %v147_v42, 0.0 }
  0x9e   :  { %196 = vst [vmem:[%s389_s3 + $0x48] sm:$0xff] %v180_v43 }
  0x9f   :  { %200 = vst [vmem:[%s389_s3 + $0x68] sm:$0xff] %v184_v44 }
  0xa0   :  { %189 = vst [vmem:[%s389_s3 + $0x10] sm:$0xff] %v173_v45 }
  0xa1   :  { %193 = vst [vmem:[%s389_s3 + $0x30] sm:$0xff] %v177_v46  ;;  %v156_v47 = vpop.f32.mrf.mxu2  ;;  %v166_v48 = vpop.f32.mrf.mxu3 }
  0xa2   :  { %v157_v49 = vadd.f32 %v272_v16, %v156_v47  ;;  %v167_v50 = vadd.f32 %v272_v16, %v166_v48  ;;  %v138_v51 = vpop.f32.mrf.mxu0  ;;  %v148_v52 = vpop.f32.mrf.mxu1 }
  0xa3   :  { %v139_v53 = vadd.f32 %v272_v16, %v138_v51  ;;  %v149_v54 = vadd.f32 %v272_v16, %v148_v52 }
  0xa4   :  { %v181_v55 = vmax.f32 %v157_v49, 0.0  ;;  %v185_v56 = vmax.f32 %v167_v50, 0.0 }
  0xa5   :  { %v174_v57 = vmax.f32 %v139_v53, 0.0  ;;  %v178_v58 = vmax.f32 %v149_v54, 0.0 }
  0xa6   :  { %197 = vst [vmem:[%s389_s3 + $0x50] sm:$0xff] %v181_v55 }
  0xa7   :  { %201 = vst [vmem:[%s389_s3 + $0x70] sm:$0xff] %v185_v56 }
  0xa8   :  { %190 = vst [vmem:[%s389_s3 + $0x18] sm:$0xff] %v174_v57 }
  0xa9   :  { %194 = vst [vmem:[%s389_s3 + $0x38] sm:$0xff] %v178_v58  ;;  %v158_v59 = vpop.f32.mrf.mxu2  ;;  %v168_v60 = vpop.f32.mrf.mxu3 }
  0xaa   :  { %v159_v61 = vadd.f32 %v272_v16, %v158_v59  ;;  %v169_v62 = vadd.f32 %v272_v16, %v168_v60 }
  0xac   :  { %v182_v63 = vmax.f32 %v159_v61, 0.0  ;;  %v186_v0 = vmax.f32 %v169_v62, 0.0 }
  0xae   :  { %198 = vst [vmem:[%s389_s3 + $0x58] sm:$0xff] %v182_v63 }
  0xaf   :  { %202 = vst [vmem:[%s389_s3 + $0x78] sm:$0xff] %v186_v0 }

// kernel: vae_forward.10
= control target key start
LH: loop header
LB: loop body
LE: loop exit
PB: predicated region body
PF: predicated region fallthrough
CT: control target
= control target key end

     0   :  { %vm21_vm0 = vcmask 64512   ;;  %v161_v3 = vmov 32.0   ;;  %vm136_vm5 = vcmask 31744   ;;  %s238_s0 = inlined_call_operand.vmem [shape: f32[32,8], index: 0, kind: input, shape index: {}]   ;;  %s239_s1 = inlined_call_operand.vmem [shape: f32[1,8], index: 1, kind: input, shape index: {}]   ;;  %s240_s2 = inlined_call_operand.vmem [shape: f32[1,8], index: 2, kind: input, shape index: {}]   ;;  %s241_s3 = inlined_call_operand.vmem [shape: f32[32,4], index: 3, kind: input, shape index: {}]   ;;  %s242_s4 = inlined_call_operand.vmem [shape: f32[32,4], index: 4, kind: output, shape index: {}]  }
   0x1   :  { %v17_v0 = vld [vmem:[%s238_s0] sm:$0xff]  ;;  %v18_v1 = vld [vmem:[%s238_s0 + $0x8] sm:$0xff]  ;;  %v19_v2 = vld [vmem:[%s238_s0 + $0x10] sm:$0xff]  ;;  %149 = vrcp.f32 %v161_v3 }
   0x2   :  { %v20_v4 = vld [vmem:[%s238_s0 + $0x18] sm:$0xff]  ;;  %v22_v5 = vsel %vm21_vm0, %v17_v0, 0.0  ;;  %v23_v6 = vsel %vm21_vm0, %v18_v1, 0.0  ;;  %v25_v7 = vsel %vm21_vm0, %v19_v2, 0.0  ;;  %v147_v54 = vld [vmem:[%s239_s1] ss:$0 sm:$0xff] }
   0x3   :  { %v24_v8 = vadd.f32 %v23_v6, %v22_v5  ;;  %v27_v9 = vsel %vm21_vm0, %v20_v4, 0.0  ;;  %v148_v58 = vld [vmem:[%s240_s2] ss:$0 sm:$0xff]  ;;  %s162_s1 = smov 124  }
   0x5   :  { %v26_v10 = vadd.f32 %v25_v7, %v24_v8 }
   0x7   :  { %v150_v11 = vpop.eup %149  ;;  %v28_v12 = vadd.f32 %v27_v9, %v26_v10 }
   0x8   :  { %v36_v13 = vmul.f32 32.0, %v150_v11  ;;  %vm40_vm1 = vweird.f32 %v150_v11 }
   0x9   :  { %v29_v14 = vrot.slane %v28_v12, 4 }
   0xa   :  { %v37_v15 = vsub.f32 1.0, %v36_v13 }
   0xb   :  { %v30_v16 = vadd.f32 %v29_v14, %v28_v12 }
   0xc   :  { %v38_v17 = vmul.f32 %v150_v11, %v37_v15 }
   0xd   :  { %v31_v18 = vrot.slane %v30_v16, 2 }
   0xe   :  { %v39_v19 = vadd.f32 %v150_v11, %v38_v17  ;;  %v98_v17 = vld [vmem:[%s241_s3 + $0x10] sm:$0xff] }
   0xf   :  { %v32_v20 = vadd.f32 %v31_v18, %v30_v16  ;;  %v96_v18 = vld [vmem:[%s241_s3] sm:$0xff] }
  0x10   :  { %v41_v22 = vsel %vm40_vm1, %v150_v11, %v39_v19 }
  0x11   :  { %v33_v21 = vrot.slane %v32_v20, 1 }
  0x13   :  { %v34_v23 = vadd.f32 %v33_v21, %v32_v20 }
  0x15   :  { %v42_v24 = vmul.f32 %v41_v22, %v34_v23 }
  0x17   :  { %v43_v25 = vsub.f32 %v17_v0, %v42_v24  ;;  %v44_v26 = vsub.f32 %v18_v1, %v42_v24  ;;  %v45_v27 = vsub.f32 %v19_v2, %v42_v24  ;;  %v46_v28 = vsub.f32 %v20_v4, %v42_v24 }
  0x19   :  { %v47_v29 = vmul.f32 %v43_v25, %v43_v25  ;;  %v48_v30 = vmul.f32 %v44_v26, %v44_v26  ;;  %v49_v31 = vmul.f32 %v45_v27, %v45_v27  ;;  %v50_v32 = vmul.f32 %v46_v28, %v46_v28 }
  0x1b   :  { %v51_v33 = vsel %vm21_vm0, %v47_v29, 0.0  ;;  %v52_v34 = vsel %vm21_vm0, %v48_v30, 0.0  ;;  %v54_v35 = vsel %vm21_vm0, %v49_v31, 0.0  ;;  %v56_v37 = vsel %vm21_vm0, %v50_v32, 0.0 }
  0x1c   :  { %v53_v36 = vadd.f32 %v52_v34, %v51_v33 }
  0x1e   :  { %v55_v38 = vadd.f32 %v54_v35, %v53_v36 }
  0x20   :  { %v57_v39 = vadd.f32 %v56_v37, %v55_v38 }
  0x22   :  { %v58_v40 = vrot.slane %v57_v39, 4 }
  0x24   :  { %v59_v41 = vadd.f32 %v58_v40, %v57_v39 }
  0x26   :  { %v60_v42 = vrot.slane %v59_v41, 2 }
  0x28   :  { %v61_v43 = vadd.f32 %v60_v42, %v59_v41 }
  0x2a   :  { %v62_v44 = vrot.slane %v61_v43, 1 }
  0x2c   :  { %v63_v45 = vadd.f32 %v62_v44, %v61_v43 }
  0x2e   :  { %v64_v46 = vmul.f32 %v63_v45, %v41_v22 }
  0x30   :  { %v65_v47 = vadd.f32 1e-05, %v64_v46 }
  0x32   :  { %151 = vrsqrt.f32 %v65_v47  ;;  %vm72_vm2 = vweird.f32 %v65_v47 }
  0x38   :  { %v152_v48 = vpop.eup %151 }
  0x39   :  { %v67_v49 = vmul.f32 %v152_v48, %v65_v47  ;;  %vm73_vm3 = vweird.f32 %v152_v48 }
  0x3a   :  { %vm74_vm4 = vmor %vm72_vm2, %vm73_vm3 }
  0x3b   :  { %v68_v50 = vmul.f32 %v152_v48, %v67_v49 }
  0x3d   :  { %v69_v51 = vmul.f32 0.5, %v68_v50 }
  0x3f   :  { %v70_v52 = vsub.f32 1.5, %v69_v51 }
  0x41   :  { %v71_v53 = vmul.f32 %v152_v48, %v70_v52 }
  0x43   :  { %v75_v55 = vsel %vm74_vm4, %v152_v48, %v71_v53 }
  0x44   :  { %v78_v56 = vmul.f32 %v75_v55, %v45_v27  ;;  %v79_v57 = vmul.f32 %v75_v55, %v46_v28  ;;  %v77_v59 = vmul.f32 %v75_v55, %v44_v26  ;;  %v76_v60 = vmul.f32 %v75_v55, %v43_v25  ;;  %v99_v25 = vld [vmem:[%s241_s3 + $0x18] sm:$0xff]  ;;  %v97_v26 = vld [vmem:[%s241_s3 + $0x8] sm:$0xff] }
  0x46   :  { %v86_v61 = vmul.f32 %v147_v54, %v78_v56  ;;  %v84_v62 = vmul.f32 %v147_v54, %v76_v60  ;;  %v87_v63 = vmul.f32 %v147_v54, %v79_v57  ;;  %v85_v0 = vmul.f32 %v147_v54, %v77_v59 }
  0x48   :  { %v94_v1 = vadd.f32 %v148_v58, %v86_v61  ;;  %v92_v2 = vadd.f32 %v148_v58, %v84_v62  ;;  %v95_v3 = vadd.f32 %v148_v58, %v87_v63  ;;  %v93_v4 = vadd.f32 %v148_v58, %v85_v0 }
  0x4a   :  { %v102_v5 = vmul.f32 0.5, %v94_v1  ;;  %v100_v6 = vmul.f32 0.5, %v92_v2  ;;  %v103_v9 = vmul.f32 0.5, %v95_v3  ;;  %v101_v10 = vmul.f32 0.5, %v93_v4 }
  0x4c   :  { %v108_v7 = vmul.f32 1.442695, %v102_v5  ;;  %v104_v8 = vmul.f32 1.442695, %v100_v6  ;;  %v110_v11 = vmul.f32 1.442695, %v103_v9 }
  0x4d   :  { %v106_v12 = vmul.f32 1.442695, %v101_v10 }
  0x4e   :  { %153 = vpow2.f32 %v108_v7 }
  0x4f   :  { %155 = vpow2.f32 %v104_v8 }
  0x50   :  { %157 = vpow2.f32 %v110_v11 }
  0x51   :  { %159 = vpow2.f32 %v106_v12 }
  0x54   :  { %v154_v13 = vpop.eup %153 }
  0x55   :  { %v156_v14 = vpop.eup %155  ;;  %120 = vrot.lane.b32.xlu1 %v154_v13, %s162_s1 }
  0x56   :  { %116 = vrot.lane.b32.xlu0 %v156_v14, %s162_s1  ;;  %v158_v15 = vpop.eup %157 }
  0x57   :  { %v160_v16 = vpop.eup %159 }
  0x5d   :  { %122 = vrot.lane.b32.xlu1 %v158_v15, %s162_s1 }
  0x5e   :  { %118 = vrot.lane.b32.xlu0 %v160_v16, %s162_s1 }
  0xc7   :  { %v121_v19 = vpop.permute.xlu1 %120 }
  0xc8   :  { %v130_v20 = vmul.f32 %v121_v19, %v98_v17  ;;  %v117_v21 = vpop.permute.xlu0 %116 }
  0xc9   :  { %v128_v22 = vmul.f32 %v117_v21, %v96_v18 }
  0xca   :  { %v134_v23 = vadd.f32 %v130_v20, %v94_v1 }
  0xcb   :  { %v132_v24 = vadd.f32 %v128_v22, %v92_v2 }
  0xcc   :  { %139 = vst.msk [vmem:[%s242_s4 + $0x10] sm:$0xff] %vm136_vm5, %v134_v23 }
  0xcd   :  { %137 = vst.msk [vmem:[%s242_s4] sm:$0xff] %vm136_vm5, %v132_v24 }
  0xcf   :  { %v123_v27 = vpop.permute.xlu1 %122 }
  0xd0   :  { %v131_v28 = vmul.f32 %v123_v27, %v99_v25  ;;  %v119_v29 = vpop.permute.xlu0 %118 }
  0xd1   :  { %v129_v30 = vmul.f32 %v119_v29, %v97_v26 }
  0xd2   :  { %v135_v31 = vadd.f32 %v131_v28, %v95_v3 }
  0xd3   :  { %v133_v32 = vadd.f32 %v129_v30, %v93_v4 }
  0xd4   :  { %140 = vst.msk [vmem:[%s242_s4 + $0x18] sm:$0xff] %vm136_vm5, %v135_v31 }
  0xd5   :  { %138 = vst.msk [vmem:[%s242_s4 + $0x8] sm:$0xff] %vm136_vm5, %v133_v32 }

// kernel: tile.48
= control target key start
LH: loop header
LB: loop body
LE: loop exit
PB: predicated region body
PF: predicated region fallthrough
CT: control target
= control target key end

     0   :  { %s22_s0 = inlined_call_operand.vmem [shape: f32[128], index: 0, kind: input, shape index: {}]   ;;  %s23_s1 = inlined_call_operand.vmem [shape: f32[4,128], index: 1, kind: output, shape index: {}]  }
   0x1   :  { %v4_v0 = vld [vmem:[%s22_s0] ss:$0 sm:$0xff] }
   0x2   :  { %5 = vst [vmem:[%s23_s1] sm:$0xf] %v4_v0 }

// kernel: vae_forward.9
= control target key start
LH: loop header
LB: loop body
LE: loop exit
PB: predicated region body
PF: predicated region fallthrough
CT: control target
= control target key end

     0   :  { %vm369_vm0 = vcmask 523264   ;;  %s919_s1 = inlined_call_operand.vmem [shape: bf16[576,128], index: 1, kind: input, shape index: {}]   ;;  %s920_s2 = inlined_call_operand.vmem [shape: f32[1,128], index: 2, kind: input, shape index: {}]   ;;  %s921_s0 = inlined_call_operand.vmem [shape: bf16[32,576], index: 0, kind: input, shape index: {}]   ;;  %s922_s3 = inlined_call_operand.vmem [shape: f32[32,128], index: 3, kind: output, shape index: {}]  }
   0x1   :  { %v682_v0 = vld [vmem:[%s919_s1 + $0x38] sm:$0xff]  ;;  %v681_v4 = vld [vmem:[%s919_s1 + $0x30] sm:$0xff]  ;;  %v680_v8 = vld [vmem:[%s919_s1 + $0x28] sm:$0xff] }
   0x2   :  { %v690_v1 = vld [vmem:[%s919_s1 + $0x78] sm:$0xff]  ;;  %376 = vmatpush.bf16.msra.mxu0 %v682_v0  ;;  %v689_v5 = vld [vmem:[%s919_s1 + $0x70] sm:$0xff]  ;;  %v688_v9 = vld [vmem:[%s919_s1 + $0x68] sm:$0xff] }
   0x3   :  { %v698_v2 = vld [vmem:[%s919_s1 + $0xb8] sm:$0xff]  ;;  %395 = vmatpush.bf16.msra.mxu1 %v690_v1  ;;  %v697_v6 = vld [vmem:[%s919_s1 + $0xb0] sm:$0xff]  ;;  %v696_v10 = vld [vmem:[%s919_s1 + $0xa8] sm:$0xff] }
   0x4   :  { %v706_v3 = vld [vmem:[%s919_s1 + $0xf8] sm:$0xff]  ;;  %414 = vmatpush.bf16.msra.mxu2 %v698_v2  ;;  %v705_v7 = vld [vmem:[%s919_s1 + $0xf0] sm:$0xff]  ;;  %v704_v11 = vld [vmem:[%s919_s1 + $0xe8] sm:$0xff] }
   0x5   :  { %433 = vmatpush.bf16.msra.mxu3 %v706_v3  ;;  %v679_v12 = vld [vmem:[%s919_s1 + $0x20] sm:$0xff]  ;;  %v678_v16 = vld [vmem:[%s919_s1 + $0x18] sm:$0xff]  ;;  %v677_v20 = vld [vmem:[%s919_s1 + $0x10] sm:$0xff] }
   0x6   :  { %377 = vmatpush.bf16.msra.mxu0 %v681_v4  ;;  %v687_v13 = vld [vmem:[%s919_s1 + $0x60] sm:$0xff]  ;;  %v686_v17 = vld [vmem:[%s919_s1 + $0x58] sm:$0xff]  ;;  %v685_v21 = vld [vmem:[%s919_s1 + $0x50] sm:$0xff] }
   0x7   :  { %396 = vmatpush.bf16.msra.mxu1 %v689_v5  ;;  %v695_v14 = vld [vmem:[%s919_s1 + $0xa0] sm:$0xff]  ;;  %v694_v18 = vld [vmem:[%s919_s1 + $0x98] sm:$0xff]  ;;  %v693_v22 = vld [vmem:[%s919_s1 + $0x90] sm:$0xff] }
   0x8   :  { %415 = vmatpush.bf16.msra.mxu2 %v697_v6  ;;  %v703_v15 = vld [vmem:[%s919_s1 + $0xe0] sm:$0xff]  ;;  %v702_v19 = vld [vmem:[%s919_s1 + $0xd8] sm:$0xff]  ;;  %v701_v23 = vld [vmem:[%s919_s1 + $0xd0] sm:$0xff] }
   0x9   :  { %434 = vmatpush.bf16.msra.mxu3 %v705_v7  ;;  %v676_v24 = vld [vmem:[%s919_s1 + $0x8] sm:$0xff]  ;;  %v675_v28 = vld [vmem:[%s919_s1] sm:$0xff]  ;;  %v667_v33 = vld [vmem:[%s921_s0 + $0x10] sm:$0xf0] }
   0xa   :  { %378 = vmatpush.bf16.msra.mxu0 %v680_v8  ;;  %v684_v25 = vld [vmem:[%s919_s1 + $0x48] sm:$0xff]  ;;  %v683_v29 = vld [vmem:[%s919_s1 + $0x40] sm:$0xff]  ;;  %v483_v35 = vld [vmem:[%s921_s0 + $0x14] sm:$0xf0] }
   0xb   :  { %397 = vmatpush.bf16.msra.mxu1 %v688_v9  ;;  %v692_v26 = vld [vmem:[%s919_s1 + $0x88] sm:$0xff]  ;;  %v691_v30 = vld [vmem:[%s919_s1 + $0x80] sm:$0xff]  ;;  %v668_v37 = vld [vmem:[%s921_s0 + $0x18] sm:$0xf0] }
   0xc   :  { %416 = vmatpush.bf16.msra.mxu2 %v696_v10  ;;  %v700_v27 = vld [vmem:[%s919_s1 + $0xc8] sm:$0xff]  ;;  %v699_v31 = vld [vmem:[%s919_s1 + $0xc0] sm:$0xff]  ;;  %v710_v40 = vld [vmem:[%s919_s1 + $0x118] sm:$0xff] }
   0xd   :  { %435 = vmatpush.bf16.msra.mxu3 %v704_v11  ;;  %v481_v32 = vld [vmem:[%s921_s0] sm:$0xf]  ;;  %v665_v34 = vld [vmem:[%s921_s0 + $0x4] sm:$0xf]  ;;  %v489_v36 = vld [vmem:[%s921_s0 + $0x8] sm:$0xf] }
   0xe   :  { %379 = vmatpush.bf16.msra.mxu0 %v679_v12  ;;  %v666_v38 = vld [vmem:[%s921_s0 + $0xc] sm:$0xf]  ;;  %v491_v39 = vld [vmem:[%s921_s0 + $0x1c] sm:$0xf0]  ;;  %v482_v41 = vor.u32 %v667_v33, %v481_v32  ;;  %v486_v42 = vor.u32 %v665_v34, %v483_v35  ;;  %v490_v43 = vor.u32 %v668_v37, %v489_v36  ;;  %v709_v45 = vld [vmem:[%s919_s1 + $0x110] sm:$0xff] }
   0xf   :  { %398 = vmatpush.bf16.msra.mxu1 %v687_v13  ;;  %v494_v44 = vor.u32 %v666_v38, %v491_v39  ;;  %v708_v46 = vld [vmem:[%s919_s1 + $0x108] sm:$0xff]  ;;  %v707_v47 = vld [vmem:[%s919_s1 + $0x100] sm:$0xff]  ;;  %v672_v49 = vld [vmem:[%s921_s0 + $0x38] sm:$0xf0] }
  0x10   :  { %417 = vmatpush.bf16.msra.mxu2 %v695_v14  ;;  %v501_v48 = vld [vmem:[%s921_s0 + $0x28] sm:$0xf]  ;;  %v670_v50 = vld [vmem:[%s921_s0 + $0x2c] sm:$0xf]  ;;  %v503_v51 = vld [vmem:[%s921_s0 + $0x3c] sm:$0xf0] }
  0x11   :  { %436 = vmatpush.bf16.msra.mxu3 %v703_v15  ;;  %v509_v52 = vld [vmem:[%s921_s0 + $0x30] sm:$0xf]  ;;  %v673_v53 = vld [vmem:[%s921_s0 + $0x40] sm:$0xf0]  ;;  %v671_v54 = vld [vmem:[%s921_s0 + $0x34] sm:$0xf]  ;;  %v502_v56 = vor.u32 %v672_v49, %v501_v48  ;;  %v506_v57 = vor.u32 %v670_v50, %v503_v51 }
  0x12   :  { %380 = vmatpush.bf16.msra.mxu0 %v678_v16  ;;  %v511_v55 = vld [vmem:[%s921_s0 + $0x44] sm:$0xf0]  ;;  %v510_v58 = vor.u32 %v673_v53, %v509_v52  ;;  %v497_v60 = vld [vmem:[%s921_s0 + $0x10] sm:$0xf]  ;;  %v669_v61 = vld [vmem:[%s921_s0 + $0x20] sm:$0xf0] }
  0x13   :  { %399 = vmatpush.bf16.msra.mxu1 %v686_v17  ;;  %v514_v59 = vor.u32 %v671_v54, %v511_v55  ;;  %v517_v62 = vld [vmem:[%s921_s0 + $0x38] sm:$0xf]  ;;  %v674_v63 = vld [vmem:[%s921_s0 + $0x48] sm:$0xf0]  ;;  %v498_v0 = vor.u32 %v669_v61, %v497_v60  ;;  %v715_v11 = vld [vmem:[%s920_s2] ss:$0 sm:$0xff] }
  0x14   :  { %418 = vmatpush.bf16.msra.mxu2 %v694_v18  ;;  %v518_v1 = vor.u32 %v674_v63, %v517_v62 }
  0x15   :  { %437 = vmatpush.bf16.msra.mxu3 %v702_v19 }
  0x16   :  { %381 = vmatpush.bf16.msra.mxu0 %v677_v20 }
  0x17   :  { %400 = vmatpush.bf16.msra.mxu1 %v685_v21 }
  0x18   :  { %419 = vmatpush.bf16.msra.mxu2 %v693_v22 }
  0x19   :  { %438 = vmatpush.bf16.msra.mxu3 %v701_v23 }
  0x1a   :  { %382 = vmatpush.bf16.msra.mxu0 %v676_v24 }
  0x1b   :  { %401 = vmatpush.bf16.msra.mxu1 %v684_v25 }
  0x1c   :  { %420 = vmatpush.bf16.msra.mxu2 %v692_v26 }
  0x1d   :  { %439 = vmatpush.bf16.msra.mxu3 %v700_v27 }
  0x1e   :  { %383 = vmatpush.bf16.msra.mxu0 %v675_v28 }
  0x1f   :  { %402 = vmatpush.bf16.msra.mxu1 %v683_v29 }
  0x20   :  { %421 = vmatpush.bf16.msra.mxu2 %v691_v30 }
  0x21   :  { %440 = vmatpush.bf16.msra.mxu3 %v699_v31  ;;  %384 = vmatmul.bf16.vlgmr.msra.gmra.mxu0 %v482_v41 }
  0x22   :  { %456 = vmatpush.bf16.msrb.mxu0 %v710_v40  ;;  %403 = vmatmul.bf16.vlgmr.msra.gmra.mxu1 %v486_v42 }
  0x23   :  { %711 = vmatpush.bf16.msrb.mxu1 %v710_v40  ;;  %422 = vmatmul.bf16.vlgmr.msra.gmra.mxu2 %v490_v43 }
  0x24   :  { %441 = vmatmul.bf16.vlgmr.msra.gmra.mxu3 %v494_v44 }
  0x26   :  { %457 = vmatpush.bf16.msrb.mxu0 %v709_v45 }
  0x27   :  { %712 = vmatpush.bf16.msrb.mxu1 %v709_v45 }
  0x2a   :  { %458 = vmatpush.bf16.msrb.mxu0 %v708_v46 }
  0x2b   :  { %713 = vmatpush.bf16.msrb.mxu1 %v708_v46 }
  0x2e   :  { %459 = vmatpush.bf16.msrb.mxu0 %v707_v47 }
  0x2f   :  { %714 = vmatpush.bf16.msrb.mxu1 %v707_v47 }
  0x31   :  { %389 = vmatmul.bf16.gmra.mxu0 %v502_v56 }
  0x32   :  { %408 = vmatmul.bf16.gmra.mxu1 %v506_v57 }
  0x33   :  { %427 = vmatmul.bf16.gmra.mxu2 %v510_v58 }
  0x34   :  { %446 = vmatmul.bf16.gmra.mxu3 %v514_v59 }
  0x41   :  { %663 = vmatmul.msk.bf16.vlgmr.msrb.gmra.mxu0 %vm369_vm0, %v498_v0 }
  0x42   :  { %664 = vmatmul.msk.bf16.vlgmr.msrb.gmra.mxu1 %vm369_vm0, %v518_v1 }
  0x9e   :  { %v385_v2 = vpop.f32.mrf.mxu0 }
  0x9f   :  { %v404_v3 = vpop.f32.mrf.mxu1  ;;  %v386_v13 = vadd.f32 %v715_v11, %v385_v2 }
  0xa1   :  { %v405_v18 = vadd.f32 %v404_v3, %v386_v13 }
  0xa6   :  { %v423_v4 = vpop.f32.mrf.mxu2  ;;  %v387_v6 = vpop.f32.mrf.mxu0 }
  0xa7   :  { %v442_v5 = vpop.f32.mrf.mxu3  ;;  %v406_v7 = vpop.f32.mrf.mxu1  ;;  %v424_v20 = vadd.f32 %v423_v4, %v405_v18  ;;  %v388_v23 = vadd.f32 %v715_v11, %v387_v6 }
  0xa9   :  { %v443_v25 = vadd.f32 %v442_v5, %v424_v20  ;;  %v407_v30 = vadd.f32 %v406_v7, %v388_v23 }
  0xae   :  { %v425_v8 = vpop.f32.mrf.mxu2  ;;  %v390_v9 = vpop.f32.mrf.mxu0 }
  0xaf   :  { %v409_v10 = vpop.f32.mrf.mxu1  ;;  %v444_v12 = vpop.f32.mrf.mxu3  ;;  %v391_v14 = vadd.f32 %v715_v11, %v390_v9  ;;  %v426_v34 = vadd.f32 %v425_v8, %v407_v30 }
  0xb1   :  { %v410_v19 = vadd.f32 %v409_v10, %v391_v14  ;;  %v445_v37 = vadd.f32 %v444_v12, %v426_v34 }
  0xb6   :  { %v428_v15 = vpop.f32.mrf.mxu2  ;;  %v392_v16 = vpop.f32.mrf.mxu0 }
  0xb7   :  { %v411_v17 = vpop.f32.mrf.mxu1  ;;  %v429_v21 = vadd.f32 %v428_v15, %v410_v19  ;;  %v447_v22 = vpop.f32.mrf.mxu3  ;;  %v393_v24 = vadd.f32 %v715_v11, %v392_v16 }
  0xb9   :  { %v448_v26 = vadd.f32 %v447_v22, %v429_v21  ;;  %v412_v31 = vadd.f32 %v411_v17, %v393_v24 }
  0xbe   :  { %v430_v27 = vpop.f32.mrf.mxu2  ;;  %v461_v28 = vpop.f32.mrf.mxu0 }
  0xbf   :  { %v466_v29 = vpop.f32.mrf.mxu1  ;;  %v462_v32 = vadd.f32 %v461_v28, %v443_v25  ;;  %v431_v35 = vadd.f32 %v430_v27, %v412_v31  ;;  %v449_v36 = vpop.f32.mrf.mxu3 }
  0xc0   :  { %v467_v33 = vadd.f32 %v466_v29, %v448_v26 }
  0xc1   :  { %471 = vst [vmem:[%s922_s3] sm:$0xff] %v462_v32  ;;  %v450_v38 = vadd.f32 %v449_v36, %v431_v35 }
  0xc2   :  { %473 = vst [vmem:[%s922_s3 + $0x10] sm:$0xff] %v467_v33 }
  0xc6   :  { %v463_v39 = vpop.f32.mrf.mxu0 }
  0xc7   :  { %v468_v40 = vpop.f32.mrf.mxu1  ;;  %v464_v41 = vadd.f32 %v463_v39, %v445_v37 }
  0xc8   :  { %v469_v42 = vadd.f32 %v468_v40, %v450_v38 }
  0xc9   :  { %472 = vst [vmem:[%s922_s3 + $0x8] sm:$0xff] %v464_v41 }
  0xca   :  { %474 = vst [vmem:[%s922_s3 + $0x18] sm:$0xff] %v469_v42 }

// kernel: vae_forward.11
= control target key start
LH: loop header
LB: loop body
LE: loop exit
PB: predicated region body
PF: predicated region fallthrough
CT: control target
= control target key end

     0   :  { %vm63_vm0 = vcmask 130048   ;;  %s305_s1 = inlined_call_operand.vmem [shape: bf16[16,512], index: 1, kind: input, shape index: {}]   ;;  %s306_s0 = inlined_call_operand.vmem [shape: bf16[32,16], index: 0, kind: input, shape index: {}]   ;;  %s307_s2 = inlined_call_operand.vmem [shape: f32[1,512], index: 2, kind: input, shape index: {}]   ;;  %s308_s3 = inlined_call_operand.vmem [shape: f32[32,512], index: 3, kind: output, shape index: {}]  }
   0x1   :  { %v176_v0 = vld [vmem:[%s305_s1] sm:$0xf]  ;;  %v202_v1 = vld [vmem:[%s305_s1 + $0xc] sm:$0xf0]  ;;  %v200_v2 = vld [vmem:[%s305_s1 + $0x4] sm:$0xf] }
   0x2   :  { %v177_v3 = vor.u32 %v202_v1, %v176_v0  ;;  %v178_v4 = vld [vmem:[%s305_s1 + $0x10] sm:$0xf0]  ;;  %v184_v5 = vld [vmem:[%s305_s1 + $0x8] sm:$0xf]  ;;  %v203_v6 = vld [vmem:[%s305_s1 + $0x14] sm:$0xf0] }
   0x3   :  { %v181_v7 = vor.u32 %v200_v2, %v178_v4  ;;  %v185_v8 = vor.u32 %v203_v6, %v184_v5  ;;  %v201_v9 = vld [vmem:[%s305_s1 + $0xc] sm:$0xf]  ;;  %v186_v10 = vld [vmem:[%s305_s1 + $0x18] sm:$0xf0]  ;;  %v198_v11 = vld [vmem:[%s306_s0] sm:$0xff] }
   0x4   :  { %77 = vmatpush.bf16.msra.mxu0 %v177_v3  ;;  %v189_v12 = vor.u32 %v201_v9, %v186_v10  ;;  %v199_v13 = vld [vmem:[%s306_s0 + $0x8] sm:$0xff]  ;;  %v23_v14 = vld [vmem:[%s307_s2] sm:$0xf] }
   0x5   :  { %96 = vmatpush.bf16.msra.mxu1 %v181_v7  ;;  %115 = vmatpush.bf16.msra.mxu2 %v185_v8  ;;  %v25_v15 = vperm.slane %v23_v14, 0  ;;  %v26_v16 = vperm.slane %v23_v14, 1  ;;  %v27_v21 = vperm.slane %v23_v14, 2  ;;  %v28_v22 = vperm.slane %v23_v14, 3 }
   0x6   :  { %134 = vmatpush.bf16.msra.mxu3 %v189_v12 }
   0x7   :  { %190 = vmatmul.msk.bf16.vlgmr.msra.gmra.mxu0 %vm63_vm0, %v198_v11 }
   0x8   :  { %192 = vmatmul.msk.bf16.vlgmr.msra.gmra.mxu1 %vm63_vm0, %v198_v11  ;;  %194 = vmatmul.msk.bf16.vlgmr.msra.gmra.mxu2 %vm63_vm0, %v198_v11 }
   0x9   :  { %196 = vmatmul.msk.bf16.vlgmr.msra.gmra.mxu3 %vm63_vm0, %v198_v11 }
  0x17   :  { %191 = vmatmul.msk.bf16.gmra.mxu0 %vm63_vm0, %v199_v13 }
  0x18   :  { %193 = vmatmul.msk.bf16.gmra.mxu1 %vm63_vm0, %v199_v13  ;;  %195 = vmatmul.msk.bf16.gmra.mxu2 %vm63_vm0, %v199_v13 }
  0x19   :  { %197 = vmatmul.msk.bf16.gmra.mxu3 %vm63_vm0, %v199_v13 }
  0x84   :  { %v79_v17 = vpop.f32.mrf.mxu0 }
  0x85   :  { %v80_v18 = vadd.f32 %v79_v17, %v25_v15  ;;  %v98_v19 = vpop.f32.mrf.mxu1 }
  0x86   :  { %v99_v20 = vadd.f32 %v98_v19, %v26_v16 }
  0x87   :  { %146 = vst [vmem:[%s308_s3] sm:$0xff] %v80_v18 }
  0x88   :  { %147 = vst [vmem:[%s308_s3 + $0x8] sm:$0xff] %v99_v20 }
  0x8b   :  { %v117_v23 = vpop.f32.mrf.mxu2 }
  0x8c   :  { %v118_v24 = vadd.f32 %v117_v23, %v27_v21  ;;  %v136_v25 = vpop.f32.mrf.mxu3  ;;  %v81_v26 = vpop.f32.mrf.mxu0 }
  0x8d   :  { %v137_v27 = vadd.f32 %v136_v25, %v28_v22  ;;  %v82_v28 = vadd.f32 %v81_v26, %v25_v15  ;;  %v100_v29 = vpop.f32.mrf.mxu1 }
  0x8e   :  { %148 = vst [vmem:[%s308_s3 + $0x10] sm:$0xff] %v118_v24  ;;  %v101_v30 = vadd.f32 %v100_v29, %v26_v16 }
  0x8f   :  { %149 = vst [vmem:[%s308_s3 + $0x18] sm:$0xff] %v137_v27 }
  0x90   :  { %150 = vst [vmem:[%s308_s3 + $0x20] sm:$0xff] %v82_v28 }
  0x91   :  { %151 = vst [vmem:[%s308_s3 + $0x28] sm:$0xff] %v101_v30 }
  0x93   :  { %v119_v31 = vpop.f32.mrf.mxu2 }
  0x94   :  { %v120_v32 = vadd.f32 %v119_v31, %v27_v21  ;;  %v138_v33 = vpop.f32.mrf.mxu3  ;;  %v84_v34 = vpop.f32.mrf.mxu0 }
  0x95   :  { %v139_v35 = vadd.f32 %v138_v33, %v28_v22  ;;  %v85_v36 = vadd.f32 %v84_v34, %v25_v15  ;;  %v103_v37 = vpop.f32.mrf.mxu1 }
  0x96   :  { %152 = vst [vmem:[%s308_s3 + $0x30] sm:$0xff] %v120_v32  ;;  %v104_v38 = vadd.f32 %v103_v37, %v26_v16 }
  0x97   :  { %153 = vst [vmem:[%s308_s3 + $0x38] sm:$0xff] %v139_v35 }
  0x98   :  { %154 = vst [vmem:[%s308_s3 + $0x40] sm:$0xff] %v85_v36 }
  0x99   :  { %155 = vst [vmem:[%s308_s3 + $0x48] sm:$0xff] %v104_v38 }
  0x9b   :  { %v122_v39 = vpop.f32.mrf.mxu2 }
  0x9c   :  { %v123_v40 = vadd.f32 %v122_v39, %v27_v21  ;;  %v141_v41 = vpop.f32.mrf.mxu3  ;;  %v86_v42 = vpop.f32.mrf.mxu0 }
  0x9d   :  { %v142_v43 = vadd.f32 %v141_v41, %v28_v22  ;;  %v87_v44 = vadd.f32 %v86_v42, %v25_v15  ;;  %v105_v45 = vpop.f32.mrf.mxu1 }
  0x9e   :  { %156 = vst [vmem:[%s308_s3 + $0x50] sm:$0xff] %v123_v40  ;;  %v106_v46 = vadd.f32 %v105_v45, %v26_v16 }
  0x9f   :  { %157 = vst [vmem:[%s308_s3 + $0x58] sm:$0xff] %v142_v43 }
  0xa0   :  { %158 = vst [vmem:[%s308_s3 + $0x60] sm:$0xff] %v87_v44 }
  0xa1   :  { %159 = vst [vmem:[%s308_s3 + $0x68] sm:$0xff] %v106_v46 }
  0xa3   :  { %v124_v47 = vpop.f32.mrf.mxu2 }
  0xa4   :  { %v125_v48 = vadd.f32 %v124_v47, %v27_v21  ;;  %v143_v49 = vpop.f32.mrf.mxu3 }
  0xa5   :  { %v144_v50 = vadd.f32 %v143_v49, %v28_v22 }
  0xa6   :  { %160 = vst [vmem:[%s308_s3 + $0x70] sm:$0xff] %v125_v48 }
  0xa7   :  { %161 = vst [vmem:[%s308_s3 + $0x78] sm:$0xff] %v144_v50 }

// kernel: vae_forward.12
= control target key start
LH: loop header
LB: loop body
LE: loop exit
PB: predicated region body
PF: predicated region fallthrough
CT: control target
= control target key end

     0   :  { %s280_s0 = inlined_call_operand.vmem [shape: f32[32,512], index: 0, kind: input, shape index: {}]   ;;  %s281_s1 = inlined_call_operand.vmem [shape: f32[1,512], index: 1, kind: input, shape index: {}]   ;;  %s282_s2 = inlined_call_operand.vmem [shape: f32[1,512], index: 2, kind: input, shape index: {}]   ;;  %s283_s3 = inlined_call_operand.vmem [shape: f32[32,512], index: 3, kind: output, shape index: {}]  }
   0x1   :  { %v14_v0 = vld [vmem:[%s280_s0] sm:$0xff]  ;;  %v15_v5 = vld [vmem:[%s280_s0 + $0x8] sm:$0xff]  ;;  %v16_v8 = vld [vmem:[%s280_s0 + $0x10] sm:$0xff] }
   0x2   :  { %v30_v1 = vld [vmem:[%s281_s1] sm:$0xf]  ;;  %v17_v11 = vld [vmem:[%s280_s0 + $0x18] sm:$0xff]  ;;  %v19_v18 = vld [vmem:[%s280_s0 + $0x28] sm:$0xff] }
   0x3   :  { %v56_v2 = vld [vmem:[%s282_s2] sm:$0xf]  ;;  %v32_v3 = vperm.slane %v30_v1, 0  ;;  %v33_v6 = vperm.slane %v30_v1, 1  ;;  %v34_v9 = vperm.slane %v30_v1, 2  ;;  %v35_v12 = vperm.slane %v30_v1, 3 }
   0x4   :  { %v163_v4 = vperm.slane %v56_v2, 0  ;;  %v168_v7 = vperm.slane %v56_v2, 1  ;;  %v173_v10 = vperm.slane %v56_v2, 2  ;;  %v178_v13 = vperm.slane %v56_v2, 3  ;;  %v18_v14 = vld [vmem:[%s280_s0 + $0x20] sm:$0xff]  ;;  %v20_v19 = vld [vmem:[%s280_s0 + $0x30] sm:$0xff] }
   0x5   :  { %v40_v15 = vmul.f32 %v32_v3, %v14_v0  ;;  %v41_v16 = vmul.f32 %v33_v6, %v15_v5  ;;  %v44_v17 = vmul.f32 %v32_v3, %v18_v14  ;;  %v21_v20 = vld [vmem:[%s280_s0 + $0x38] sm:$0xff]  ;;  %v42_v21 = vmul.f32 %v34_v9, %v16_v8  ;;  %v22_v37 = vld [vmem:[%s280_s0 + $0x40] sm:$0xff]  ;;  %v23_v38 = vld [vmem:[%s280_s0 + $0x48] sm:$0xff] }
   0x6   :  { %v43_v22 = vmul.f32 %v35_v12, %v17_v11  ;;  %v45_v23 = vmul.f32 %v33_v6, %v19_v18  ;;  %v46_v24 = vmul.f32 %v34_v9, %v20_v19  ;;  %v47_v28 = vmul.f32 %v35_v12, %v21_v20  ;;  %v24_v43 = vld [vmem:[%s280_s0 + $0x50] sm:$0xff]  ;;  %v25_v44 = vld [vmem:[%s280_s0 + $0x58] sm:$0xff]  ;;  %v26_v49 = vld [vmem:[%s280_s0 + $0x60] sm:$0xff] }
   0x7   :  { %v66_v25 = vadd.f32 %v163_v4, %v40_v15  ;;  %v67_v26 = vadd.f32 %v168_v7, %v41_v16  ;;  %v70_v27 = vadd.f32 %v163_v4, %v44_v17  ;;  %v68_v29 = vadd.f32 %v173_v10, %v42_v21  ;;  %v27_v50 = vld [vmem:[%s280_s0 + $0x68] sm:$0xff]  ;;  %v28_v51 = vld [vmem:[%s280_s0 + $0x70] sm:$0xff]  ;;  %v29_v56 = vld [vmem:[%s280_s0 + $0x78] sm:$0xff] }
   0x8   :  { %v69_v30 = vadd.f32 %v178_v13, %v43_v22  ;;  %v71_v31 = vadd.f32 %v168_v7, %v45_v23  ;;  %v72_v32 = vadd.f32 %v173_v10, %v46_v24  ;;  %v73_v36 = vadd.f32 %v178_v13, %v47_v28 }
   0x9   :  { %v82_v33 = vmax.f32 %v66_v25, 0.0  ;;  %v83_v34 = vmax.f32 %v67_v26, 0.0  ;;  %v86_v35 = vmax.f32 %v70_v27, 0.0  ;;  %v84_v39 = vmax.f32 %v68_v29, 0.0 }
   0xa   :  { %v85_v40 = vmax.f32 %v69_v30, 0.0  ;;  %v87_v41 = vmax.f32 %v71_v31, 0.0  ;;  %v88_v42 = vmax.f32 %v72_v32, 0.0  ;;  %v89_v48 = vmax.f32 %v73_v36, 0.0 }
   0xb   :  { %v98_v45 = vadd.f32 %v82_v33, %v14_v0  ;;  %v99_v46 = vadd.f32 %v83_v34, %v15_v5  ;;  %v102_v47 = vadd.f32 %v86_v35, %v18_v14  ;;  %v100_v52 = vadd.f32 %v84_v39, %v16_v8 }
   0xc   :  { %v101_v53 = vadd.f32 %v85_v40, %v17_v11  ;;  %v103_v54 = vadd.f32 %v87_v41, %v19_v18  ;;  %v104_v55 = vadd.f32 %v88_v42, %v20_v19  ;;  %v105_v57 = vadd.f32 %v89_v48, %v21_v20 }
   0xd   :  { %114 = vst [vmem:[%s283_s3] sm:$0xff] %v98_v45  ;;  %v48_v58 = vmul.f32 %v32_v3, %v22_v37  ;;  %v49_v59 = vmul.f32 %v33_v6, %v23_v38  ;;  %v50_v60 = vmul.f32 %v34_v9, %v24_v43  ;;  %v51_v61 = vmul.f32 %v35_v12, %v25_v44 }
   0xe   :  { %115 = vst [vmem:[%s283_s3 + $0x8] sm:$0xff] %v99_v46  ;;  %v52_v62 = vmul.f32 %v32_v3, %v26_v49  ;;  %v53_v63 = vmul.f32 %v33_v6, %v27_v50  ;;  %v54_v0 = vmul.f32 %v34_v9, %v28_v51  ;;  %v55_v8 = vmul.f32 %v35_v12, %v29_v56 }
   0xf   :  { %116 = vst [vmem:[%s283_s3 + $0x10] sm:$0xff] %v100_v52  ;;  %v74_v1 = vadd.f32 %v163_v4, %v48_v58  ;;  %v75_v2 = vadd.f32 %v168_v7, %v49_v59  ;;  %v76_v5 = vadd.f32 %v173_v10, %v50_v60  ;;  %v77_v11 = vadd.f32 %v178_v13, %v51_v61 }
  0x10   :  { %117 = vst [vmem:[%s283_s3 + $0x18] sm:$0xff] %v101_v53  ;;  %v78_v3 = vadd.f32 %v163_v4, %v52_v62  ;;  %v79_v6 = vadd.f32 %v168_v7, %v53_v63  ;;  %v80_v9 = vadd.f32 %v173_v10, %v54_v0  ;;  %v81_v12 = vadd.f32 %v178_v13, %v55_v8 }
  0x11   :  { %118 = vst [vmem:[%s283_s3 + $0x20] sm:$0xff] %v102_v47  ;;  %v90_v14 = vmax.f32 %v74_v1, 0.0  ;;  %v91_v15 = vmax.f32 %v75_v2, 0.0  ;;  %v92_v16 = vmax.f32 %v76_v5, 0.0  ;;  %v93_v17 = vmax.f32 %v77_v11, 0.0 }
  0x12   :  { %119 = vst [vmem:[%s283_s3 + $0x28] sm:$0xff] %v103_v54  ;;  %v94_v18 = vmax.f32 %v78_v3, 0.0  ;;  %v95_v4 = vmax.f32 %v79_v6, 0.0  ;;  %v96_v20 = vmax.f32 %v80_v9, 0.0  ;;  %v97_v21 = vmax.f32 %v81_v12, 0.0 }
  0x13   :  { %120 = vst [vmem:[%s283_s3 + $0x30] sm:$0xff] %v104_v55  ;;  %v106_v7 = vadd.f32 %v90_v14, %v22_v37  ;;  %v107_v10 = vadd.f32 %v91_v15, %v23_v38  ;;  %v108_v19 = vadd.f32 %v92_v16, %v24_v43  ;;  %v109_v13 = vadd.f32 %v93_v17, %v25_v44 }
  0x14   :  { %121 = vst [vmem:[%s283_s3 + $0x38] sm:$0xff] %v105_v57  ;;  %v110_v22 = vadd.f32 %v94_v18, %v26_v49  ;;  %v111_v23 = vadd.f32 %v95_v4, %v27_v50  ;;  %v112_v24 = vadd.f32 %v96_v20, %v28_v51  ;;  %v113_v25 = vadd.f32 %v97_v21, %v29_v56 }
  0x15   :  { %122 = vst [vmem:[%s283_s3 + $0x40] sm:$0xff] %v106_v7 }
  0x16   :  { %123 = vst [vmem:[%s283_s3 + $0x48] sm:$0xff] %v107_v10 }
  0x17   :  { %124 = vst [vmem:[%s283_s3 + $0x50] sm:$0xff] %v108_v19 }
  0x18   :  { %125 = vst [vmem:[%s283_s3 + $0x58] sm:$0xff] %v109_v13 }
  0x19   :  { %126 = vst [vmem:[%s283_s3 + $0x60] sm:$0xff] %v110_v22 }
  0x1a   :  { %127 = vst [vmem:[%s283_s3 + $0x68] sm:$0xff] %v111_v23 }
  0x1b   :  { %128 = vst [vmem:[%s283_s3 + $0x70] sm:$0xff] %v112_v24 }
  0x1c   :  { %129 = vst [vmem:[%s283_s3 + $0x78] sm:$0xff] %v113_v25 }

// kernel: vae_forward.13
= control target key start
LH: loop header
LB: loop body
LE: loop exit
PB: predicated region body
PF: predicated region fallthrough
CT: control target
= control target key end

     0   :  { %s2367_s1 = inlined_call_operand.vmem [shape: bf16[512,256], index: 1, kind: input, shape index: {}]   ;;  %s2368_s0 = inlined_call_operand.vmem [shape: bf16[128,512], index: 0, kind: input, shape index: {}]   ;;  %s2369_s2 = inlined_call_operand.vmem [shape: f32[1,256], index: 2, kind: input, shape index: {}]   ;;  %s2370_s3 = inlined_call_operand.vmem [shape: f32[128,256], index: 3, kind: output, shape index: {}]  }
   0x1   :  { %v1210_v0 = vld [vmem:[%s2367_s1 + $0x70] sm:$0xf]  ;;  %v1455_v1 = vld [vmem:[%s2367_s1 + $0x74] sm:$0xf0]  ;;  %v1202_v11 = vld [vmem:[%s2367_s1 + $0x60] sm:$0xf] }
   0x2   :  { %v1274_v2 = vld [vmem:[%s2367_s1 + $0xf0] sm:$0xf]  ;;  %v1211_v3 = vor.u32 %v1455_v1, %v1210_v0  ;;  %v1471_v4 = vld [vmem:[%s2367_s1 + $0xf4] sm:$0xf0]  ;;  %v1453_v13 = vld [vmem:[%s2367_s1 + $0x64] sm:$0xf0] }
   0x3   :  { %v1338_v5 = vld [vmem:[%s2367_s1 + $0x170] sm:$0xf]  ;;  %v1487_v6 = vld [vmem:[%s2367_s1 + $0x174] sm:$0xf0]  ;;  %v1275_v7 = vor.u32 %v1471_v4, %v1274_v2  ;;  %v1266_v14 = vld [vmem:[%s2367_s1 + $0xe0] sm:$0xf]  ;;  %v1203_v16 = vor.u32 %v1453_v13, %v1202_v11 }
   0x4   :  { %v1339_v8 = vor.u32 %v1487_v6, %v1338_v5  ;;  %v1402_v9 = vld [vmem:[%s2367_s1 + $0x1f0] sm:$0xf]  ;;  %v1503_v10 = vld [vmem:[%s2367_s1 + $0x1f4] sm:$0xf0]  ;;  %596 = vmatpush.bf16.msra.mxu0 %v1211_v3  ;;  %v1469_v15 = vld [vmem:[%s2367_s1 + $0xe4] sm:$0xf0] }
   0x5   :  { %v1403_v12 = vor.u32 %v1503_v10, %v1402_v9  ;;  %645 = vmatpush.bf16.msra.mxu1 %v1275_v7  ;;  %v1267_v17 = vor.u32 %v1469_v15, %v1266_v14  ;;  %v1330_v18 = vld [vmem:[%s2367_s1 + $0x160] sm:$0xf]  ;;  %v1485_v19 = vld [vmem:[%s2367_s1 + $0x164] sm:$0xf0]  ;;  %v1194_v23 = vld [vmem:[%s2367_s1 + $0x50] sm:$0xf] }
   0x6   :  { %694 = vmatpush.bf16.msra.mxu2 %v1339_v8  ;;  %v1394_v20 = vld [vmem:[%s2367_s1 + $0x1e0] sm:$0xf]  ;;  %v1331_v21 = vor.u32 %v1485_v19, %v1330_v18  ;;  %v1501_v22 = vld [vmem:[%s2367_s1 + $0x1e4] sm:$0xf0]  ;;  %v1451_v24 = vld [vmem:[%s2367_s1 + $0x54] sm:$0xf0] }
   0x7   :  { %743 = vmatpush.bf16.msra.mxu3 %v1403_v12  ;;  %v1395_v25 = vor.u32 %v1501_v22, %v1394_v20  ;;  %v1258_v26 = vld [vmem:[%s2367_s1 + $0xd0] sm:$0xf]  ;;  %v1467_v27 = vld [vmem:[%s2367_s1 + $0xd4] sm:$0xf0]  ;;  %v1195_v29 = vor.u32 %v1451_v24, %v1194_v23  ;;  %v1186_v35 = vld [vmem:[%s2367_s1 + $0x40] sm:$0xf] }
   0x8   :  { %v1322_v28 = vld [vmem:[%s2367_s1 + $0x150] sm:$0xf]  ;;  %597 = vmatpush.bf16.msra.mxu0 %v1203_v16  ;;  %v1483_v30 = vld [vmem:[%s2367_s1 + $0x154] sm:$0xf0]  ;;  %v1259_v33 = vor.u32 %v1467_v27, %v1258_v26  ;;  %v1449_v36 = vld [vmem:[%s2367_s1 + $0x44] sm:$0xf0] }
   0x9   :  { %v1386_v31 = vld [vmem:[%s2367_s1 + $0x1d0] sm:$0xf]  ;;  %v1499_v32 = vld [vmem:[%s2367_s1 + $0x1d4] sm:$0xf0]  ;;  %646 = vmatpush.bf16.msra.mxu1 %v1267_v17  ;;  %v1323_v34 = vor.u32 %v1483_v30, %v1322_v28  ;;  %v1250_v37 = vld [vmem:[%s2367_s1 + $0xc0] sm:$0xf]  ;;  %v1187_v44 = vor.u32 %v1449_v36, %v1186_v35 }
   0xa   :  { %695 = vmatpush.bf16.msra.mxu2 %v1331_v21  ;;  %v1387_v38 = vor.u32 %v1499_v32, %v1386_v31  ;;  %v1465_v39 = vld [vmem:[%s2367_s1 + $0xc4] sm:$0xf0]  ;;  %v1314_v40 = vld [vmem:[%s2367_s1 + $0x140] sm:$0xf]  ;;  %v1178_v47 = vld [vmem:[%s2367_s1 + $0x30] sm:$0xf] }
   0xb   :  { %744 = vmatpush.bf16.msra.mxu3 %v1395_v25  ;;  %v1481_v41 = vld [vmem:[%s2367_s1 + $0x144] sm:$0xf0]  ;;  %v1378_v42 = vld [vmem:[%s2367_s1 + $0x1c0] sm:$0xf]  ;;  %v1251_v45 = vor.u32 %v1465_v39, %v1250_v37  ;;  %v1447_v48 = vld [vmem:[%s2367_s1 + $0x34] sm:$0xf0] }
   0xc   :  { %v1497_v43 = vld [vmem:[%s2367_s1 + $0x1c4] sm:$0xf0]  ;;  %598 = vmatpush.bf16.msra.mxu0 %v1195_v29  ;;  %v1315_v46 = vor.u32 %v1481_v41, %v1314_v40  ;;  %v1242_v49 = vld [vmem:[%s2367_s1 + $0xb0] sm:$0xf]  ;;  %v1463_v51 = vld [vmem:[%s2367_s1 + $0xb4] sm:$0xf0]  ;;  %v1179_v56 = vor.u32 %v1447_v48, %v1178_v47 }
   0xd   :  { %647 = vmatpush.bf16.msra.mxu1 %v1259_v33  ;;  %v1379_v50 = vor.u32 %v1497_v43, %v1378_v42  ;;  %v1306_v52 = vld [vmem:[%s2367_s1 + $0x130] sm:$0xf]  ;;  %v1479_v53 = vld [vmem:[%s2367_s1 + $0x134] sm:$0xf0]  ;;  %v1243_v57 = vor.u32 %v1463_v51, %v1242_v49  ;;  %v1170_v59 = vld [vmem:[%s2367_s1 + $0x20] sm:$0xf] }
   0xe   :  { %696 = vmatpush.bf16.msra.mxu2 %v1323_v34  ;;  %v1370_v54 = vld [vmem:[%s2367_s1 + $0x1b0] sm:$0xf]  ;;  %v1495_v55 = vld [vmem:[%s2367_s1 + $0x1b4] sm:$0xf0]  ;;  %v1307_v58 = vor.u32 %v1479_v53, %v1306_v52  ;;  %v1445_v60 = vld [vmem:[%s2367_s1 + $0x24] sm:$0xf0] }
   0xf   :  { %745 = vmatpush.bf16.msra.mxu3 %v1387_v38  ;;  %v1234_v61 = vld [vmem:[%s2367_s1 + $0xa0] sm:$0xf]  ;;  %v1371_v62 = vor.u32 %v1495_v55, %v1370_v54  ;;  %v1461_v63 = vld [vmem:[%s2367_s1 + $0xa4] sm:$0xf0]  ;;  %v1171_v4 = vor.u32 %v1445_v60, %v1170_v59  ;;  %v1162_v7 = vld [vmem:[%s2367_s1 + $0x10] sm:$0xf] }
  0x10   :  { %599 = vmatpush.bf16.msra.mxu0 %v1187_v44  ;;  %v1298_v0 = vld [vmem:[%s2367_s1 + $0x120] sm:$0xf]  ;;  %v1477_v1 = vld [vmem:[%s2367_s1 + $0x124] sm:$0xf0]  ;;  %v1235_v5 = vor.u32 %v1461_v63, %v1234_v61  ;;  %v1443_v8 = vld [vmem:[%s2367_s1 + $0x14] sm:$0xf0] }
  0x11   :  { %648 = vmatpush.bf16.msra.mxu1 %v1251_v45  ;;  %v1362_v2 = vld [vmem:[%s2367_s1 + $0x1a0] sm:$0xf]  ;;  %v1493_v3 = vld [vmem:[%s2367_s1 + $0x1a4] sm:$0xf0]  ;;  %v1299_v6 = vor.u32 %v1477_v1, %v1298_v0  ;;  %v1226_v9 = vld [vmem:[%s2367_s1 + $0x90] sm:$0xf]  ;;  %v1163_v17 = vor.u32 %v1443_v8, %v1162_v7 }
  0x12   :  { %697 = vmatpush.bf16.msra.mxu2 %v1315_v46  ;;  %v1363_v10 = vor.u32 %v1493_v3, %v1362_v2  ;;  %v1459_v11 = vld [vmem:[%s2367_s1 + $0x94] sm:$0xf0]  ;;  %v1290_v12 = vld [vmem:[%s2367_s1 + $0x110] sm:$0xf]  ;;  %v1154_v16 = vld [vmem:[%s2367_s1] sm:$0xf] }
  0x13   :  { %746 = vmatpush.bf16.msra.mxu3 %v1379_v50  ;;  %v1475_v13 = vld [vmem:[%s2367_s1 + $0x114] sm:$0xf0]  ;;  %v1354_v14 = vld [vmem:[%s2367_s1 + $0x190] sm:$0xf]  ;;  %v1441_v18 = vld [vmem:[%s2367_s1 + $0x4] sm:$0xf0]  ;;  %v1227_v21 = vor.u32 %v1459_v11, %v1226_v9 }
  0x14   :  { %600 = vmatpush.bf16.msra.mxu0 %v1179_v56  ;;  %v1491_v15 = vld [vmem:[%s2367_s1 + $0x194] sm:$0xf0]  ;;  %v1218_v19 = vld [vmem:[%s2367_s1 + $0x80] sm:$0xf]  ;;  %v1457_v20 = vld [vmem:[%s2367_s1 + $0x84] sm:$0xf0]  ;;  %v1291_v22 = vor.u32 %v1475_v13, %v1290_v12  ;;  %v1155_v34 = vor.u32 %v1441_v18, %v1154_v16 }
  0x15   :  { %649 = vmatpush.bf16.msra.mxu1 %v1243_v57  ;;  %v1282_v23 = vld [vmem:[%s2367_s1 + $0x100] sm:$0xf]  ;;  %v1473_v24 = vld [vmem:[%s2367_s1 + $0x104] sm:$0xf0]  ;;  %v1355_v26 = vor.u32 %v1491_v15, %v1354_v14  ;;  %v1410_v29 = vld [vmem:[%s2368_s0 + $0xc] sm:$0xf0]  ;;  %v1219_v38 = vor.u32 %v1457_v20, %v1218_v19 }
  0x16   :  { %698 = vmatpush.bf16.msra.mxu2 %v1307_v58  ;;  %v1346_v25 = vld [vmem:[%s2367_s1 + $0x180] sm:$0xf]  ;;  %v1489_v27 = vld [vmem:[%s2367_s1 + $0x184] sm:$0xf0]  ;;  %v1408_v30 = vld [vmem:[%s2368_s0 + $0x4] sm:$0xf]  ;;  %v1283_v39 = vor.u32 %v1473_v24, %v1282_v23 }
  0x17   :  { %747 = vmatpush.bf16.msra.mxu3 %v1371_v62  ;;  %v1026_v28 = vld [vmem:[%s2368_s0] sm:$0xf]  ;;  %v1028_v31 = vld [vmem:[%s2368_s0 + $0x10] sm:$0xf0]  ;;  %v1340_v33 = vld [vmem:[%s2367_s1 + $0x178] sm:$0xf0]  ;;  %v1347_v43 = vor.u32 %v1489_v27, %v1346_v25 }
  0x18   :  { %601 = vmatpush.bf16.msra.mxu0 %v1171_v4  ;;  %v1486_v32 = vld [vmem:[%s2367_s1 + $0x174] sm:$0xf]  ;;  %v1034_v35 = vld [vmem:[%s2368_s0 + $0x8] sm:$0xf]  ;;  %v1404_v37 = vld [vmem:[%s2367_s1 + $0x1f8] sm:$0xf0]  ;;  %v1761_v48 = vor.u32 %v1410_v29, %v1026_v28  ;;  %v1772_v53 = vor.u32 %v1408_v30, %v1028_v31 }
  0x19   :  { %650 = vmatpush.bf16.msra.mxu1 %v1235_v5  ;;  %v1502_v36 = vld [vmem:[%s2367_s1 + $0x1f4] sm:$0xf]  ;;  %v1411_v40 = vld [vmem:[%s2368_s0 + $0x14] sm:$0xf0]  ;;  %v1409_v41 = vld [vmem:[%s2368_s0 + $0xc] sm:$0xf]  ;;  %v1343_v44 = vor.u32 %v1486_v32, %v1340_v33 }
  0x1a   :  { %699 = vmatpush.bf16.msra.mxu2 %v1299_v6  ;;  %v1036_v42 = vld [vmem:[%s2368_s0 + $0x18] sm:$0xf0]  ;;  %v1454_v45 = vld [vmem:[%s2367_s1 + $0x74] sm:$0xf]  ;;  %v1407_v49 = vor.u32 %v1502_v36, %v1404_v37  ;;  %v1484_v51 = vld [vmem:[%s2367_s1 + $0x164] sm:$0xf]  ;;  %v1774_v54 = vor.u32 %v1411_v40, %v1034_v35 }
  0x1b   :  { %748 = vmatpush.bf16.msra.mxu3 %v1363_v10  ;;  %v1212_v46 = vld [vmem:[%s2367_s1 + $0x78] sm:$0xf0]  ;;  %v1470_v47 = vld [vmem:[%s2367_s1 + $0xf4] sm:$0xf]  ;;  %v1332_v52 = vld [vmem:[%s2367_s1 + $0x168] sm:$0xf0]  ;;  %v1782_v57 = vor.u32 %v1409_v41, %v1036_v42 }
  0x1c   :  { %602 = vmatpush.bf16.msra.mxu0 %v1163_v17  ;;  %v1276_v50 = vld [vmem:[%s2367_s1 + $0xf8] sm:$0xf0]  ;;  %v1500_v55 = vld [vmem:[%s2367_s1 + $0x1e4] sm:$0xf]  ;;  %v1396_v56 = vld [vmem:[%s2367_s1 + $0x1e8] sm:$0xf0]  ;;  %v1215_v58 = vor.u32 %v1454_v45, %v1212_v46  ;;  %v1335_v60 = vor.u32 %v1484_v51, %v1332_v52 }
  0x1d   :  { %651 = vmatpush.bf16.msra.mxu1 %v1227_v21  ;;  %v1279_v59 = vor.u32 %v1470_v47, %v1276_v50  ;;  %v1452_v61 = vld [vmem:[%s2367_s1 + $0x64] sm:$0xf]  ;;  %v1204_v62 = vld [vmem:[%s2367_s1 + $0x68] sm:$0xf0]  ;;  %v1399_v63 = vor.u32 %v1500_v55, %v1396_v56  ;;  %v1482_v3 = vld [vmem:[%s2367_s1 + $0x154] sm:$0xf] }
  0x1e   :  { %700 = vmatpush.bf16.msra.mxu2 %v1291_v22  ;;  %v1468_v0 = vld [vmem:[%s2367_s1 + $0xe4] sm:$0xf]  ;;  %v1268_v1 = vld [vmem:[%s2367_s1 + $0xe8] sm:$0xf0]  ;;  %v1207_v2 = vor.u32 %v1452_v61, %v1204_v62  ;;  %v1324_v4 = vld [vmem:[%s2367_s1 + $0x158] sm:$0xf0] }
  0x1f   :  { %749 = vmatpush.bf16.msra.mxu3 %v1355_v26  ;;  %v1450_v5 = vld [vmem:[%s2367_s1 + $0x54] sm:$0xf]  ;;  %v1271_v6 = vor.u32 %v1468_v0, %v1268_v1  ;;  %v1327_v7 = vor.u32 %v1482_v3, %v1324_v4  ;;  %v1196_v8 = vld [vmem:[%s2367_s1 + $0x58] sm:$0xf0]  ;;  %v1042_v16 = vld [vmem:[%s2368_s0 + $0x20] sm:$0xf] }
  0x20   :  { %603 = vmatpush.bf16.msra.mxu0 %v1155_v34  ;;  %v1498_v9 = vld [vmem:[%s2367_s1 + $0x1d4] sm:$0xf]  ;;  %v1388_v10 = vld [vmem:[%s2367_s1 + $0x1d8] sm:$0xf0]  ;;  %v1199_v14 = vor.u32 %v1450_v5, %v1196_v8  ;;  %v1414_v17 = vld [vmem:[%s2368_s0 + $0x2c] sm:$0xf0] }
  0x21   :  { %652 = vmatpush.bf16.msra.mxu1 %v1219_v38  ;;  %v1391_v11 = vor.u32 %v1498_v9, %v1388_v10  ;;  %v1466_v12 = vld [vmem:[%s2367_s1 + $0xd4] sm:$0xf]  ;;  %v1260_v13 = vld [vmem:[%s2367_s1 + $0xd8] sm:$0xf0]  ;;  %v1412_v18 = vld [vmem:[%s2368_s0 + $0x24] sm:$0xf]  ;;  %v1848_v24 = vor.u32 %v1414_v17, %v1042_v16 }
  0x22   :  { %701 = vmatpush.bf16.msra.mxu2 %v1283_v39  ;;  %v1263_v15 = vor.u32 %v1466_v12, %v1260_v13  ;;  %v1044_v19 = vld [vmem:[%s2368_s0 + $0x30] sm:$0xf0]  ;;  %v1050_v20 = vld [vmem:[%s2368_s0 + $0x28] sm:$0xf]  ;;  %v1415_v21 = vld [vmem:[%s2368_s0 + $0x34] sm:$0xf0] }
  0x23   :  { %750 = vmatpush.bf16.msra.mxu3 %v1347_v43  ;;  %604 = vmatmul.bf16.vlgmr.msra.gmra.mxu0 %v1761_v48  ;;  %v1413_v22 = vld [vmem:[%s2368_s0 + $0x2c] sm:$0xf]  ;;  %v1052_v23 = vld [vmem:[%s2368_s0 + $0x38] sm:$0xf0]  ;;  %v1850_v25 = vor.u32 %v1412_v18, %v1044_v19  ;;  %v1852_v26 = vor.u32 %v1415_v21, %v1050_v20  ;;  %v1480_v28 = vld [vmem:[%s2367_s1 + $0x144] sm:$0xf] }
  0x24   :  { %653 = vmatmul.bf16.vlgmr.msra.gmra.mxu1 %v1772_v53  ;;  %792 = vmatpush.bf16.msrb.mxu0 %v1215_v58  ;;  %v1854_v27 = vor.u32 %v1413_v22, %v1052_v23  ;;  %v1316_v29 = vld [vmem:[%s2367_s1 + $0x148] sm:$0xf0]  ;;  %v1448_v30 = vld [vmem:[%s2367_s1 + $0x44] sm:$0xf]  ;;  %v1058_v40 = vld [vmem:[%s2368_s0 + $0x40] sm:$0xf] }
  0x25   :  { %702 = vmatmul.bf16.vlgmr.msra.gmra.mxu2 %v1774_v54  ;;  %841 = vmatpush.bf16.msrb.mxu1 %v1279_v59  ;;  %v1319_v31 = vor.u32 %v1480_v28, %v1316_v29  ;;  %v1188_v32 = vld [vmem:[%s2367_s1 + $0x48] sm:$0xf0]  ;;  %v1496_v33 = vld [vmem:[%s2367_s1 + $0x1c4] sm:$0xf]  ;;  %v1418_v41 = vld [vmem:[%s2368_s0 + $0x4c] sm:$0xf0] }
  0x26   :  { %890 = vmatpush.bf16.msrb.mxu2 %v1343_v44  ;;  %751 = vmatmul.bf16.vlgmr.msra.gmra.mxu3 %v1782_v57  ;;  %v1380_v34 = vld [vmem:[%s2367_s1 + $0x1c8] sm:$0xf0]  ;;  %v1191_v35 = vor.u32 %v1448_v30, %v1188_v32  ;;  %v1464_v37 = vld [vmem:[%s2367_s1 + $0xc4] sm:$0xf]  ;;  %v1060_v43 = vld [vmem:[%s2368_s0 + $0x50] sm:$0xf0] }
  0x27   :  { %939 = vmatpush.bf16.msrb.mxu3 %v1407_v49  ;;  %v1383_v36 = vor.u32 %v1496_v33, %v1380_v34  ;;  %v1252_v38 = vld [vmem:[%s2367_s1 + $0xc8] sm:$0xf0]  ;;  %v1416_v42 = vld [vmem:[%s2368_s0 + $0x44] sm:$0xf]  ;;  %v1066_v44 = vld [vmem:[%s2368_s0 + $0x48] sm:$0xf]  ;;  %v1908_v49 = vor.u32 %v1418_v41, %v1058_v40 }
  0x28   :  { %793 = vmatpush.bf16.msrb.mxu0 %v1207_v2  ;;  %v1255_v39 = vor.u32 %v1464_v37, %v1252_v38  ;;  %v1419_v45 = vld [vmem:[%s2368_s0 + $0x54] sm:$0xf0]  ;;  %v1417_v46 = vld [vmem:[%s2368_s0 + $0x4c] sm:$0xf]  ;;  %v1068_v47 = vld [vmem:[%s2368_s0 + $0x58] sm:$0xf0]  ;;  %v1910_v50 = vor.u32 %v1416_v42, %v1060_v43 }
  0x29   :  { %842 = vmatpush.bf16.msrb.mxu1 %v1271_v6  ;;  %v1912_v51 = vor.u32 %v1419_v45, %v1066_v44  ;;  %v1914_v52 = vor.u32 %v1417_v46, %v1068_v47  ;;  %v1478_v55 = vld [vmem:[%s2367_s1 + $0x134] sm:$0xf]  ;;  %v1308_v56 = vld [vmem:[%s2367_s1 + $0x138] sm:$0xf0]  ;;  %v1074_v4 = vld [vmem:[%s2368_s0 + $0x60] sm:$0xf] }
  0x2a   :  { %891 = vmatpush.bf16.msrb.mxu2 %v1335_v60  ;;  %v1446_v58 = vld [vmem:[%s2367_s1 + $0x34] sm:$0xf]  ;;  %v1311_v59 = vor.u32 %v1478_v55, %v1308_v56  ;;  %v1180_v60 = vld [vmem:[%s2367_s1 + $0x38] sm:$0xf0]  ;;  %v1422_v5 = vld [vmem:[%s2368_s0 + $0x6c] sm:$0xf0] }
  0x2b   :  { %940 = vmatpush.bf16.msrb.mxu3 %v1399_v63  ;;  %v1494_v61 = vld [vmem:[%s2367_s1 + $0x1b4] sm:$0xf]  ;;  %v1372_v62 = vld [vmem:[%s2367_s1 + $0x1b8] sm:$0xf0]  ;;  %v1183_v63 = vor.u32 %v1446_v58, %v1180_v60  ;;  %v1420_v6 = vld [vmem:[%s2368_s0 + $0x64] sm:$0xf]  ;;  %v1968_v12 = vor.u32 %v1422_v5, %v1074_v4 }
  0x2c   :  { %794 = vmatpush.bf16.msrb.mxu0 %v1199_v14  ;;  %v1375_v0 = vor.u32 %v1494_v61, %v1372_v62  ;;  %v1462_v1 = vld [vmem:[%s2367_s1 + $0xb4] sm:$0xf]  ;;  %v1244_v2 = vld [vmem:[%s2367_s1 + $0xb8] sm:$0xf0]  ;;  %v1082_v8 = vld [vmem:[%s2368_s0 + $0x68] sm:$0xf] }
  0x2d   :  { %843 = vmatpush.bf16.msrb.mxu1 %v1263_v15  ;;  %v1247_v3 = vor.u32 %v1462_v1, %v1244_v2  ;;  %v1423_v9 = vld [vmem:[%s2368_s0 + $0x74] sm:$0xf0]  ;;  %v1421_v10 = vld [vmem:[%s2368_s0 + $0x6c] sm:$0xf]  ;;  %v1476_v16 = vld [vmem:[%s2367_s1 + $0x124] sm:$0xf] }
  0x2e   :  { %892 = vmatpush.bf16.msrb.mxu2 %v1327_v7  ;;  %v1076_v7 = vld [vmem:[%s2368_s0 + $0x70] sm:$0xf0]  ;;  %v1972_v14 = vor.u32 %v1423_v9, %v1082_v8  ;;  %v1300_v17 = vld [vmem:[%s2367_s1 + $0x128] sm:$0xf0]  ;;  %v1444_v18 = vld [vmem:[%s2367_s1 + $0x24] sm:$0xf] }
  0x2f   :  { %941 = vmatpush.bf16.msrb.mxu3 %v1391_v11  ;;  %v1084_v11 = vld [vmem:[%s2368_s0 + $0x78] sm:$0xf0]  ;;  %v1970_v13 = vor.u32 %v1420_v6, %v1076_v7  ;;  %v1303_v19 = vor.u32 %v1476_v16, %v1300_v17  ;;  %v1172_v20 = vld [vmem:[%s2367_s1 + $0x28] sm:$0xf0]  ;;  %v1492_v21 = vld [vmem:[%s2367_s1 + $0x1a4] sm:$0xf] }
  0x30   :  { %795 = vmatpush.bf16.msrb.mxu0 %v1191_v35  ;;  %v1974_v15 = vor.u32 %v1421_v10, %v1084_v11  ;;  %v1364_v22 = vld [vmem:[%s2367_s1 + $0x1a8] sm:$0xf0]  ;;  %v1175_v23 = vor.u32 %v1444_v18, %v1172_v20  ;;  %v1460_v29 = vld [vmem:[%s2367_s1 + $0xa4] sm:$0xf]  ;;  %v1090_v32 = vld [vmem:[%s2368_s0 + $0x80] sm:$0xf] }
  0x31   :  { %844 = vmatpush.bf16.msrb.mxu1 %v1255_v39  ;;  %v1367_v28 = vor.u32 %v1492_v21, %v1364_v22  ;;  %v1236_v30 = vld [vmem:[%s2367_s1 + $0xa8] sm:$0xf0]  ;;  %v1426_v33 = vld [vmem:[%s2368_s0 + $0x8c] sm:$0xf0]  ;;  %v1424_v34 = vld [vmem:[%s2368_s0 + $0x84] sm:$0xf] }
  0x32   :  { %893 = vmatpush.bf16.msrb.mxu2 %v1319_v31  ;;  %v1239_v31 = vor.u32 %v1460_v29, %v1236_v30  ;;  %v1092_v35 = vld [vmem:[%s2368_s0 + $0x90] sm:$0xf0]  ;;  %v1427_v37 = vld [vmem:[%s2368_s0 + $0x94] sm:$0xf0]  ;;  %v1425_v38 = vld [vmem:[%s2368_s0 + $0x8c] sm:$0xf]  ;;  %v2028_v40 = vor.u32 %v1426_v33, %v1090_v32 }
  0x33   :  { %609 = vmatmul.bf16.gmra.mxu0 %v1848_v24  ;;  %942 = vmatpush.bf16.msrb.mxu3 %v1383_v36  ;;  %v1098_v36 = vld [vmem:[%s2368_s0 + $0x88] sm:$0xf]  ;;  %v1100_v39 = vld [vmem:[%s2368_s0 + $0x98] sm:$0xf0]  ;;  %v2030_v41 = vor.u32 %v1424_v34, %v1092_v35  ;;  %v1474_v44 = vld [vmem:[%s2367_s1 + $0x114] sm:$0xf] }
  0x34   :  { %658 = vmatmul.bf16.gmra.mxu1 %v1850_v25  ;;  %796 = vmatpush.bf16.msrb.mxu0 %v1183_v63  ;;  %v2032_v42 = vor.u32 %v1427_v37, %v1098_v36  ;;  %v2034_v43 = vor.u32 %v1425_v38, %v1100_v39  ;;  %v1292_v45 = vld [vmem:[%s2367_s1 + $0x118] sm:$0xf0]  ;;  %v1442_v46 = vld [vmem:[%s2367_s1 + $0x14] sm:$0xf]  ;;  %v1430_v1 = vld [vmem:[%s2368_s0 + $0xac] sm:$0xf0] }
  0x35   :  { %707 = vmatmul.bf16.gmra.mxu2 %v1852_v26  ;;  %845 = vmatpush.bf16.msrb.mxu1 %v1247_v3  ;;  %v1295_v47 = vor.u32 %v1474_v44, %v1292_v45  ;;  %v1164_v55 = vld [vmem:[%s2367_s1 + $0x18] sm:$0xf0]  ;;  %v1490_v56 = vld [vmem:[%s2367_s1 + $0x194] sm:$0xf]  ;;  %v1428_v2 = vld [vmem:[%s2368_s0 + $0xa4] sm:$0xf] }
  0x36   :  { %756 = vmatmul.bf16.gmra.mxu3 %v1854_v27  ;;  %894 = vmatpush.bf16.msrb.mxu2 %v1311_v59  ;;  %v1356_v58 = vld [vmem:[%s2367_s1 + $0x198] sm:$0xf0]  ;;  %v1167_v59 = vor.u32 %v1442_v46, %v1164_v55  ;;  %v1458_v61 = vld [vmem:[%s2367_s1 + $0x94] sm:$0xf]  ;;  %v1114_v4 = vld [vmem:[%s2368_s0 + $0xa8] sm:$0xf] }
  0x37   :  { %943 = vmatpush.bf16.msrb.mxu3 %v1375_v0  ;;  %v1359_v60 = vor.u32 %v1490_v56, %v1356_v58  ;;  %v1228_v62 = vld [vmem:[%s2367_s1 + $0x98] sm:$0xf0]  ;;  %v1106_v0 = vld [vmem:[%s2368_s0 + $0xa0] sm:$0xf]  ;;  %v1108_v3 = vld [vmem:[%s2368_s0 + $0xb0] sm:$0xf0] }
  0x38   :  { %797 = vmatpush.bf16.msrb.mxu0 %v1175_v23  ;;  %v1231_v63 = vor.u32 %v1458_v61, %v1228_v62  ;;  %v1431_v5 = vld [vmem:[%s2368_s0 + $0xb4] sm:$0xf0]  ;;  %v1429_v6 = vld [vmem:[%s2368_s0 + $0xac] sm:$0xf]  ;;  %v1116_v7 = vld [vmem:[%s2368_s0 + $0xb8] sm:$0xf0]  ;;  %v2088_v8 = vor.u32 %v1430_v1, %v1106_v0  ;;  %v2090_v9 = vor.u32 %v1428_v2, %v1108_v3 }
  0x39   :  { %846 = vmatpush.bf16.msrb.mxu1 %v1239_v31  ;;  %v2092_v10 = vor.u32 %v1431_v5, %v1114_v4  ;;  %v2094_v11 = vor.u32 %v1429_v6, %v1116_v7  ;;  %v1472_v16 = vld [vmem:[%s2367_s1 + $0x104] sm:$0xf]  ;;  %v1284_v17 = vld [vmem:[%s2367_s1 + $0x108] sm:$0xf0]  ;;  %v1122_v32 = vld [vmem:[%s2368_s0 + $0xc0] sm:$0xf] }
  0x3a   :  { %895 = vmatpush.bf16.msrb.mxu2 %v1303_v19  ;;  %v1440_v18 = vld [vmem:[%s2367_s1 + $0x4] sm:$0xf]  ;;  %v1287_v19 = vor.u32 %v1472_v16, %v1284_v17  ;;  %v1156_v20 = vld [vmem:[%s2367_s1 + $0x8] sm:$0xf0]  ;;  %v1434_v33 = vld [vmem:[%s2368_s0 + $0xcc] sm:$0xf0] }
  0x3b   :  { %944 = vmatpush.bf16.msrb.mxu3 %v1367_v28  ;;  %v1488_v21 = vld [vmem:[%s2367_s1 + $0x184] sm:$0xf]  ;;  %v1348_v22 = vld [vmem:[%s2367_s1 + $0x188] sm:$0xf0]  ;;  %v1159_v23 = vor.u32 %v1440_v18, %v1156_v20  ;;  %v1124_v35 = vld [vmem:[%s2368_s0 + $0xd0] sm:$0xf0]  ;;  %v2148_v44 = vor.u32 %v1434_v33, %v1122_v32 }
  0x3c   :  { %798 = vmatpush.bf16.msrb.mxu0 %v1167_v59  ;;  %v1351_v28 = vor.u32 %v1488_v21, %v1348_v22  ;;  %v1456_v29 = vld [vmem:[%s2367_s1 + $0x84] sm:$0xf]  ;;  %v1220_v30 = vld [vmem:[%s2367_s1 + $0x88] sm:$0xf0]  ;;  %v1130_v36 = vld [vmem:[%s2368_s0 + $0xc8] sm:$0xf] }
  0x3d   :  { %847 = vmatpush.bf16.msrb.mxu1 %v1231_v63  ;;  %v1223_v31 = vor.u32 %v1456_v29, %v1220_v30  ;;  %v1432_v34 = vld [vmem:[%s2368_s0 + $0xc4] sm:$0xf]  ;;  %v1435_v37 = vld [vmem:[%s2368_s0 + $0xd4] sm:$0xf0]  ;;  %v1433_v38 = vld [vmem:[%s2368_s0 + $0xcc] sm:$0xf] }
  0x3e   :  { %896 = vmatpush.bf16.msrb.mxu2 %v1295_v47  ;;  %v1132_v39 = vld [vmem:[%s2368_s0 + $0xd8] sm:$0xf0]  ;;  %v2150_v45 = vor.u32 %v1432_v34, %v1124_v35  ;;  %v2152_v46 = vor.u32 %v1435_v37, %v1130_v36  ;;  %v1138_v55 = vld [vmem:[%s2368_s0 + $0xe0] sm:$0xf]  ;;  %v1438_v56 = vld [vmem:[%s2368_s0 + $0xec] sm:$0xf0] }
  0x3f   :  { %945 = vmatpush.bf16.msrb.mxu3 %v1359_v60  ;;  %v2154_v47 = vor.u32 %v1433_v38, %v1132_v39  ;;  %v1436_v58 = vld [vmem:[%s2368_s0 + $0xe4] sm:$0xf]  ;;  %v1140_v59 = vld [vmem:[%s2368_s0 + $0xf0] sm:$0xf0]  ;;  %v1146_v60 = vld [vmem:[%s2368_s0 + $0xe8] sm:$0xf]  ;;  %v2184_v0 = vor.u32 %v1438_v56, %v1138_v55 }
  0x40   :  { %799 = vmatpush.bf16.msrb.mxu0 %v1159_v23  ;;  %v1439_v61 = vld [vmem:[%s2368_s0 + $0xf4] sm:$0xf0]  ;;  %v1437_v62 = vld [vmem:[%s2368_s0 + $0xec] sm:$0xf]  ;;  %v1148_v63 = vld [vmem:[%s2368_s0 + $0xf8] sm:$0xf0]  ;;  %v2186_v1 = vor.u32 %v1436_v58, %v1140_v59 }
  0x41   :  { %848 = vmatpush.bf16.msrb.mxu1 %v1223_v31  ;;  %v2188_v2 = vor.u32 %v1439_v61, %v1146_v60  ;;  %v2190_v3 = vor.u32 %v1437_v62, %v1148_v63  ;;  %v2199_v4 = vld [vmem:[%s2369_s2] sm:$0x3] }
  0x42   :  { %897 = vmatpush.bf16.msrb.mxu2 %v1287_v19  ;;  %v2202_v5 = vperm.slane %v2199_v4, 0 }
  0x43   :  { %614 = vmatmul.bf16.gmra.mxu0 %v1908_v49  ;;  %946 = vmatpush.bf16.msrb.mxu3 %v1351_v28 }
  0x44   :  { %663 = vmatmul.bf16.gmra.mxu1 %v1910_v50 }
  0x45   :  { %712 = vmatmul.bf16.gmra.mxu2 %v1912_v51 }
  0x46   :  { %761 = vmatmul.bf16.gmra.mxu3 %v1914_v52 }
  0x53   :  { %619 = vmatmul.bf16.gmra.mxu0 %v1968_v12 }
  0x54   :  { %668 = vmatmul.bf16.gmra.mxu1 %v1970_v13 }
  0x55   :  { %717 = vmatmul.bf16.gmra.mxu2 %v1972_v14 }
  0x56   :  { %766 = vmatmul.bf16.gmra.mxu3 %v1974_v15 }
  0x63   :  { %624 = vmatmul.bf16.gmra.mxu0 %v2028_v40 }
  0x64   :  { %673 = vmatmul.bf16.gmra.mxu1 %v2030_v41 }
  0x65   :  { %722 = vmatmul.bf16.gmra.mxu2 %v2032_v42 }
  0x66   :  { %771 = vmatmul.bf16.gmra.mxu3 %v2034_v43 }
  0x73   :  { %629 = vmatmul.bf16.gmra.mxu0 %v2088_v8 }
  0x74   :  { %678 = vmatmul.bf16.gmra.mxu1 %v2090_v9 }
  0x75   :  { %727 = vmatmul.bf16.gmra.mxu2 %v2092_v10 }
  0x76   :  { %776 = vmatmul.bf16.gmra.mxu3 %v2094_v11 }
  0x83   :  { %634 = vmatmul.bf16.gmra.mxu0 %v2148_v44 }
  0x84   :  { %683 = vmatmul.bf16.gmra.mxu1 %v2150_v45 }
  0x85   :  { %732 = vmatmul.bf16.gmra.mxu2 %v2152_v46 }
  0x86   :  { %781 = vmatmul.bf16.gmra.mxu3 %v2154_v47 }
  0x93   :  { %639 = vmatmul.bf16.gmra.mxu0 %v2184_v0 }
  0x94   :  { %688 = vmatmul.bf16.gmra.mxu1 %v2186_v1 }
  0x95   :  { %737 = vmatmul.bf16.gmra.mxu2 %v2188_v2 }
  0x96   :  { %786 = vmatmul.bf16.gmra.mxu3 %v2190_v3 }
  0xa0   :  { %v605_v6 = vpop.f32.mrf.mxu0 }
  0xa1   :  { %v606_v7 = vadd.f32 %v605_v6, %v2202_v5  ;;  %v654_v16 = vpop.f32.mrf.mxu1 }
  0xa3   :  { %800 = vmatmul.bf16.vlgmr.msrb.gmra.mxu0 %v1761_v48  ;;  %v655_v17 = vadd.f32 %v654_v16, %v606_v7 }
  0xa4   :  { %849 = vmatmul.bf16.vlgmr.msrb.gmra.mxu1 %v1772_v53 }
  0xa5   :  { %898 = vmatmul.bf16.vlgmr.msrb.gmra.mxu2 %v1774_v54 }
  0xa6   :  { %947 = vmatmul.bf16.vlgmr.msrb.gmra.mxu3 %v1782_v57 }
  0xa8   :  { %v703_v18 = vpop.f32.mrf.mxu2  ;;  %v607_v21 = vpop.f32.mrf.mxu0 }
  0xa9   :  { %v704_v19 = vadd.f32 %v703_v18, %v655_v17  ;;  %v752_v20 = vpop.f32.mrf.mxu3  ;;  %v656_v22 = vpop.f32.mrf.mxu1  ;;  %v608_v28 = vadd.f32 %v607_v21, %v2202_v5 }
  0xab   :  { %v753_v23 = vadd.f32 %v752_v20, %v704_v19  ;;  %v657_v48 = vadd.f32 %v656_v22, %v608_v28 }
  0xad   :  { %988 = vst [vmem:[%s2370_s3] sm:$0xff] %v753_v23 }
  0xb0   :  { %v705_v29 = vpop.f32.mrf.mxu2  ;;  %v610_v31 = vpop.f32.mrf.mxu0 }
  0xb1   :  { %v706_v30 = vadd.f32 %v705_v29, %v657_v48  ;;  %v754_v53 = vpop.f32.mrf.mxu3  ;;  %v611_v54 = vadd.f32 %v610_v31, %v2202_v5  ;;  %v659_v57 = vpop.f32.mrf.mxu1 }
  0xb3   :  { %v755_v32 = vadd.f32 %v754_v53, %v706_v30  ;;  %805 = vmatmul.bf16.gmra.mxu0 %v1848_v24  ;;  %v660_v33 = vadd.f32 %v659_v57, %v611_v54 }
  0xb4   :  { %854 = vmatmul.bf16.gmra.mxu1 %v1850_v25 }
  0xb5   :  { %990 = vst [vmem:[%s2370_s3 + $0x10] sm:$0xff] %v755_v32  ;;  %903 = vmatmul.bf16.gmra.mxu2 %v1852_v26 }
  0xb6   :  { %952 = vmatmul.bf16.gmra.mxu3 %v1854_v27 }
  0xb8   :  { %v708_v34 = vpop.f32.mrf.mxu2  ;;  %v612_v37 = vpop.f32.mrf.mxu0 }
  0xb9   :  { %v709_v35 = vadd.f32 %v708_v34, %v660_v33  ;;  %v757_v36 = vpop.f32.mrf.mxu3  ;;  %v661_v38 = vpop.f32.mrf.mxu1  ;;  %v613_v55 = vadd.f32 %v612_v37, %v2202_v5 }
  0xbb   :  { %v758_v39 = vadd.f32 %v757_v36, %v709_v35  ;;  %v662_v24 = vadd.f32 %v661_v38, %v613_v55 }
  0xbd   :  { %992 = vst [vmem:[%s2370_s3 + $0x20] sm:$0xff] %v758_v39 }
  0xc0   :  { %v710_v56 = vpop.f32.mrf.mxu2  ;;  %v615_v59 = vpop.f32.mrf.mxu0 }
  0xc1   :  { %v711_v58 = vadd.f32 %v710_v56, %v662_v24  ;;  %v759_v25 = vpop.f32.mrf.mxu3  ;;  %v616_v26 = vadd.f32 %v615_v59, %v2202_v5  ;;  %v664_v27 = vpop.f32.mrf.mxu1 }
  0xc3   :  { %v760_v60 = vadd.f32 %v759_v25, %v711_v58  ;;  %810 = vmatmul.bf16.gmra.mxu0 %v1908_v49  ;;  %v665_v61 = vadd.f32 %v664_v27, %v616_v26 }
  0xc4   :  { %859 = vmatmul.bf16.gmra.mxu1 %v1910_v50 }
  0xc5   :  { %994 = vst [vmem:[%s2370_s3 + $0x30] sm:$0xff] %v760_v60  ;;  %908 = vmatmul.bf16.gmra.mxu2 %v1912_v51 }
  0xc6   :  { %957 = vmatmul.bf16.gmra.mxu3 %v1914_v52 }
  0xc8   :  { %v713_v62 = vpop.f32.mrf.mxu2  ;;  %v617_v7 = vpop.f32.mrf.mxu0 }
  0xc9   :  { %v714_v63 = vadd.f32 %v713_v62, %v665_v61  ;;  %v762_v6 = vpop.f32.mrf.mxu3  ;;  %v666_v16 = vpop.f32.mrf.mxu1  ;;  %v618_v18 = vadd.f32 %v617_v7, %v2202_v5 }
  0xcb   :  { %v763_v17 = vadd.f32 %v762_v6, %v714_v63  ;;  %v667_v49 = vadd.f32 %v666_v16, %v618_v18 }
  0xcd   :  { %996 = vst [vmem:[%s2370_s3 + $0x40] sm:$0xff] %v763_v17 }
  0xd0   :  { %v715_v19 = vpop.f32.mrf.mxu2  ;;  %v620_v21 = vpop.f32.mrf.mxu0 }
  0xd1   :  { %v716_v20 = vadd.f32 %v715_v19, %v667_v49  ;;  %v764_v50 = vpop.f32.mrf.mxu3  ;;  %v621_v51 = vadd.f32 %v620_v21, %v2202_v5  ;;  %v669_v52 = vpop.f32.mrf.mxu1 }
  0xd3   :  { %v765_v22 = vadd.f32 %v764_v50, %v716_v20  ;;  %815 = vmatmul.bf16.gmra.mxu0 %v1968_v12  ;;  %v670_v23 = vadd.f32 %v669_v52, %v621_v51 }
  0xd4   :  { %864 = vmatmul.bf16.gmra.mxu1 %v1970_v13 }
  0xd5   :  { %998 = vst [vmem:[%s2370_s3 + $0x50] sm:$0xff] %v765_v22  ;;  %913 = vmatmul.bf16.gmra.mxu2 %v1972_v14 }
  0xd6   :  { %962 = vmatmul.bf16.gmra.mxu3 %v1974_v15 }
  0xd8   :  { %v718_v28 = vpop.f32.mrf.mxu2  ;;  %v622_v30 = vpop.f32.mrf.mxu0 }
  0xd9   :  { %v719_v48 = vadd.f32 %v718_v28, %v670_v23  ;;  %v767_v29 = vpop.f32.mrf.mxu3  ;;  %v671_v53 = vpop.f32.mrf.mxu1  ;;  %v623_v54 = vadd.f32 %v622_v30, %v2202_v5 }
  0xdb   :  { %v768_v31 = vadd.f32 %v767_v29, %v719_v48  ;;  %v672_v12 = vadd.f32 %v671_v53, %v623_v54 }
  0xdd   :  { %1000 = vst [vmem:[%s2370_s3 + $0x60] sm:$0xff] %v768_v31 }
  0xe0   :  { %v720_v57 = vpop.f32.mrf.mxu2  ;;  %v625_v33 = vpop.f32.mrf.mxu0 }
  0xe1   :  { %v721_v32 = vadd.f32 %v720_v57, %v672_v12  ;;  %v769_v13 = vpop.f32.mrf.mxu3  ;;  %v626_v14 = vadd.f32 %v625_v33, %v2202_v5  ;;  %v674_v15 = vpop.f32.mrf.mxu1 }
  0xe3   :  { %v770_v34 = vadd.f32 %v769_v13, %v721_v32  ;;  %820 = vmatmul.bf16.gmra.mxu0 %v2028_v40  ;;  %v675_v35 = vadd.f32 %v674_v15, %v626_v14 }
  0xe4   :  { %869 = vmatmul.bf16.gmra.mxu1 %v2030_v41 }
  0xe5   :  { %1002 = vst [vmem:[%s2370_s3 + $0x70] sm:$0xff] %v770_v34  ;;  %918 = vmatmul.bf16.gmra.mxu2 %v2032_v42 }
  0xe6   :  { %967 = vmatmul.bf16.gmra.mxu3 %v2034_v43 }
  0xe8   :  { %v723_v36 = vpop.f32.mrf.mxu2  ;;  %v627_v39 = vpop.f32.mrf.mxu0 }
  0xe9   :  { %v724_v37 = vadd.f32 %v723_v36, %v675_v35  ;;  %v772_v38 = vpop.f32.mrf.mxu3  ;;  %v676_v55 = vpop.f32.mrf.mxu1  ;;  %v628_v56 = vadd.f32 %v627_v39, %v2202_v5 }
  0xeb   :  { %v773_v24 = vadd.f32 %v772_v38, %v724_v37  ;;  %v677_v40 = vadd.f32 %v676_v55, %v628_v56 }
  0xed   :  { %1004 = vst [vmem:[%s2370_s3 + $0x80] sm:$0xff] %v773_v24 }
  0xf0   :  { %v725_v58 = vpop.f32.mrf.mxu2  ;;  %v630_v59 = vpop.f32.mrf.mxu0 }
  0xf1   :  { %v726_v25 = vadd.f32 %v725_v58, %v677_v40  ;;  %v774_v41 = vpop.f32.mrf.mxu3  ;;  %v631_v42 = vadd.f32 %v630_v59, %v2202_v5  ;;  %v679_v43 = vpop.f32.mrf.mxu1 }
  0xf3   :  { %v775_v26 = vadd.f32 %v774_v41, %v726_v25  ;;  %825 = vmatmul.bf16.gmra.mxu0 %v2088_v8  ;;  %v680_v27 = vadd.f32 %v679_v43, %v631_v42 }
  0xf4   :  { %874 = vmatmul.bf16.gmra.mxu1 %v2090_v9 }
  0xf5   :  { %1006 = vst [vmem:[%s2370_s3 + $0x90] sm:$0xff] %v775_v26  ;;  %923 = vmatmul.bf16.gmra.mxu2 %v2092_v10 }
  0xf6   :  { %972 = vmatmul.bf16.gmra.mxu3 %v2094_v11 }
  0xf8   :  { %v728_v60 = vpop.f32.mrf.mxu2  ;;  %v632_v63 = vpop.f32.mrf.mxu0 }
  0xf9   :  { %v729_v61 = vadd.f32 %v728_v60, %v680_v27  ;;  %v777_v62 = vpop.f32.mrf.mxu3  ;;  %v681_v6 = vpop.f32.mrf.mxu1  ;;  %v633_v16 = vadd.f32 %v632_v63, %v2202_v5 }
  0xfb   :  { %v778_v7 = vadd.f32 %v777_v62, %v729_v61  ;;  %v682_v8 = vadd.f32 %v681_v6, %v633_v16 }
  0xfd   :  { %1008 = vst [vmem:[%s2370_s3 + $0xa0] sm:$0xff] %v778_v7 }
 0x100   :  { %v730_v17 = vpop.f32.mrf.mxu2  ;;  %v635_v49 = vpop.f32.mrf.mxu0 }
 0x101   :  { %v731_v18 = vadd.f32 %v730_v17, %v682_v8  ;;  %v779_v9 = vpop.f32.mrf.mxu3  ;;  %v636_v10 = vadd.f32 %v635_v49, %v2202_v5  ;;  %v684_v11 = vpop.f32.mrf.mxu1 }
 0x103   :  { %v780_v19 = vadd.f32 %v779_v9, %v731_v18  ;;  %830 = vmatmul.bf16.gmra.mxu0 %v2148_v44  ;;  %v685_v20 = vadd.f32 %v684_v11, %v636_v10 }
 0x104   :  { %879 = vmatmul.bf16.gmra.mxu1 %v2150_v45 }
 0x105   :  { %1010 = vst [vmem:[%s2370_s3 + $0xb0] sm:$0xff] %v780_v19  ;;  %928 = vmatmul.bf16.gmra.mxu2 %v2152_v46 }
 0x106   :  { %977 = vmatmul.bf16.gmra.mxu3 %v2154_v47 }
 0x108   :  { %v733_v50 = vpop.f32.mrf.mxu2  ;;  %v637_v52 = vpop.f32.mrf.mxu0 }
 0x109   :  { %v734_v21 = vadd.f32 %v733_v50, %v685_v20  ;;  %v782_v51 = vpop.f32.mrf.mxu3  ;;  %v686_v22 = vpop.f32.mrf.mxu1  ;;  %v638_v28 = vadd.f32 %v637_v52, %v2202_v5 }
 0x10b   :  { %v783_v23 = vadd.f32 %v782_v51, %v734_v21  ;;  %v687_v44 = vadd.f32 %v686_v22, %v638_v28 }
 0x10d   :  { %1012 = vst [vmem:[%s2370_s3 + $0xc0] sm:$0xff] %v783_v23 }
 0x110   :  { %v735_v48 = vpop.f32.mrf.mxu2  ;;  %v640_v30 = vpop.f32.mrf.mxu0 }
 0x111   :  { %v736_v29 = vadd.f32 %v735_v48, %v687_v44  ;;  %v784_v45 = vpop.f32.mrf.mxu3  ;;  %v641_v46 = vadd.f32 %v640_v30, %v2202_v5  ;;  %v689_v47 = vpop.f32.mrf.mxu1 }
 0x113   :  { %v785_v53 = vadd.f32 %v784_v45, %v736_v29  ;;  %835 = vmatmul.bf16.gmra.mxu0 %v2184_v0  ;;  %v690_v31 = vadd.f32 %v689_v47, %v641_v46  ;;  %v2298_v0 = vperm.slane %v2199_v4, 1 }
 0x114   :  { %884 = vmatmul.bf16.gmra.mxu1 %v2186_v1 }
 0x115   :  { %1014 = vst [vmem:[%s2370_s3 + $0xd0] sm:$0xff] %v785_v53  ;;  %933 = vmatmul.bf16.gmra.mxu2 %v2188_v2 }
 0x116   :  { %982 = vmatmul.bf16.gmra.mxu3 %v2190_v3 }
 0x118   :  { %v738_v54 = vpop.f32.mrf.mxu2  ;;  %v642_v32 = vpop.f32.mrf.mxu0 }
 0x119   :  { %v739_v12 = vadd.f32 %v738_v54, %v690_v31  ;;  %v787_v57 = vpop.f32.mrf.mxu3  ;;  %v691_v13 = vpop.f32.mrf.mxu1  ;;  %v643_v14 = vadd.f32 %v642_v32, %v2202_v5 }
 0x11b   :  { %v788_v33 = vadd.f32 %v787_v57, %v739_v12  ;;  %v692_v1 = vadd.f32 %v691_v13, %v643_v14 }
 0x11d   :  { %1016 = vst [vmem:[%s2370_s3 + $0xe0] sm:$0xff] %v788_v33 }
 0x120   :  { %v740_v15 = vpop.f32.mrf.mxu2  ;;  %v801_v3 = vpop.f32.mrf.mxu0 }
 0x121   :  { %v741_v2 = vadd.f32 %v740_v15, %v692_v1  ;;  %v789_v34 = vpop.f32.mrf.mxu3  ;;  %v802_v35 = vadd.f32 %v801_v3, %v2298_v0  ;;  %v850_v36 = vpop.f32.mrf.mxu1 }
 0x123   :  { %v790_v37 = vadd.f32 %v789_v34, %v741_v2  ;;  %v851_v5 = vadd.f32 %v850_v36, %v802_v35 }
 0x125   :  { %1018 = vst [vmem:[%s2370_s3 + $0xf0] sm:$0xff] %v790_v37 }
 0x128   :  { %v899_v38 = vpop.f32.mrf.mxu2  ;;  %v803_v24 = vpop.f32.mrf.mxu0 }
 0x129   :  { %v900_v39 = vadd.f32 %v899_v38, %v851_v5  ;;  %v948_v55 = vpop.f32.mrf.mxu3  ;;  %v852_v4 = vpop.f32.mrf.mxu1  ;;  %v804_v40 = vadd.f32 %v803_v24, %v2298_v0 }
 0x12b   :  { %v949_v56 = vadd.f32 %v948_v55, %v900_v39  ;;  %v853_v58 = vadd.f32 %v852_v4, %v804_v40 }
 0x12d   :  { %989 = vst [vmem:[%s2370_s3 + $0x8] sm:$0xff] %v949_v56 }
 0x130   :  { %v901_v25 = vpop.f32.mrf.mxu2  ;;  %v806_v42 = vpop.f32.mrf.mxu0 }
 0x131   :  { %v902_v41 = vadd.f32 %v901_v25, %v853_v58  ;;  %v950_v59 = vpop.f32.mrf.mxu3  ;;  %v807_v43 = vadd.f32 %v806_v42, %v2298_v0  ;;  %v855_v26 = vpop.f32.mrf.mxu1 }
 0x133   :  { %v951_v27 = vadd.f32 %v950_v59, %v902_v41  ;;  %v856_v60 = vadd.f32 %v855_v26, %v807_v43 }
 0x135   :  { %991 = vst [vmem:[%s2370_s3 + $0x18] sm:$0xff] %v951_v27 }
 0x138   :  { %v904_v61 = vpop.f32.mrf.mxu2  ;;  %v808_v6 = vpop.f32.mrf.mxu0 }
 0x139   :  { %v905_v62 = vadd.f32 %v904_v61, %v856_v60  ;;  %v953_v63 = vpop.f32.mrf.mxu3  ;;  %v857_v7 = vpop.f32.mrf.mxu1  ;;  %v809_v8 = vadd.f32 %v808_v6, %v2298_v0 }
 0x13b   :  { %v954_v16 = vadd.f32 %v953_v63, %v905_v62  ;;  %v858_v17 = vadd.f32 %v857_v7, %v809_v8 }
 0x13d   :  { %993 = vst [vmem:[%s2370_s3 + $0x28] sm:$0xff] %v954_v16 }
 0x140   :  { %v906_v18 = vpop.f32.mrf.mxu2  ;;  %v811_v10 = vpop.f32.mrf.mxu0 }
 0x141   :  { %v907_v9 = vadd.f32 %v906_v18, %v858_v17  ;;  %v955_v49 = vpop.f32.mrf.mxu3  ;;  %v812_v11 = vadd.f32 %v811_v10, %v2298_v0  ;;  %v860_v19 = vpop.f32.mrf.mxu1 }
 0x143   :  { %v956_v20 = vadd.f32 %v955_v49, %v907_v9  ;;  %v861_v50 = vadd.f32 %v860_v19, %v812_v11 }
 0x145   :  { %995 = vst [vmem:[%s2370_s3 + $0x38] sm:$0xff] %v956_v20 }
 0x148   :  { %v909_v21 = vpop.f32.mrf.mxu2  ;;  %v813_v22 = vpop.f32.mrf.mxu0 }
 0x149   :  { %v910_v51 = vadd.f32 %v909_v21, %v861_v50  ;;  %v958_v52 = vpop.f32.mrf.mxu3  ;;  %v862_v23 = vpop.f32.mrf.mxu1  ;;  %v814_v44 = vadd.f32 %v813_v22, %v2298_v0 }
 0x14b   :  { %v959_v28 = vadd.f32 %v958_v52, %v910_v51  ;;  %v863_v48 = vadd.f32 %v862_v23, %v814_v44 }
 0x14d   :  { %997 = vst [vmem:[%s2370_s3 + $0x48] sm:$0xff] %v959_v28 }
 0x150   :  { %v911_v29 = vpop.f32.mrf.mxu2  ;;  %v816_v46 = vpop.f32.mrf.mxu0 }
 0x151   :  { %v912_v45 = vadd.f32 %v911_v29, %v863_v48  ;;  %v960_v30 = vpop.f32.mrf.mxu3  ;;  %v817_v47 = vadd.f32 %v816_v46, %v2298_v0  ;;  %v865_v53 = vpop.f32.mrf.mxu1 }
 0x153   :  { %v961_v31 = vadd.f32 %v960_v30, %v912_v45  ;;  %v866_v54 = vadd.f32 %v865_v53, %v817_v47 }
 0x155   :  { %999 = vst [vmem:[%s2370_s3 + $0x58] sm:$0xff] %v961_v31 }
 0x158   :  { %v914_v12 = vpop.f32.mrf.mxu2  ;;  %v818_v13 = vpop.f32.mrf.mxu0 }
 0x159   :  { %v915_v57 = vadd.f32 %v914_v12, %v866_v54  ;;  %v963_v32 = vpop.f32.mrf.mxu3  ;;  %v867_v33 = vpop.f32.mrf.mxu1  ;;  %v819_v1 = vadd.f32 %v818_v13, %v2298_v0 }
 0x15b   :  { %v964_v14 = vadd.f32 %v963_v32, %v915_v57  ;;  %v868_v15 = vadd.f32 %v867_v33, %v819_v1 }
 0x15d   :  { %1001 = vst [vmem:[%s2370_s3 + $0x68] sm:$0xff] %v964_v14 }
 0x160   :  { %v916_v2 = vpop.f32.mrf.mxu2  ;;  %v821_v35 = vpop.f32.mrf.mxu0 }
 0x161   :  { %v917_v34 = vadd.f32 %v916_v2, %v868_v15  ;;  %v965_v3 = vpop.f32.mrf.mxu3  ;;  %v822_v36 = vadd.f32 %v821_v35, %v2298_v0  ;;  %v870_v37 = vpop.f32.mrf.mxu1 }
 0x163   :  { %v966_v5 = vadd.f32 %v965_v3, %v917_v34  ;;  %v871_v38 = vadd.f32 %v870_v37, %v822_v36 }
 0x165   :  { %1003 = vst [vmem:[%s2370_s3 + $0x78] sm:$0xff] %v966_v5 }
 0x168   :  { %v919_v39 = vpop.f32.mrf.mxu2  ;;  %v823_v4 = vpop.f32.mrf.mxu0 }
 0x169   :  { %v920_v55 = vadd.f32 %v919_v39, %v871_v38  ;;  %v968_v24 = vpop.f32.mrf.mxu3  ;;  %v872_v56 = vpop.f32.mrf.mxu1  ;;  %v824_v58 = vadd.f32 %v823_v4, %v2298_v0 }
 0x16b   :  { %v969_v40 = vadd.f32 %v968_v24, %v920_v55  ;;  %v873_v25 = vadd.f32 %v872_v56, %v824_v58 }
 0x16d   :  { %1005 = vst [vmem:[%s2370_s3 + $0x88] sm:$0xff] %v969_v40 }
 0x170   :  { %v921_v41 = vpop.f32.mrf.mxu2  ;;  %v826_v43 = vpop.f32.mrf.mxu0 }
 0x171   :  { %v922_v59 = vadd.f32 %v921_v41, %v873_v25  ;;  %v970_v42 = vpop.f32.mrf.mxu3  ;;  %v827_v26 = vadd.f32 %v826_v43, %v2298_v0  ;;  %v875_v27 = vpop.f32.mrf.mxu1 }
 0x173   :  { %v971_v60 = vadd.f32 %v970_v42, %v922_v59  ;;  %v876_v61 = vadd.f32 %v875_v27, %v827_v26 }
 0x175   :  { %1007 = vst [vmem:[%s2370_s3 + $0x98] sm:$0xff] %v971_v60 }
 0x178   :  { %v924_v62 = vpop.f32.mrf.mxu2  ;;  %v828_v7 = vpop.f32.mrf.mxu0 }
 0x179   :  { %v925_v63 = vadd.f32 %v924_v62, %v876_v61  ;;  %v973_v6 = vpop.f32.mrf.mxu3  ;;  %v877_v16 = vpop.f32.mrf.mxu1  ;;  %v829_v17 = vadd.f32 %v828_v7, %v2298_v0 }
 0x17b   :  { %v974_v8 = vadd.f32 %v973_v6, %v925_v63  ;;  %v878_v18 = vadd.f32 %v877_v16, %v829_v17 }
 0x17d   :  { %1009 = vst [vmem:[%s2370_s3 + $0xa8] sm:$0xff] %v974_v8 }
 0x180   :  { %v926_v9 = vpop.f32.mrf.mxu2  ;;  %v831_v11 = vpop.f32.mrf.mxu0 }
 0x181   :  { %v927_v49 = vadd.f32 %v926_v9, %v878_v18  ;;  %v975_v10 = vpop.f32.mrf.mxu3  ;;  %v832_v19 = vadd.f32 %v831_v11, %v2298_v0  ;;  %v880_v20 = vpop.f32.mrf.mxu1 }
 0x183   :  { %v976_v50 = vadd.f32 %v975_v10, %v927_v49  ;;  %v881_v21 = vadd.f32 %v880_v20, %v832_v19 }
 0x185   :  { %1011 = vst [vmem:[%s2370_s3 + $0xb8] sm:$0xff] %v976_v50 }
 0x188   :  { %v929_v51 = vpop.f32.mrf.mxu2  ;;  %v833_v23 = vpop.f32.mrf.mxu0 }
 0x189   :  { %v930_v52 = vadd.f32 %v929_v51, %v881_v21  ;;  %v978_v22 = vpop.f32.mrf.mxu3  ;;  %v882_v28 = vpop.f32.mrf.mxu1  ;;  %v834_v48 = vadd.f32 %v833_v23, %v2298_v0 }
 0x18b   :  { %v979_v44 = vadd.f32 %v978_v22, %v930_v52  ;;  %v883_v29 = vadd.f32 %v882_v28, %v834_v48 }
 0x18d   :  { %1013 = vst [vmem:[%s2370_s3 + $0xc8] sm:$0xff] %v979_v44 }
 0x190   :  { %v931_v45 = vpop.f32.mrf.mxu2  ;;  %v836_v47 = vpop.f32.mrf.mxu0 }
 0x191   :  { %v932_v30 = vadd.f32 %v931_v45, %v883_v29  ;;  %v980_v46 = vpop.f32.mrf.mxu3  ;;  %v837_v53 = vadd.f32 %v836_v47, %v2298_v0  ;;  %v885_v54 = vpop.f32.mrf.mxu1 }
 0x193   :  { %v981_v31 = vadd.f32 %v980_v46, %v932_v30  ;;  %v886_v12 = vadd.f32 %v885_v54, %v837_v53 }
 0x195   :  { %1015 = vst [vmem:[%s2370_s3 + $0xd8] sm:$0xff] %v981_v31 }
 0x198   :  { %v934_v57 = vpop.f32.mrf.mxu2  ;;  %v838_v33 = vpop.f32.mrf.mxu0 }
 0x199   :  { %v935_v32 = vadd.f32 %v934_v57, %v886_v12  ;;  %v983_v13 = vpop.f32.mrf.mxu3  ;;  %v839_v1 = vadd.f32 %v838_v33, %v2298_v0  ;;  %v887_v15 = vpop.f32.mrf.mxu1 }
 0x19b   :  { %v984_v14 = vadd.f32 %v983_v13, %v935_v32  ;;  %v888_v2 = vadd.f32 %v887_v15, %v839_v1 }
 0x19d   :  { %1017 = vst [vmem:[%s2370_s3 + $0xe8] sm:$0xff] %v984_v14 }
 0x1a0   :  { %v936_v34 = vpop.f32.mrf.mxu2 }
 0x1a1   :  { %v937_v3 = vadd.f32 %v936_v34, %v888_v2  ;;  %v985_v35 = vpop.f32.mrf.mxu3 }
 0x1a3   :  { %v986_v36 = vadd.f32 %v985_v35, %v937_v3 }
 0x1a5   :  { %1019 = vst [vmem:[%s2370_s3 + $0xf8] sm:$0xff] %v986_v36 }

// kernel: vae_forward.14
= control target key start
LH: loop header
LB: loop body
LE: loop exit
PB: predicated region body
PF: predicated region fallthrough
CT: control target
= control target key end

     0   :  { %s524_s0 = inlined_call_operand.vmem [shape: f32[128,256], index: 0, kind: input, shape index: {}]   ;;  %s525_s1 = inlined_call_operand.vmem [shape: f32[1,256], index: 1, kind: input, shape index: {}]   ;;  %s526_s2 = inlined_call_operand.vmem [shape: f32[1,256], index: 2, kind: input, shape index: {}]   ;;  %s527_s3 = inlined_call_operand.vmem [shape: f32[128,256], index: 3, kind: output, shape index: {}]  }
   0x1   :  { %v14_v0 = vld [vmem:[%s524_s0] sm:$0xff]  ;;  %v15_v5 = vld [vmem:[%s524_s0 + $0x8] sm:$0xff]  ;;  %v16_v8 = vld [vmem:[%s524_s0 + $0x10] sm:$0xff] }
   0x2   :  { %v46_v1 = vld [vmem:[%s525_s1] sm:$0x3]  ;;  %v17_v9 = vld [vmem:[%s524_s0 + $0x18] sm:$0xff]  ;;  %v19_v11 = vld [vmem:[%s524_s0 + $0x28] sm:$0xff] }
   0x3   :  { %v84_v2 = vld [vmem:[%s526_s2] sm:$0x3]  ;;  %v251_v3 = vperm.slane %v46_v1, 0  ;;  %v258_v6 = vperm.slane %v46_v1, 1  ;;  %v20_v16 = vld [vmem:[%s524_s0 + $0x30] sm:$0xff]  ;;  %v21_v17 = vld [vmem:[%s524_s0 + $0x38] sm:$0xff] }
   0x4   :  { %v253_v4 = vperm.slane %v84_v2, 0  ;;  %v260_v7 = vperm.slane %v84_v2, 1  ;;  %v18_v10 = vld [vmem:[%s524_s0 + $0x20] sm:$0xff]  ;;  %v23_v35 = vld [vmem:[%s524_s0 + $0x48] sm:$0xff]  ;;  %v24_v36 = vld [vmem:[%s524_s0 + $0x50] sm:$0xff] }
   0x5   :  { %v52_v12 = vmul.f32 %v251_v3, %v14_v0  ;;  %v53_v13 = vmul.f32 %v258_v6, %v15_v5  ;;  %v54_v14 = vmul.f32 %v251_v3, %v16_v8  ;;  %v55_v15 = vmul.f32 %v258_v6, %v17_v9  ;;  %v22_v30 = vld [vmem:[%s524_s0 + $0x40] sm:$0xff]  ;;  %v25_v41 = vld [vmem:[%s524_s0 + $0x58] sm:$0xff]  ;;  %v27_v47 = vld [vmem:[%s524_s0 + $0x68] sm:$0xff] }
   0x6   :  { %v56_v18 = vmul.f32 %v251_v3, %v18_v10  ;;  %v57_v19 = vmul.f32 %v258_v6, %v19_v11  ;;  %v58_v20 = vmul.f32 %v251_v3, %v20_v16  ;;  %v59_v21 = vmul.f32 %v258_v6, %v21_v17  ;;  %v26_v42 = vld [vmem:[%s524_s0 + $0x60] sm:$0xff]  ;;  %v28_v48 = vld [vmem:[%s524_s0 + $0x70] sm:$0xff]  ;;  %v29_v49 = vld [vmem:[%s524_s0 + $0x78] sm:$0xff] }
   0x7   :  { %v90_v22 = vadd.f32 %v253_v4, %v52_v12  ;;  %v91_v23 = vadd.f32 %v260_v7, %v53_v13  ;;  %v92_v24 = vadd.f32 %v253_v4, %v54_v14  ;;  %v93_v25 = vadd.f32 %v260_v7, %v55_v15  ;;  %v361_v12 = vld [vmem:[%s524_s0 + $0x90] sm:$0xff] }
   0x8   :  { %v94_v26 = vadd.f32 %v253_v4, %v56_v18  ;;  %v95_v27 = vadd.f32 %v260_v7, %v57_v19  ;;  %v96_v28 = vadd.f32 %v253_v4, %v58_v20  ;;  %v97_v29 = vadd.f32 %v260_v7, %v59_v21 }
   0x9   :  { %v122_v31 = vmax.f32 %v90_v22, 0.0  ;;  %v123_v32 = vmax.f32 %v91_v23, 0.0  ;;  %v124_v33 = vmax.f32 %v92_v24, 0.0  ;;  %v125_v34 = vmax.f32 %v93_v25, 0.0  ;;  %v34_v22 = vld [vmem:[%s524_s0 + $0xa0] sm:$0xff] }
   0xa   :  { %v126_v37 = vmax.f32 %v94_v26, 0.0  ;;  %v127_v38 = vmax.f32 %v95_v27, 0.0  ;;  %v128_v39 = vmax.f32 %v96_v28, 0.0  ;;  %v129_v40 = vmax.f32 %v97_v29, 0.0  ;;  %v35_v27 = vld [vmem:[%s524_s0 + $0xa8] sm:$0xff]  ;;  %v36_v28 = vld [vmem:[%s524_s0 + $0xb0] sm:$0xff] }
   0xb   :  { %v154_v43 = vadd.f32 %v122_v31, %v14_v0  ;;  %v155_v44 = vadd.f32 %v123_v32, %v15_v5  ;;  %v156_v45 = vadd.f32 %v124_v33, %v16_v8  ;;  %v157_v46 = vadd.f32 %v125_v34, %v17_v9  ;;  %v37_v29 = vld [vmem:[%s524_s0 + $0xb8] sm:$0xff] }
   0xc   :  { %v158_v50 = vadd.f32 %v126_v37, %v18_v10  ;;  %v159_v51 = vadd.f32 %v127_v38, %v19_v11  ;;  %v160_v52 = vadd.f32 %v128_v39, %v20_v16  ;;  %v161_v53 = vadd.f32 %v129_v40, %v21_v17  ;;  %v351_v10 = vld [vmem:[%s524_s0 + $0x80] sm:$0xff]  ;;  %v356_v11 = vld [vmem:[%s524_s0 + $0x88] sm:$0xff]  ;;  %v33_v17 = vld [vmem:[%s524_s0 + $0x98] sm:$0xff] }
   0xd   :  { %186 = vst [vmem:[%s527_s3] sm:$0xff] %v154_v43  ;;  %v60_v54 = vmul.f32 %v251_v3, %v22_v30  ;;  %v61_v55 = vmul.f32 %v258_v6, %v23_v35  ;;  %v62_v56 = vmul.f32 %v251_v3, %v24_v36  ;;  %v63_v57 = vmul.f32 %v258_v6, %v25_v41 }
   0xe   :  { %187 = vst [vmem:[%s527_s3 + $0x8] sm:$0xff] %v155_v44  ;;  %v64_v58 = vmul.f32 %v251_v3, %v26_v42  ;;  %v65_v59 = vmul.f32 %v258_v6, %v27_v47  ;;  %v66_v60 = vmul.f32 %v251_v3, %v28_v48  ;;  %v67_v61 = vmul.f32 %v258_v6, %v29_v49 }
   0xf   :  { %188 = vst [vmem:[%s527_s3 + $0x10] sm:$0xff] %v156_v45  ;;  %v98_v62 = vadd.f32 %v253_v4, %v60_v54  ;;  %v99_v63 = vadd.f32 %v260_v7, %v61_v55  ;;  %v100_v0 = vadd.f32 %v253_v4, %v62_v56  ;;  %v101_v1 = vadd.f32 %v260_v7, %v63_v57  ;;  %v41_v57 = vld [vmem:[%s524_s0 + $0xd8] sm:$0xff] }
  0x10   :  { %189 = vst [vmem:[%s527_s3 + $0x18] sm:$0xff] %v157_v46  ;;  %v102_v2 = vadd.f32 %v253_v4, %v64_v58  ;;  %v103_v5 = vadd.f32 %v260_v7, %v65_v59  ;;  %v104_v8 = vadd.f32 %v253_v4, %v66_v60  ;;  %v105_v9 = vadd.f32 %v260_v7, %v67_v61 }
  0x11   :  { %190 = vst [vmem:[%s527_s3 + $0x20] sm:$0xff] %v158_v50  ;;  %v130_v13 = vmax.f32 %v98_v62, 0.0  ;;  %v131_v14 = vmax.f32 %v99_v63, 0.0  ;;  %v132_v15 = vmax.f32 %v100_v0, 0.0  ;;  %v133_v16 = vmax.f32 %v101_v1, 0.0  ;;  %v38_v50 = vld [vmem:[%s524_s0 + $0xc0] sm:$0xff] }
  0x12   :  { %191 = vst [vmem:[%s527_s3 + $0x28] sm:$0xff] %v159_v51  ;;  %v134_v18 = vmax.f32 %v102_v2, 0.0  ;;  %v135_v19 = vmax.f32 %v103_v5, 0.0  ;;  %v136_v20 = vmax.f32 %v104_v8, 0.0  ;;  %v137_v21 = vmax.f32 %v105_v9, 0.0  ;;  %v39_v51 = vld [vmem:[%s524_s0 + $0xc8] sm:$0xff] }
  0x13   :  { %192 = vst [vmem:[%s527_s3 + $0x30] sm:$0xff] %v160_v52  ;;  %v162_v23 = vadd.f32 %v130_v13, %v22_v30  ;;  %v163_v24 = vadd.f32 %v131_v14, %v23_v35  ;;  %v164_v25 = vadd.f32 %v132_v15, %v24_v36  ;;  %v165_v26 = vadd.f32 %v133_v16, %v25_v41  ;;  %v40_v52 = vld [vmem:[%s524_s0 + $0xd0] sm:$0xff]  ;;  %v42_v62 = vld [vmem:[%s524_s0 + $0xe0] sm:$0xff]  ;;  %v43_v5 = vld [vmem:[%s524_s0 + $0xe8] sm:$0xff] }
  0x14   :  { %193 = vst [vmem:[%s527_s3 + $0x38] sm:$0xff] %v161_v53  ;;  %v166_v30 = vadd.f32 %v134_v18, %v26_v42  ;;  %v167_v31 = vadd.f32 %v135_v19, %v27_v47  ;;  %v168_v32 = vadd.f32 %v136_v20, %v28_v48  ;;  %v169_v33 = vadd.f32 %v137_v21, %v29_v49  ;;  %v44_v8 = vld [vmem:[%s524_s0 + $0xf0] sm:$0xff]  ;;  %v45_v9 = vld [vmem:[%s524_s0 + $0xf8] sm:$0xff] }
  0x15   :  { %194 = vst [vmem:[%s527_s3 + $0x40] sm:$0xff] %v162_v23  ;;  %v68_v34 = vmul.f32 %v251_v3, %v351_v10  ;;  %v69_v35 = vmul.f32 %v258_v6, %v356_v11  ;;  %v70_v36 = vmul.f32 %v251_v3, %v361_v12  ;;  %v71_v37 = vmul.f32 %v258_v6, %v33_v17 }
  0x16   :  { %195 = vst [vmem:[%s527_s3 + $0x48] sm:$0xff] %v163_v24  ;;  %v72_v38 = vmul.f32 %v251_v3, %v34_v22  ;;  %v73_v39 = vmul.f32 %v258_v6, %v35_v27  ;;  %v74_v40 = vmul.f32 %v251_v3, %v36_v28  ;;  %v75_v41 = vmul.f32 %v258_v6, %v37_v29 }
  0x17   :  { %196 = vst [vmem:[%s527_s3 + $0x50] sm:$0xff] %v164_v25  ;;  %v106_v42 = vadd.f32 %v253_v4, %v68_v34  ;;  %v107_v43 = vadd.f32 %v260_v7, %v69_v35  ;;  %v108_v44 = vadd.f32 %v253_v4, %v70_v36  ;;  %v109_v45 = vadd.f32 %v260_v7, %v71_v37 }
  0x18   :  { %197 = vst [vmem:[%s527_s3 + $0x58] sm:$0xff] %v165_v26  ;;  %v110_v46 = vadd.f32 %v253_v4, %v72_v38  ;;  %v111_v47 = vadd.f32 %v260_v7, %v73_v39  ;;  %v112_v48 = vadd.f32 %v253_v4, %v74_v40  ;;  %v113_v49 = vadd.f32 %v260_v7, %v75_v41 }
  0x19   :  { %198 = vst [vmem:[%s527_s3 + $0x60] sm:$0xff] %v166_v30  ;;  %v138_v53 = vmax.f32 %v106_v42, 0.0  ;;  %v139_v54 = vmax.f32 %v107_v43, 0.0  ;;  %v140_v55 = vmax.f32 %v108_v44, 0.0  ;;  %v141_v56 = vmax.f32 %v109_v45, 0.0 }
  0x1a   :  { %199 = vst [vmem:[%s527_s3 + $0x68] sm:$0xff] %v167_v31  ;;  %v142_v58 = vmax.f32 %v110_v46, 0.0  ;;  %v143_v59 = vmax.f32 %v111_v47, 0.0  ;;  %v144_v60 = vmax.f32 %v112_v48, 0.0  ;;  %v145_v61 = vmax.f32 %v113_v49, 0.0 }
  0x1b   :  { %200 = vst [vmem:[%s527_s3 + $0x70] sm:$0xff] %v168_v32  ;;  %v170_v63 = vadd.f32 %v138_v53, %v351_v10  ;;  %v171_v0 = vadd.f32 %v139_v54, %v356_v11  ;;  %v172_v1 = vadd.f32 %v140_v55, %v361_v12  ;;  %v173_v2 = vadd.f32 %v141_v56, %v33_v17 }
  0x1c   :  { %201 = vst [vmem:[%s527_s3 + $0x78] sm:$0xff] %v169_v33  ;;  %v174_v10 = vadd.f32 %v142_v58, %v34_v22  ;;  %v175_v11 = vadd.f32 %v143_v59, %v35_v27  ;;  %v176_v12 = vadd.f32 %v144_v60, %v36_v28  ;;  %v177_v13 = vadd.f32 %v145_v61, %v37_v29 }
  0x1d   :  { %202 = vst [vmem:[%s527_s3 + $0x80] sm:$0xff] %v170_v63  ;;  %v76_v14 = vmul.f32 %v251_v3, %v38_v50  ;;  %v77_v15 = vmul.f32 %v258_v6, %v39_v51  ;;  %v78_v16 = vmul.f32 %v251_v3, %v40_v52  ;;  %v79_v17 = vmul.f32 %v258_v6, %v41_v57 }
  0x1e   :  { %203 = vst [vmem:[%s527_s3 + $0x88] sm:$0xff] %v171_v0  ;;  %v80_v18 = vmul.f32 %v251_v3, %v42_v62  ;;  %v81_v19 = vmul.f32 %v258_v6, %v43_v5  ;;  %v82_v20 = vmul.f32 %v251_v3, %v44_v8  ;;  %v83_v21 = vmul.f32 %v258_v6, %v45_v9 }
  0x1f   :  { %204 = vst [vmem:[%s527_s3 + $0x90] sm:$0xff] %v172_v1  ;;  %v114_v22 = vadd.f32 %v253_v4, %v76_v14  ;;  %v115_v23 = vadd.f32 %v260_v7, %v77_v15  ;;  %v116_v24 = vadd.f32 %v253_v4, %v78_v16  ;;  %v117_v25 = vadd.f32 %v260_v7, %v79_v17 }
  0x20   :  { %205 = vst [vmem:[%s527_s3 + $0x98] sm:$0xff] %v173_v2  ;;  %v118_v3 = vadd.f32 %v253_v4, %v80_v18  ;;  %v119_v6 = vadd.f32 %v260_v7, %v81_v19  ;;  %v120_v26 = vadd.f32 %v253_v4, %v82_v20  ;;  %v121_v27 = vadd.f32 %v260_v7, %v83_v21 }
  0x21   :  { %206 = vst [vmem:[%s527_s3 + $0xa0] sm:$0xff] %v174_v10  ;;  %v146_v28 = vmax.f32 %v114_v22, 0.0  ;;  %v147_v29 = vmax.f32 %v115_v23, 0.0  ;;  %v148_v30 = vmax.f32 %v116_v24, 0.0  ;;  %v149_v31 = vmax.f32 %v117_v25, 0.0 }
  0x22   :  { %207 = vst [vmem:[%s527_s3 + $0xa8] sm:$0xff] %v175_v11  ;;  %v150_v32 = vmax.f32 %v118_v3, 0.0  ;;  %v151_v33 = vmax.f32 %v119_v6, 0.0  ;;  %v152_v35 = vmax.f32 %v120_v26, 0.0  ;;  %v153_v37 = vmax.f32 %v121_v27, 0.0 }
  0x23   :  { %208 = vst [vmem:[%s527_s3 + $0xb0] sm:$0xff] %v176_v12  ;;  %v178_v4 = vadd.f32 %v146_v28, %v38_v50  ;;  %v179_v7 = vadd.f32 %v147_v29, %v39_v51  ;;  %v180_v34 = vadd.f32 %v148_v30, %v40_v52  ;;  %v181_v36 = vadd.f32 %v149_v31, %v41_v57 }
  0x24   :  { %209 = vst [vmem:[%s527_s3 + $0xb8] sm:$0xff] %v177_v13  ;;  %v182_v38 = vadd.f32 %v150_v32, %v42_v62  ;;  %v183_v39 = vadd.f32 %v151_v33, %v43_v5  ;;  %v184_v40 = vadd.f32 %v152_v35, %v44_v8  ;;  %v185_v41 = vadd.f32 %v153_v37, %v45_v9 }
  0x25   :  { %210 = vst [vmem:[%s527_s3 + $0xc0] sm:$0xff] %v178_v4 }
  0x26   :  { %211 = vst [vmem:[%s527_s3 + $0xc8] sm:$0xff] %v179_v7 }
  0x27   :  { %212 = vst [vmem:[%s527_s3 + $0xd0] sm:$0xff] %v180_v34 }
  0x28   :  { %213 = vst [vmem:[%s527_s3 + $0xd8] sm:$0xff] %v181_v36 }
  0x29   :  { %214 = vst [vmem:[%s527_s3 + $0xe0] sm:$0xff] %v182_v38 }
  0x2a   :  { %215 = vst [vmem:[%s527_s3 + $0xe8] sm:$0xff] %v183_v39 }
  0x2b   :  { %216 = vst [vmem:[%s527_s3 + $0xf0] sm:$0xff] %v184_v40 }
  0x2c   :  { %217 = vst [vmem:[%s527_s3 + $0xf8] sm:$0xff] %v185_v41 }

// kernel: vae_forward.15
= control target key start
LH: loop header
LB: loop body
LE: loop exit
PB: predicated region body
PF: predicated region fallthrough
CT: control target
= control target key end

     0   :  { %s4797_s1 = inlined_call_operand.vmem [shape: bf16[256,128], index: 1, kind: input, shape index: {}]   ;;  %s4798_s2 = inlined_call_operand.vmem [shape: f32[1,128], index: 2, kind: input, shape index: {}]   ;;  %s4799_s0 = inlined_call_operand.vmem [shape: bf16[512,256], index: 0, kind: input, shape index: {}]   ;;  %s4800_s3 = inlined_call_operand.vmem [shape: f32[512,128], index: 3, kind: output, shape index: {}]  }
   0x1   :  { %v2607_v0 = vld [vmem:[%s4797_s1 + $0x38] sm:$0xff]  ;;  %v2606_v2 = vld [vmem:[%s4797_s1 + $0x30] sm:$0xff]  ;;  %v2605_v4 = vld [vmem:[%s4797_s1 + $0x28] sm:$0xff] }
   0x2   :  { %v2615_v1 = vld [vmem:[%s4797_s1 + $0x78] sm:$0xff]  ;;  %530 = vmatpush.bf16.msra.mxu0 %v2607_v0  ;;  %2616 = vmatpush.bf16.msra.mxu2 %v2607_v0  ;;  %v2614_v3 = vld [vmem:[%s4797_s1 + $0x70] sm:$0xff]  ;;  %v2613_v5 = vld [vmem:[%s4797_s1 + $0x68] sm:$0xff] }
   0x3   :  { %699 = vmatpush.bf16.msra.mxu1 %v2615_v1  ;;  %2624 = vmatpush.bf16.msra.mxu3 %v2615_v1  ;;  %v2604_v6 = vld [vmem:[%s4797_s1 + $0x20] sm:$0xff]  ;;  %v2603_v8 = vld [vmem:[%s4797_s1 + $0x18] sm:$0xff]  ;;  %v2602_v10 = vld [vmem:[%s4797_s1 + $0x10] sm:$0xff] }
   0x4   :  { %v2612_v7 = vld [vmem:[%s4797_s1 + $0x60] sm:$0xff]  ;;  %v2611_v9 = vld [vmem:[%s4797_s1 + $0x58] sm:$0xff]  ;;  %v2610_v11 = vld [vmem:[%s4797_s1 + $0x50] sm:$0xff] }
   0x5   :  { %v2601_v12 = vld [vmem:[%s4797_s1 + $0x8] sm:$0xff]  ;;  %v2600_v14 = vld [vmem:[%s4797_s1] sm:$0xff]  ;;  %v2162_v28 = vld [vmem:[%s4799_s0 + $0x10] sm:$0xf] }
   0x6   :  { %531 = vmatpush.bf16.msra.mxu0 %v2606_v2  ;;  %2617 = vmatpush.bf16.msra.mxu2 %v2606_v2  ;;  %v2609_v13 = vld [vmem:[%s4797_s1 + $0x48] sm:$0xff]  ;;  %v2608_v15 = vld [vmem:[%s4797_s1 + $0x40] sm:$0xff]  ;;  %v2539_v29 = vld [vmem:[%s4799_s0 + $0x14] sm:$0xf0] }
   0x7   :  { %700 = vmatpush.bf16.msra.mxu1 %v2614_v3  ;;  %2625 = vmatpush.bf16.msra.mxu3 %v2614_v3  ;;  %v2154_v16 = vld [vmem:[%s4799_s0] sm:$0xf]  ;;  %v2537_v17 = vld [vmem:[%s4799_s0 + $0x4] sm:$0xf0]  ;;  %v2536_v20 = vld [vmem:[%s4799_s0 + $0x4] sm:$0xf]  ;;  %v2163_v36 = vor.u32 %v2539_v29, %v2162_v28 }
   0x8   :  { %v2282_v18 = vld [vmem:[%s4799_s0 + $0x100] sm:$0xf]  ;;  %v2569_v19 = vld [vmem:[%s4799_s0 + $0x104] sm:$0xf0]  ;;  %v2156_v21 = vld [vmem:[%s4799_s0 + $0x8] sm:$0xf0]  ;;  %v2155_v24 = vor.u32 %v2537_v17, %v2154_v16 }
   0x9   :  { %v2568_v22 = vld [vmem:[%s4799_s0 + $0x104] sm:$0xf]  ;;  %v2284_v23 = vld [vmem:[%s4799_s0 + $0x108] sm:$0xf0]  ;;  %v2283_v25 = vor.u32 %v2569_v19, %v2282_v18  ;;  %v2159_v26 = vor.u32 %v2536_v20, %v2156_v21  ;;  %v2290_v30 = vld [vmem:[%s4799_s0 + $0x110] sm:$0xf] }
   0xa   :  { %532 = vmatpush.bf16.msra.mxu0 %v2605_v4  ;;  %2618 = vmatpush.bf16.msra.mxu2 %v2605_v4  ;;  %v2287_v27 = vor.u32 %v2568_v22, %v2284_v23  ;;  %v2571_v31 = vld [vmem:[%s4799_s0 + $0x114] sm:$0xf0]  ;;  %v2538_v32 = vld [vmem:[%s4799_s0 + $0x14] sm:$0xf]  ;;  %v2164_v33 = vld [vmem:[%s4799_s0 + $0x18] sm:$0xf0] }
   0xb   :  { %701 = vmatpush.bf16.msra.mxu1 %v2613_v5  ;;  %2626 = vmatpush.bf16.msra.mxu3 %v2613_v5  ;;  %v2570_v34 = vld [vmem:[%s4799_s0 + $0x114] sm:$0xf]  ;;  %v2292_v35 = vld [vmem:[%s4799_s0 + $0x118] sm:$0xf0]  ;;  %v2291_v37 = vor.u32 %v2571_v31, %v2290_v30  ;;  %v2167_v38 = vor.u32 %v2538_v32, %v2164_v33  ;;  %v2170_v40 = vld [vmem:[%s4799_s0 + $0x20] sm:$0xf] }
   0xc   :  { %v2295_v39 = vor.u32 %v2570_v34, %v2292_v35  ;;  %v2541_v41 = vld [vmem:[%s4799_s0 + $0x24] sm:$0xf0]  ;;  %v2298_v42 = vld [vmem:[%s4799_s0 + $0x120] sm:$0xf]  ;;  %v2540_v44 = vld [vmem:[%s4799_s0 + $0x24] sm:$0xf] }
   0xd   :  { %v2573_v43 = vld [vmem:[%s4799_s0 + $0x124] sm:$0xf0]  ;;  %v2172_v45 = vld [vmem:[%s4799_s0 + $0x28] sm:$0xf0]  ;;  %v2572_v46 = vld [vmem:[%s4799_s0 + $0x124] sm:$0xf]  ;;  %v2171_v48 = vor.u32 %v2541_v41, %v2170_v40 }
   0xe   :  { %533 = vmatpush.bf16.msra.mxu0 %v2604_v6  ;;  %2619 = vmatpush.bf16.msra.mxu2 %v2604_v6  ;;  %v2300_v47 = vld [vmem:[%s4799_s0 + $0x128] sm:$0xf0]  ;;  %v2299_v49 = vor.u32 %v2573_v43, %v2298_v42  ;;  %v2175_v50 = vor.u32 %v2540_v44, %v2172_v45  ;;  %v2178_v52 = vld [vmem:[%s4799_s0 + $0x30] sm:$0xf]  ;;  %v2543_v53 = vld [vmem:[%s4799_s0 + $0x34] sm:$0xf0] }
   0xf   :  { %702 = vmatpush.bf16.msra.mxu1 %v2612_v7  ;;  %2627 = vmatpush.bf16.msra.mxu3 %v2612_v7  ;;  %v2303_v51 = vor.u32 %v2572_v46, %v2300_v47  ;;  %v2306_v54 = vld [vmem:[%s4799_s0 + $0x130] sm:$0xf]  ;;  %v2575_v55 = vld [vmem:[%s4799_s0 + $0x134] sm:$0xf0]  ;;  %v2542_v56 = vld [vmem:[%s4799_s0 + $0x34] sm:$0xf]  ;;  %v2179_v60 = vor.u32 %v2543_v53, %v2178_v52 }
  0x10   :  { %v2180_v57 = vld [vmem:[%s4799_s0 + $0x38] sm:$0xf0]  ;;  %v2574_v58 = vld [vmem:[%s4799_s0 + $0x134] sm:$0xf]  ;;  %v2307_v61 = vor.u32 %v2575_v55, %v2306_v54  ;;  %v2186_v0 = vld [vmem:[%s4799_s0 + $0x40] sm:$0xf] }
  0x11   :  { %v2308_v59 = vld [vmem:[%s4799_s0 + $0x138] sm:$0xf0]  ;;  %v2183_v62 = vor.u32 %v2542_v56, %v2180_v57  ;;  %v2545_v1 = vld [vmem:[%s4799_s0 + $0x44] sm:$0xf0]  ;;  %v2314_v2 = vld [vmem:[%s4799_s0 + $0x140] sm:$0xf] }
  0x12   :  { %534 = vmatpush.bf16.msra.mxu0 %v2603_v8  ;;  %2620 = vmatpush.bf16.msra.mxu2 %v2603_v8  ;;  %v2311_v63 = vor.u32 %v2574_v58, %v2308_v59  ;;  %v2577_v3 = vld [vmem:[%s4799_s0 + $0x144] sm:$0xf0]  ;;  %v2544_v4 = vld [vmem:[%s4799_s0 + $0x44] sm:$0xf]  ;;  %v2188_v5 = vld [vmem:[%s4799_s0 + $0x48] sm:$0xf0]  ;;  %v2187_v8 = vor.u32 %v2545_v1, %v2186_v0 }
  0x13   :  { %703 = vmatpush.bf16.msra.mxu1 %v2611_v9  ;;  %2628 = vmatpush.bf16.msra.mxu3 %v2611_v9  ;;  %v2576_v6 = vld [vmem:[%s4799_s0 + $0x144] sm:$0xf]  ;;  %v2316_v7 = vld [vmem:[%s4799_s0 + $0x148] sm:$0xf0]  ;;  %v2315_v9 = vor.u32 %v2577_v3, %v2314_v2  ;;  %v2546_v16 = vld [vmem:[%s4799_s0 + $0x54] sm:$0xf] }
  0x14   :  { %v2196_v17 = vld [vmem:[%s4799_s0 + $0x58] sm:$0xf0]  ;;  %v2578_v18 = vld [vmem:[%s4799_s0 + $0x154] sm:$0xf]  ;;  %v2548_v28 = vld [vmem:[%s4799_s0 + $0x64] sm:$0xf] }
  0x15   :  { %v2324_v19 = vld [vmem:[%s4799_s0 + $0x158] sm:$0xf0]  ;;  %v2199_v22 = vor.u32 %v2546_v16, %v2196_v17  ;;  %v2204_v29 = vld [vmem:[%s4799_s0 + $0x68] sm:$0xf0]  ;;  %v2580_v30 = vld [vmem:[%s4799_s0 + $0x164] sm:$0xf] }
  0x16   :  { %535 = vmatpush.bf16.msra.mxu0 %v2602_v10  ;;  %2621 = vmatpush.bf16.msra.mxu2 %v2602_v10  ;;  %v2191_v10 = vor.u32 %v2544_v4, %v2188_v5  ;;  %v2327_v23 = vor.u32 %v2578_v18, %v2324_v19  ;;  %v2332_v31 = vld [vmem:[%s4799_s0 + $0x168] sm:$0xf0]  ;;  %v2207_v34 = vor.u32 %v2548_v28, %v2204_v29  ;;  %v2550_v40 = vld [vmem:[%s4799_s0 + $0x74] sm:$0xf]  ;;  %v2212_v41 = vld [vmem:[%s4799_s0 + $0x78] sm:$0xf0] }
  0x17   :  { %704 = vmatpush.bf16.msra.mxu1 %v2610_v11  ;;  %2629 = vmatpush.bf16.msra.mxu3 %v2610_v11  ;;  %v2319_v11 = vor.u32 %v2576_v6, %v2316_v7  ;;  %v2335_v35 = vor.u32 %v2580_v30, %v2332_v31  ;;  %v2582_v42 = vld [vmem:[%s4799_s0 + $0x174] sm:$0xf]  ;;  %v2340_v43 = vld [vmem:[%s4799_s0 + $0x178] sm:$0xf0]  ;;  %v2215_v46 = vor.u32 %v2550_v40, %v2212_v41  ;;  %v2585_v52 = vld [vmem:[%s4799_s0 + $0x184] sm:$0xf0] }
  0x18   :  { %v2343_v47 = vor.u32 %v2582_v42, %v2340_v43  ;;  %v2552_v53 = vld [vmem:[%s4799_s0 + $0x84] sm:$0xf]  ;;  %v2220_v54 = vld [vmem:[%s4799_s0 + $0x88] sm:$0xf0]  ;;  %v2228_v16 = vld [vmem:[%s4799_s0 + $0x98] sm:$0xf0] }
  0x19   :  { %v2584_v55 = vld [vmem:[%s4799_s0 + $0x184] sm:$0xf]  ;;  %v2348_v56 = vld [vmem:[%s4799_s0 + $0x188] sm:$0xf0]  ;;  %v2586_v19 = vld [vmem:[%s4799_s0 + $0x194] sm:$0xf] }
  0x1a   :  { %536 = vmatpush.bf16.msra.mxu0 %v2601_v12  ;;  %2622 = vmatpush.bf16.msra.mxu2 %v2601_v12  ;;  %v2194_v12 = vld [vmem:[%s4799_s0 + $0x50] sm:$0xf]  ;;  %v3222_v40 = vld [vmem:[%s4799_s0 + $0xa4] sm:$0xf0]  ;;  %v3230_v43 = vld [vmem:[%s4799_s0 + $0x1a0] sm:$0xf] }
  0x1b   :  { %705 = vmatpush.bf16.msra.mxu1 %v2609_v13  ;;  %2630 = vmatpush.bf16.msra.mxu3 %v2609_v13  ;;  %v2547_v13 = vld [vmem:[%s4799_s0 + $0x54] sm:$0xf0] }
  0x1c   :  { %v2195_v20 = vor.u32 %v2547_v13, %v2194_v12  ;;  %v2555_v12 = vld [vmem:[%s4799_s0 + $0x94] sm:$0xf0]  ;;  %v2354_v13 = vld [vmem:[%s4799_s0 + $0x190] sm:$0xf] }
  0x1e   :  { %537 = vmatpush.bf16.msra.mxu0 %v2600_v14  ;;  %2623 = vmatpush.bf16.msra.mxu2 %v2600_v14  ;;  %v2322_v14 = vld [vmem:[%s4799_s0 + $0x150] sm:$0xf] }
  0x1f   :  { %706 = vmatpush.bf16.msra.mxu1 %v2608_v15  ;;  %2631 = vmatpush.bf16.msra.mxu3 %v2608_v15  ;;  %v2579_v15 = vld [vmem:[%s4799_s0 + $0x154] sm:$0xf0] }
  0x20   :  { %v2323_v21 = vor.u32 %v2579_v15, %v2322_v14  ;;  %v2587_v14 = vld [vmem:[%s4799_s0 + $0x194] sm:$0xf0]  ;;  %v2554_v15 = vld [vmem:[%s4799_s0 + $0x94] sm:$0xf] }
  0x21   :  { %538 = vmatmul.bf16.vlgmr.msra.gmra.mxu0 %v2155_v24  ;;  %618 = vmatmul.bf16.vlgmr.msra.gmra.mxu2 %v2283_v25  ;;  %v2202_v24 = vld [vmem:[%s4799_s0 + $0x60] sm:$0xf]  ;;  %v2549_v25 = vld [vmem:[%s4799_s0 + $0x64] sm:$0xf0]  ;;  %v2231_v28 = vor.u32 %v2554_v15, %v2228_v16  ;;  %v3299_v15 = vld [vmem:[%s4799_s0 + $0xb0] sm:$0xf] }
  0x22   :  { %707 = vmatmul.bf16.vlgmr.msra.gmra.mxu1 %v2159_v26  ;;  %787 = vmatmul.bf16.vlgmr.msra.gmra.mxu3 %v2287_v27  ;;  %v2330_v26 = vld [vmem:[%s4799_s0 + $0x160] sm:$0xf]  ;;  %v2581_v27 = vld [vmem:[%s4799_s0 + $0x164] sm:$0xf0]  ;;  %v2203_v32 = vor.u32 %v2549_v25, %v2202_v24  ;;  %v3304_v16 = vld [vmem:[%s4799_s0 + $0xb4] sm:$0xf0] }
  0x23   :  { %v2331_v33 = vor.u32 %v2581_v27, %v2330_v26  ;;  %v2355_v26 = vor.u32 %v2587_v14, %v2354_v13 }
  0x31   :  { %543 = vmatmul.bf16.gmra.mxu0 %v2163_v36  ;;  %623 = vmatmul.bf16.gmra.mxu2 %v2291_v37  ;;  %v2210_v36 = vld [vmem:[%s4799_s0 + $0x70] sm:$0xf]  ;;  %v2551_v37 = vld [vmem:[%s4799_s0 + $0x74] sm:$0xf0] }
  0x32   :  { %712 = vmatmul.bf16.gmra.mxu1 %v2167_v38  ;;  %792 = vmatmul.bf16.gmra.mxu3 %v2295_v39  ;;  %v2338_v38 = vld [vmem:[%s4799_s0 + $0x170] sm:$0xf]  ;;  %v2583_v39 = vld [vmem:[%s4799_s0 + $0x174] sm:$0xf0]  ;;  %v2211_v44 = vor.u32 %v2551_v37, %v2210_v36 }
  0x33   :  { %v2339_v45 = vor.u32 %v2583_v39, %v2338_v38  ;;  %v3217_v39 = vld [vmem:[%s4799_s0 + $0xa0] sm:$0xf] }
  0x41   :  { %548 = vmatmul.bf16.gmra.mxu0 %v2171_v48  ;;  %628 = vmatmul.bf16.gmra.mxu2 %v2299_v49  ;;  %v3154_v48 = vld [vmem:[%s4798_s2] ss:$0 sm:$0xff] }
  0x42   :  { %717 = vmatmul.bf16.gmra.mxu1 %v2175_v50  ;;  %797 = vmatmul.bf16.gmra.mxu3 %v2303_v51  ;;  %v2218_v49 = vld [vmem:[%s4799_s0 + $0x80] sm:$0xf]  ;;  %v2553_v50 = vld [vmem:[%s4799_s0 + $0x84] sm:$0xf0] }
  0x43   :  { %v2346_v51 = vld [vmem:[%s4799_s0 + $0x180] sm:$0xf]  ;;  %v2219_v57 = vor.u32 %v2553_v50, %v2218_v49  ;;  %v3249_v50 = vld [vmem:[%s4799_s0 + $0xa8] sm:$0xf0] }
  0x44   :  { %v2347_v58 = vor.u32 %v2585_v52, %v2346_v51  ;;  %v3254_v51 = vld [vmem:[%s4799_s0 + $0x1a4] sm:$0xf] }
  0x51   :  { %553 = vmatmul.bf16.gmra.mxu0 %v2179_v60  ;;  %633 = vmatmul.bf16.gmra.mxu2 %v2307_v61  ;;  %v2223_v60 = vor.u32 %v2552_v53, %v2220_v54  ;;  %v2351_v61 = vor.u32 %v2584_v55, %v2348_v56  ;;  %v2235_v56 = vor.u32 %v3222_v40, %v3217_v39 }
  0x52   :  { %722 = vmatmul.bf16.gmra.mxu1 %v2183_v62  ;;  %802 = vmatmul.bf16.gmra.mxu3 %v2311_v63 }
  0x61   :  { %558 = vmatmul.bf16.gmra.mxu0 %v2187_v8  ;;  %638 = vmatmul.bf16.gmra.mxu2 %v2315_v9  ;;  %v2226_v9 = vld [vmem:[%s4799_s0 + $0x90] sm:$0xf] }
  0x62   :  { %727 = vmatmul.bf16.gmra.mxu1 %v2191_v10  ;;  %807 = vmatmul.bf16.gmra.mxu3 %v2319_v11  ;;  %v2227_v25 = vor.u32 %v2555_v12, %v2226_v9 }
  0x71   :  { %563 = vmatmul.bf16.gmra.mxu0 %v2195_v20  ;;  %643 = vmatmul.bf16.gmra.mxu2 %v2323_v21  ;;  %v2356_v20 = vld [vmem:[%s4799_s0 + $0x198] sm:$0xf0] }
  0x72   :  { %732 = vmatmul.bf16.gmra.mxu1 %v2199_v22  ;;  %812 = vmatmul.bf16.gmra.mxu3 %v2327_v23  ;;  %v2359_v29 = vor.u32 %v2586_v19, %v2356_v20 }
  0x81   :  { %568 = vmatmul.bf16.gmra.mxu0 %v2203_v32  ;;  %648 = vmatmul.bf16.gmra.mxu2 %v2331_v33 }
  0x82   :  { %737 = vmatmul.bf16.gmra.mxu1 %v2207_v34  ;;  %817 = vmatmul.bf16.gmra.mxu3 %v2335_v35 }
  0x91   :  { %573 = vmatmul.bf16.gmra.mxu0 %v2211_v44  ;;  %653 = vmatmul.bf16.gmra.mxu2 %v2339_v45  ;;  %v3235_v44 = vld [vmem:[%s4799_s0 + $0x1a4] sm:$0xf0]  ;;  %v3240_v45 = vld [vmem:[%s4799_s0 + $0xa4] sm:$0xf] }
  0x92   :  { %742 = vmatmul.bf16.gmra.mxu1 %v2215_v46  ;;  %822 = vmatmul.bf16.gmra.mxu3 %v2343_v47 }
  0x9e   :  { %v539_v59 = vpop.f32.mrf.mxu0 }
  0x9f   :  { %v540_v62 = vadd.f32 %v3154_v48, %v539_v59  ;;  %v708_v63 = vpop.f32.mrf.mxu1 }
  0xa1   :  { %v709_v0 = vadd.f32 %v708_v63, %v540_v62  ;;  %578 = vmatmul.bf16.gmra.mxu0 %v2219_v57  ;;  %658 = vmatmul.bf16.gmra.mxu2 %v2347_v58  ;;  %v3264_v57 = vld [vmem:[%s4799_s0 + $0x1a8] sm:$0xf0] }
  0xa2   :  { %747 = vmatmul.bf16.gmra.mxu1 %v2223_v60  ;;  %827 = vmatmul.bf16.gmra.mxu3 %v2351_v61  ;;  %v2363_v61 = vor.u32 %v3235_v44, %v3230_v43 }
  0xa3   :  { %v2472_v1 = vmul.f32 -1.442695, %v709_v0 }
  0xa4   :  { %v619_v2 = vpop.f32.mrf.mxu2 }
  0xa5   :  { %2633 = vpow2.f32 %v2472_v1  ;;  %v620_v3 = vadd.f32 %v3154_v48, %v619_v2  ;;  %v788_v4 = vpop.f32.mrf.mxu3  ;;  %v2239_v1 = vor.u32 %v3240_v45, %v3249_v50 }
  0xa6   :  { %v541_v5 = vpop.f32.mrf.mxu0 }
  0xa7   :  { %v789_v6 = vadd.f32 %v788_v4, %v620_v3  ;;  %v542_v7 = vadd.f32 %v3154_v48, %v541_v5  ;;  %v710_v8 = vpop.f32.mrf.mxu1  ;;  %v2367_v4 = vor.u32 %v3254_v51, %v3264_v57 }
  0xa9   :  { %v2504_v10 = vmul.f32 -1.442695, %v789_v6  ;;  %v711_v11 = vadd.f32 %v710_v8, %v542_v7 }
  0xab   :  { %v2634_v17 = vpop.eup %2633  ;;  %2635 = vpow2.f32 %v2504_v10  ;;  %v2473_v18 = vmul.f32 -1.442695, %v711_v11 }
  0xac   :  { %v3207_v21 = vadd.f32 1.0, %v2634_v17  ;;  %v621_v22 = vpop.f32.mrf.mxu2 }
  0xad   :  { %2637 = vpow2.f32 %v2473_v18  ;;  %v622_v23 = vadd.f32 %v3154_v48, %v621_v22  ;;  %v790_v24 = vpop.f32.mrf.mxu3 }
  0xae   :  { %2639 = vrcp.f32 %v3207_v21  ;;  %v544_v27 = vpop.f32.mrf.mxu0  ;;  %v1133_v52 = vand.u32 2147483647, %v3207_v21  ;;  %v1135_v53 = vand.u32 2147483648, %v3207_v21  ;;  %vm1129_vm0 = vweird.f32 %v3207_v21 }
  0xaf   :  { %v791_v30 = vadd.f32 %v790_v24, %v622_v23  ;;  %v545_v31 = vadd.f32 %v3154_v48, %v544_v27  ;;  %v713_v32 = vpop.f32.mrf.mxu1  ;;  %v3319_v23 = vld [vmem:[%s4799_s0 + $0x1b0] sm:$0xf] }
  0xb0   :  { %vm3281_vm2 = vcmp.eq.f32.partialorder %v1133_v52, 8.507059e+37  ;;  %v1136_v7 = vor.u32 1.1754944e-38, %v1135_v53 }
  0xb1   :  { %v2636_v33 = vpop.eup %2635  ;;  %v2505_v34 = vmul.f32 -1.442695, %v791_v30  ;;  %v714_v35 = vadd.f32 %v713_v32, %v545_v31  ;;  %583 = vmatmul.bf16.gmra.mxu0 %v2227_v25  ;;  %663 = vmatmul.bf16.gmra.mxu2 %v2355_v26  ;;  %v3339_v30 = vld [vmem:[%s4799_s0 + $0xb8] sm:$0xf0] }
  0xb2   :  { %v3212_v36 = vadd.f32 1.0, %v2636_v33  ;;  %752 = vmatmul.bf16.gmra.mxu1 %v2231_v28  ;;  %832 = vmatmul.bf16.gmra.mxu3 %v2359_v29  ;;  %v3334_v29 = vld [vmem:[%s4799_s0 + $0xb4] sm:$0xf] }
  0xb3   :  { %v2638_v37 = vpop.eup %2637  ;;  %2641 = vpow2.f32 %v2505_v34  ;;  %v2474_v38 = vmul.f32 -1.442695, %v714_v35  ;;  %v2243_v34 = vor.u32 %v3304_v16, %v3299_v15  ;;  %v2247_v44 = vor.u32 %v3334_v29, %v3339_v30 }
  0xb4   :  { %v3224_v41 = vpop.eup %2639  ;;  %2643 = vrcp.f32 %v3212_v36  ;;  %v624_v42 = vpop.f32.mrf.mxu2  ;;  %v3244_v47 = vadd.f32 1.0, %v2638_v37  ;;  %v1613_v59 = vand.u32 2147483647, %v3212_v36  ;;  %v1615_v62 = vand.u32 2147483648, %v3212_v36 }
  0xb5   :  { %v1125_v46 = vmul.f32 %v3224_v41, %v3207_v21  ;;  %2645 = vpow2.f32 %v2474_v38  ;;  %v793_v49 = vpop.f32.mrf.mxu3  ;;  %v625_v54 = vadd.f32 %v3154_v48, %v624_v42  ;;  %vm1130_vm1 = vweird.f32 %v3224_v41  ;;  %v3324_v21 = vld [vmem:[%s4799_s0 + $0x1b4] sm:$0xf0] }
  0xb6   :  { %v546_v55 = vpop.f32.mrf.mxu0  ;;  %2647 = vrcp.f32 %v3244_v47  ;;  %vm1609_vm3 = vweird.f32 %v3212_v36  ;;  %vm3291_vm4 = vcmp.eq.f32.partialorder %v1613_v59, 8.507059e+37  ;;  %v1148_v14 = vand.u32 2147483647, %v3244_v47  ;;  %vm3310_vm5 = vmor %vm1129_vm0, %vm1130_vm1 }
  0xb7   :  { %v1126_v58 = vsub.f32 1.0, %v1125_v46  ;;  %v715_v60 = vpop.f32.mrf.mxu1  ;;  %v794_v63 = vadd.f32 %v793_v49, %v625_v54  ;;  %v547_v0 = vadd.f32 %v3154_v48, %v546_v55  ;;  %v1616_v18 = vor.u32 1.1754944e-38, %v1615_v62 }
  0xb8   :  { %v1150_v19 = vand.u32 2147483648, %v3244_v47  ;;  %vm1144_vm6 = vweird.f32 %v3244_v47  ;;  %vm3352_vm8 = vcmp.eq.f32.partialorder %v1148_v14, 8.507059e+37  ;;  %v2371_v43 = vor.u32 %v3324_v21, %v3319_v23  ;;  %v3461_v21 = vld [vmem:[%s4799_s0 + $0xc0] sm:$0xf] }
  0xb9   :  { %v2642_v2 = vpop.eup %2641  ;;  %v1127_v3 = vmul.f32 %v3224_v41, %v1126_v58  ;;  %v2506_v9 = vmul.f32 -1.442695, %v794_v63  ;;  %v716_v20 = vadd.f32 %v715_v60, %v547_v0 }
  0xba   :  { %v3279_v5 = vpop.eup %2643  ;;  %v3285_v8 = vadd.f32 1.0, %v2642_v2  ;;  %v1151_v46 = vor.u32 1.1754944e-38, %v1150_v19 }
  0xbb   :  { %v2646_v10 = vpop.eup %2645  ;;  %v1128_v11 = vadd.f32 %v3224_v41, %v1127_v3  ;;  %v1605_v12 = vmul.f32 %v3279_v5, %v3212_v36  ;;  %vm1610_vm7 = vweird.f32 %v3279_v5  ;;  %v2475_v42 = vmul.f32 -1.442695, %v716_v20 }
  0xbc   :  { %2649 = vrcp.f32 %v3285_v8  ;;  %v626_v22 = vpop.f32.mrf.mxu2  ;;  %v2648_v24 = vpop.eup %2647  ;;  %v3329_v27 = vadd.f32 1.0, %v2646_v10  ;;  %vm1611_vm9 = vmor %vm1609_vm3, %vm1610_vm7  ;;  %v1630_v53 = vand.u32 2147483648, %v3285_v8  ;;  %vm1624_vm11 = vweird.f32 %v3285_v8 }
  0xbd   :  { %v1132_v25 = vsel %vm3310_vm5, %v3224_v41, %v1128_v11  ;;  %v1606_v26 = vsub.f32 1.0, %v1605_v12  ;;  %2651 = vpow2.f32 %v2506_v9  ;;  %v795_v28 = vpop.f32.mrf.mxu3  ;;  %v1140_v32 = vmul.f32 %v2648_v24, %v3244_v47 }
  0xbe   :  { %v1137_v31 = vsel %vm3281_vm2, %v1136_v7, %v1132_v25  ;;  %v549_v33 = vpop.f32.mrf.mxu0  ;;  %2653 = vrcp.f32 %v3329_v27  ;;  %v627_v49 = vadd.f32 %v3154_v48, %v626_v22  ;;  %vm1145_vm10 = vweird.f32 %v2648_v24  ;;  %v2590_v25 = vld [vmem:[%s4799_s0 + $0x1b4] sm:$0xf] }
  0xbf   :  { %2084 = vst [vmem:[%s4800_s3] sm:$0xff] %v1137_v31  ;;  %v1607_v35 = vmul.f32 %v3279_v5, %v1606_v26  ;;  %v718_v38 = vpop.f32.mrf.mxu1  ;;  %v1141_v41 = vsub.f32 1.0, %v1140_v32  ;;  %v550_v50 = vadd.f32 %v3154_v48, %v549_v33  ;;  %2655 = vpow2.f32 %v2475_v42  ;;  %vm1146_vm12 = vmor %vm1144_vm6, %vm1145_vm10 }
  0xc0   :  { %v796_v40 = vadd.f32 %v795_v28, %v627_v49  ;;  %v1628_v62 = vand.u32 2147483647, %v3285_v8  ;;  %v1631_v3 = vor.u32 1.1754944e-38, %v1630_v53  ;;  %v1163_v47 = vand.u32 2147483647, %v3329_v27 }
  0xc1   :  { %v1608_v45 = vadd.f32 %v3279_v5, %v1607_v35  ;;  %588 = vmatmul.bf16.gmra.mxu0 %v2235_v56  ;;  %668 = vmatmul.bf16.gmra.mxu2 %v2363_v61  ;;  %v1142_v52 = vmul.f32 %v2648_v24, %v1141_v41  ;;  %v719_v58 = vadd.f32 %v718_v38, %v550_v50  ;;  %vm1159_vm14 = vweird.f32 %v3329_v27 }
  0xc2   :  { %v2650_v51 = vpop.eup %2649  ;;  %757 = vmatmul.bf16.gmra.mxu1 %v2239_v1  ;;  %837 = vmatmul.bf16.gmra.mxu3 %v2367_v4  ;;  %v2507_v63 = vmul.f32 -1.442695, %v796_v40  ;;  %v1165_v14 = vand.u32 2147483648, %v3329_v27  ;;  %vm1629_vm1 = vcmp.eq.f32.partialorder %v1628_v62, 8.507059e+37  ;;  %vm3402_vm2 = vcmp.eq.f32.partialorder %v1163_v47, 8.507059e+37 }
  0xc3   :  { %v2652_v54 = vpop.eup %2651  ;;  %v1612_v55 = vsel %vm1611_vm9, %v3279_v5, %v1608_v45  ;;  %v1620_v39 = vmul.f32 %v2650_v51, %v3285_v8  ;;  %v1143_v36 = vadd.f32 %v2648_v24, %v1142_v52  ;;  %vm1625_vm13 = vweird.f32 %v2650_v51  ;;  %v2372_v8 = vld [vmem:[%s4799_s0 + $0x1b8] sm:$0xf0] }
  0xc4   :  { %v1617_v56 = vsel %vm3291_vm4, %v1616_v18, %v1612_v55  ;;  %v3377_v57 = vadd.f32 1.0, %v2652_v54  ;;  %v629_v59 = vpop.f32.mrf.mxu2  ;;  %v2654_v60 = vpop.eup %2653  ;;  %v2476_v12 = vmul.f32 -1.442695, %v719_v58  ;;  %vm1626_vm15 = vmor %vm1624_vm11, %vm1625_vm13  ;;  %v1166_v37 = vor.u32 1.1754944e-38, %v1165_v14 }
  0xc5   :  { %2116 = vst [vmem:[%s4800_s3 + $0x100] sm:$0xff] %v1617_v56  ;;  %v1621_v61 = vsub.f32 1.0, %v1620_v39  ;;  %v630_v0 = vadd.f32 %v3154_v48, %v629_v59  ;;  %v798_v1 = vpop.f32.mrf.mxu3  ;;  %v1147_v2 = vsel %vm1146_vm12, %v2648_v24, %v1143_v36  ;;  %v1155_v4 = vmul.f32 %v2654_v60, %v3329_v27  ;;  %v2656_v10 = vpop.eup %2655 }
  0xc6   :  { %2657 = vrcp.f32 %v3377_v57  ;;  %v551_v5 = vpop.f32.mrf.mxu0  ;;  %v1152_v6 = vsel %vm3352_vm8, %v1151_v46, %v1147_v2  ;;  %v3397_v17 = vadd.f32 1.0, %v2656_v10  ;;  %vm1160_vm0 = vweird.f32 %v2654_v60 }
  0xc7   :  { %v1622_v7 = vmul.f32 %v2650_v51, %v1621_v61  ;;  %v720_v9 = vpop.f32.mrf.mxu1  ;;  %2085 = vst [vmem:[%s4800_s3 + $0x8] sm:$0xff] %v1152_v6  ;;  %v1156_v11 = vsub.f32 1.0, %v1155_v4  ;;  %2659 = vpow2.f32 %v2507_v63  ;;  %v799_v18 = vadd.f32 %v798_v1, %v630_v0  ;;  %vm1161_vm3 = vmor %vm1159_vm14, %vm1160_vm0  ;;  %v3476_v1 = vld [vmem:[%s4799_s0 + $0xc4] sm:$0xf0] }
  0xc8   :  { %2661 = vpow2.f32 %v2476_v12  ;;  %v552_v20 = vadd.f32 %v3154_v48, %v551_v5  ;;  %v1643_v32 = vand.u32 2147483647, %v3377_v57  ;;  %v1645_v41 = vand.u32 2147483648, %v3377_v57  ;;  %v3487_v5 = vld [vmem:[%s4799_s0 + $0x1c0] sm:$0xf] }
  0xc9   :  { %v1623_v13 = vadd.f32 %v2650_v51, %v1622_v7  ;;  %v1157_v19 = vmul.f32 %v2654_v60, %v1156_v11  ;;  %2663 = vrcp.f32 %v3397_v17  ;;  %v2508_v33 = vmul.f32 -1.442695, %v799_v18  ;;  %v3492_v6 = vld [vmem:[%s4799_s0 + $0x1c4] sm:$0xf0] }
  0xca   :  { %v721_v42 = vadd.f32 %v720_v9, %v552_v20  ;;  %v2375_v52 = vor.u32 %v2590_v25, %v2372_v8  ;;  %vm1639_vm4 = vweird.f32 %v3377_v57  ;;  %vm3434_vm5 = vcmp.eq.f32.partialorder %v1643_v32, 8.507059e+37 }
  0xcb   :  { %v1627_v22 = vsel %vm1626_vm15, %v2650_v51, %v1623_v13  ;;  %v1158_v31 = vadd.f32 %v2654_v60, %v1157_v19  ;;  %2665 = vpow2.f32 %v2508_v33  ;;  %v1178_v36 = vand.u32 2147483647, %v3397_v17 }
  0xcc   :  { %v3413_v26 = vpop.eup %2657  ;;  %v1632_v28 = vsel %vm1629_vm1, %v1631_v3, %v1627_v22  ;;  %v631_v35 = vpop.f32.mrf.mxu2  ;;  %v2477_v55 = vmul.f32 -1.442695, %v721_v42  ;;  %v1646_v61 = vor.u32 1.1754944e-38, %v1645_v41  ;;  %vm1174_vm7 = vweird.f32 %v3397_v17 }
  0xcd   :  { %2117 = vst [vmem:[%s4800_s3 + $0x108] sm:$0xff] %v1632_v28  ;;  %v1635_v38 = vmul.f32 %v3413_v26, %v3377_v57  ;;  %v800_v45 = vpop.f32.mrf.mxu3  ;;  %v2660_v46 = vpop.eup %2659  ;;  %v1162_v49 = vsel %vm1161_vm3, %v2654_v60, %v1158_v31  ;;  %v632_v50 = vadd.f32 %v3154_v48, %v631_v35  ;;  %vm1640_vm6 = vweird.f32 %v3413_v26 }
  0xce   :  { %v554_v51 = vpop.f32.mrf.mxu0  ;;  %v1167_v53 = vsel %vm3402_vm2, %v1166_v37, %v1162_v49  ;;  %v3428_v54 = vadd.f32 1.0, %v2660_v46  ;;  %v2662_v40 = vpop.eup %2661  ;;  %v1180_v16 = vand.u32 2147483648, %v3397_v17  ;;  %vm1641_vm8 = vmor %vm1639_vm4, %vm1640_vm6  ;;  %vm3467_vm9 = vcmp.eq.f32.partialorder %v1178_v36, 8.507059e+37 }
  0xcf   :  { %v1636_v27 = vsub.f32 1.0, %v1635_v38  ;;  %v723_v39 = vpop.f32.mrf.mxu1  ;;  %2086 = vst [vmem:[%s4800_s3 + $0x10] sm:$0xff] %v1167_v53  ;;  %v801_v58 = vadd.f32 %v800_v45, %v632_v50  ;;  %v2664_v59 = vpop.eup %2663  ;;  %v3450_v63 = vadd.f32 1.0, %v2662_v40  ;;  %v555_v0 = vadd.f32 %v3154_v48, %v554_v51 }
  0xd0   :  { %2667 = vrcp.f32 %v3428_v54  ;;  %v1170_v62 = vmul.f32 %v2664_v59, %v3397_v17  ;;  %vm1175_vm10 = vweird.f32 %v2664_v59  ;;  %v1660_v57 = vand.u32 2147483648, %v3428_v54 }
  0xd1   :  { %v1637_v60 = vmul.f32 %v3413_v26, %v1636_v27  ;;  %593 = vmatmul.bf16.gmra.mxu0 %v2243_v34  ;;  %673 = vmatmul.bf16.gmra.mxu2 %v2371_v43  ;;  %2669 = vpow2.f32 %v2477_v55  ;;  %v2509_v23 = vmul.f32 -1.442695, %v801_v58  ;;  %v2666_v34 = vpop.eup %2665  ;;  %v1658_v43 = vand.u32 2147483647, %v3428_v54  ;;  %vm1176_vm12 = vmor %vm1174_vm7, %vm1175_vm10 }
  0xd2   :  { %762 = vmatmul.bf16.gmra.mxu1 %v2247_v44  ;;  %842 = vmatmul.bf16.gmra.mxu3 %v2375_v52  ;;  %v1171_v29 = vsub.f32 1.0, %v1170_v62  ;;  %2671 = vrcp.f32 %v3450_v63  ;;  %v3480_v3 = vadd.f32 1.0, %v2666_v34  ;;  %v724_v9 = vadd.f32 %v723_v39, %v555_v0 }
  0xd3   :  { %v1638_v15 = vadd.f32 %v3413_v26, %v1637_v60  ;;  %2673 = vpow2.f32 %v2509_v23  ;;  %v1181_v12 = vor.u32 1.1754944e-38, %v1180_v16  ;;  %v1193_v13 = vand.u32 2147483647, %v3450_v63 }
  0xd4   :  { %v634_v44 = vpop.f32.mrf.mxu2  ;;  %v1172_v47 = vmul.f32 %v2664_v59, %v1171_v29  ;;  %2675 = vrcp.f32 %v3480_v3  ;;  %v2251_v18 = vor.u32 %v3476_v1, %v3461_v21  ;;  %vm1654_vm11 = vweird.f32 %v3428_v54 }
  0xd5   :  { %v1642_v2 = vsel %vm1641_vm8, %v3413_v26, %v1638_v15  ;;  %v3482_v4 = vpop.f32.mrf.mxu3  ;;  %v2379_v22 = vor.u32 %v3492_v6, %v3487_v5  ;;  %vm3510_vm13 = vcmp.eq.f32.partialorder %v1658_v43, 8.507059e+37  ;;  %v1661_v8 = vor.u32 1.1754944e-38, %v1660_v57 }
  0xd6   :  { %v1647_v7 = vsel %vm3434_vm5, %v1646_v61, %v1642_v2  ;;  %v556_v10 = vpop.f32.mrf.mxu0  ;;  %v2668_v11 = vpop.eup %2667  ;;  %v1173_v19 = vadd.f32 %v2664_v59, %v1172_v47  ;;  %vm1189_vm14 = vweird.f32 %v3450_v63  ;;  %v2478_v26 = vmul.f32 -1.442695, %v724_v9 }
  0xd7   :  { %2118 = vst [vmem:[%s4800_s3 + $0x110] sm:$0xff] %v1647_v7  ;;  %v725_v14 = vpop.f32.mrf.mxu1  ;;  %v1650_v20 = vmul.f32 %v2668_v11, %v3428_v54  ;;  %v2670_v24 = vpop.eup %2669  ;;  %v1195_v33 = vand.u32 2147483648, %v3450_v63  ;;  %vm1655_vm15 = vweird.f32 %v2668_v11  ;;  %vm3521_vm0 = vcmp.eq.f32.partialorder %v1193_v13, 8.507059e+37 }
  0xd8   :  { %v2672_v28 = vpop.eup %2671  ;;  %v1177_v31 = vsel %vm1176_vm12, %v2664_v59, %v1173_v19  ;;  %v3516_v35 = vadd.f32 1.0, %v2670_v24  ;;  %v1673_v41 = vand.u32 2147483647, %v3480_v3  ;;  %v1675_v46 = vand.u32 2147483648, %v3480_v3  ;;  %vm1656_vm2 = vmor %vm1654_vm11, %vm1655_vm15 }
  0xd9   :  { %v1651_v32 = vsub.f32 1.0, %v1650_v20  ;;  %v1182_v37 = vsel %vm3467_vm9, %v1181_v12, %v1177_v31  ;;  %v1185_v17 = vmul.f32 %v2672_v28, %v3450_v63  ;;  %v2674_v42 = vpop.eup %2673  ;;  %v635_v49 = vadd.f32 %v3154_v48, %v634_v44  ;;  %v2380_v31 = vld [vmem:[%s4799_s0 + $0x1c8] sm:$0xf0] }
  0xda   :  { %2087 = vst [vmem:[%s4800_s3 + $0x18] sm:$0xff] %v1182_v37  ;;  %2677 = vrcp.f32 %v3516_v35  ;;  %v3532_v51 = vpop.eup %2675  ;;  %v3534_v53 = vadd.f32 1.0, %v2674_v42  ;;  %v557_v27 = vadd.f32 %v3154_v48, %v556_v10  ;;  %v1196_v40 = vor.u32 1.1754944e-38, %v1195_v33 }
  0xdb   :  { %v1652_v45 = vmul.f32 %v2668_v11, %v1651_v32  ;;  %v1186_v52 = vsub.f32 1.0, %v1185_v17  ;;  %2679 = vpow2.f32 %v2478_v26  ;;  %v1665_v56 = vmul.f32 %v3532_v51, %v3480_v3 }
  0xdc   :  { %v636_v50 = vpop.f32.mrf.mxu2  ;;  %vm1669_vm1 = vweird.f32 %v3480_v3  ;;  %vm1190_vm3 = vweird.f32 %v2672_v28  ;;  %v1208_v59 = vand.u32 2147483647, %v3516_v35  ;;  %2681 = vrcp.f32 %v3534_v53  ;;  %v2252_v3 = vld [vmem:[%s4799_s0 + $0xc8] sm:$0xf0] }
  0xdd   :  { %v805_v55 = vpop.f32.mrf.mxu3  ;;  %v1653_v39 = vadd.f32 %v2668_v11, %v1652_v45  ;;  %v1187_v58 = vmul.f32 %v2672_v28, %v1186_v52  ;;  %v1666_v62 = vsub.f32 1.0, %v1665_v56  ;;  %vm3545_vm4 = vcmp.eq.f32.partialorder %v1673_v41, 8.507059e+37  ;;  %vm1191_vm6 = vmor %vm1189_vm14, %vm1190_vm3 }
  0xde   :  { %v559_v36 = vpop.f32.mrf.mxu0  ;;  %v1676_v15 = vor.u32 1.1754944e-38, %v1675_v46  ;;  %vm1204_vm5 = vweird.f32 %v3516_v35  ;;  %v804_v54 = vadd.f32 %v3482_v4, %v635_v49  ;;  %v726_v21 = vadd.f32 %v725_v14, %v557_v27  ;;  %v2258_v49 = vld [vmem:[%s4799_s0 + $0xd0] sm:$0xf] }
  0xdf   :  { %v728_v60 = vpop.f32.mrf.mxu1  ;;  %v1657_v61 = vsel %vm1656_vm2, %v2668_v11, %v1653_v39  ;;  %v1188_v23 = vadd.f32 %v2672_v28, %v1187_v58  ;;  %v1667_v29 = vmul.f32 %v3532_v51, %v1666_v62  ;;  %vm1670_vm7 = vweird.f32 %v3532_v51 }
  0xe0   :  { %v1662_v16 = vsel %vm3510_vm13, %v1661_v8, %v1657_v61  ;;  %v3553_v34 = vpop.eup %2677  ;;  %v1210_v30 = vand.u32 2147483648, %v3516_v35  ;;  %v637_v43 = vadd.f32 %v3154_v48, %v636_v50  ;;  %vm3567_vm8 = vcmp.eq.f32.partialorder %v1208_v59, 8.507059e+37  ;;  %vm1671_vm9 = vmor %vm1669_vm1, %vm1670_vm7  ;;  %v2563_v50 = vld [vmem:[%s4799_s0 + $0xd4] sm:$0xf0] }
  0xe1   :  { %598 = vmatmul.bf16.gmra.mxu0 %v2251_v18  ;;  %2119 = vst [vmem:[%s4800_s3 + $0x118] sm:$0xff] %v1662_v16  ;;  %678 = vmatmul.bf16.gmra.mxu2 %v2379_v22  ;;  %v2680_v44 = vpop.eup %2679  ;;  %v1192_v1 = vsel %vm1191_vm6, %v2672_v28, %v1188_v23  ;;  %v1200_v2 = vmul.f32 %v3553_v34, %v3516_v35  ;;  %v1688_v63 = vand.u32 2147483647, %v3534_v53  ;;  %v2510_v4 = vmul.f32 -1.442695, %v804_v54 }
  0xe2   :  { %v1197_v5 = vsel %vm3521_vm0, %v1196_v40, %v1192_v1  ;;  %v1668_v6 = vadd.f32 %v3532_v51, %v1667_v29  ;;  %v3575_v7 = vadd.f32 1.0, %v2680_v44  ;;  %v2479_v47 = vmul.f32 -1.442695, %v726_v21  ;;  %v3577_v10 = vpop.eup %2681  ;;  %v2560_v22 = vld [vmem:[%s4799_s0 + $0xc4] sm:$0xf] }
  0xe3   :  { %2088 = vst [vmem:[%s4800_s3 + $0x20] sm:$0xff] %v1197_v5  ;;  %v1201_v11 = vsub.f32 1.0, %v1200_v2  ;;  %2683 = vpow2.f32 %v2510_v4  ;;  %v806_v12 = vadd.f32 %v805_v55, %v637_v43  ;;  %v560_v13 = vadd.f32 %v3154_v48, %v559_v36  ;;  %v2592_v28 = vld [vmem:[%s4799_s0 + $0x1c4] sm:$0xf] }
  0xe4   :  { %v639_v9 = vpop.f32.mrf.mxu2  ;;  %v1672_v18 = vsel %vm1671_vm9, %v3532_v51, %v1668_v6  ;;  %v1211_v19 = vor.u32 1.1754944e-38, %v1210_v30  ;;  %v1680_v20 = vmul.f32 %v3577_v10, %v3534_v53  ;;  %2685 = vrcp.f32 %v3575_v7 }
  0xe5   :  { %v808_v14 = vpop.f32.mrf.mxu3  ;;  %v1677_v25 = vsel %vm3545_vm4, %v1676_v15, %v1672_v18  ;;  %v1202_v8 = vmul.f32 %v3553_v34, %v1201_v11  ;;  %vm1205_vm10 = vweird.f32 %v3553_v34  ;;  %v1690_v26 = vand.u32 2147483648, %v3534_v53 }
  0xe6   :  { %v561_v24 = vpop.f32.mrf.mxu0  ;;  %2120 = vst [vmem:[%s4800_s3 + $0x120] sm:$0xff] %v1677_v25  ;;  %v1681_v33 = vsub.f32 1.0, %v1680_v20  ;;  %vm1684_vm11 = vweird.f32 %v3534_v53  ;;  %2687 = vpow2.f32 %v2479_v47  ;;  %v2511_v37 = vmul.f32 -1.442695, %v806_v12  ;;  %vm1206_vm13 = vmor %vm1204_vm5, %vm1205_vm10 }
  0xe7   :  { %v730_v32 = vpop.f32.mrf.mxu1  ;;  %v1203_v17 = vadd.f32 %v3553_v34, %v1202_v8  ;;  %vm3613_vm12 = vcmp.eq.f32.partialorder %v1688_v63, 8.507059e+37  ;;  %v729_v41 = vadd.f32 %v728_v60, %v560_v13  ;;  %v2255_v42 = vor.u32 %v2560_v22, %v2252_v3 }
  0xe8   :  { %v1682_v45 = vmul.f32 %v3577_v10, %v1681_v33  ;;  %vm1685_vm14 = vweird.f32 %v3577_v10  ;;  %2689 = vpow2.f32 %v2511_v37  ;;  %v2383_v46 = vor.u32 %v2592_v28, %v2380_v31 }
  0xe9   :  { %v2684_v51 = vpop.eup %2683  ;;  %v1207_v52 = vsel %vm1206_vm13, %v3553_v34, %v1203_v17  ;;  %v1691_v27 = vor.u32 1.1754944e-38, %v1690_v26  ;;  %v2480_v35 = vmul.f32 -1.442695, %v729_v41  ;;  %767 = vmatmul.bf16.gmra.mxu1 %v2255_v42  ;;  %v640_v55 = vadd.f32 %v3154_v48, %v639_v9  ;;  %vm1686_vm15 = vmor %vm1684_vm11, %vm1685_vm14 }
  0xea   :  { %v2686_v39 = vpop.eup %2685  ;;  %v1212_v40 = vsel %vm3567_vm8, %v1211_v19, %v1207_v52  ;;  %v1683_v56 = vadd.f32 %v3577_v10, %v1682_v45  ;;  %v3632_v36 = vadd.f32 1.0, %v2684_v51  ;;  %847 = vmatmul.bf16.gmra.mxu3 %v2383_v46  ;;  %v562_v58 = vadd.f32 %v3154_v48, %v561_v24 }
  0xeb   :  { %2089 = vst [vmem:[%s4800_s3 + $0x28] sm:$0xff] %v1212_v40  ;;  %v1215_v60 = vmul.f32 %v2686_v39, %v3575_v7  ;;  %2691 = vpow2.f32 %v2480_v35  ;;  %v809_v61 = vadd.f32 %v808_v14, %v640_v55  ;;  %v2259_v0 = vor.u32 %v2563_v50, %v2258_v49 }
  0xec   :  { %v641_v59 = vpop.f32.mrf.mxu2  ;;  %v2688_v15 = vpop.eup %2687  ;;  %v1687_v16 = vsel %vm1686_vm15, %v3577_v10, %v1683_v56  ;;  %vm1219_vm0 = vweird.f32 %v3575_v7  ;;  %v1223_v23 = vand.u32 2147483647, %v3575_v7  ;;  %2693 = vrcp.f32 %v3632_v36 }
  0xed   :  { %v810_v62 = vpop.f32.mrf.mxu3  ;;  %v1692_v53 = vsel %vm3613_vm12, %v1691_v27, %v1687_v16  ;;  %v1216_v21 = vsub.f32 1.0, %v1215_v60  ;;  %v1225_v34 = vand.u32 2147483648, %v3575_v7  ;;  %v3650_v29 = vadd.f32 1.0, %v2688_v15 }
  0xee   :  { %v564_v54 = vpop.f32.mrf.mxu0  ;;  %v2690_v43 = vpop.eup %2689  ;;  %2121 = vst [vmem:[%s4800_s3 + $0x128] sm:$0xff] %v1692_v53  ;;  %vm1220_vm1 = vweird.f32 %v2686_v39  ;;  %v2512_v44 = vmul.f32 -1.442695, %v809_v61  ;;  %v731_v1 = vadd.f32 %v730_v32, %v562_v58  ;;  %v642_v2 = vadd.f32 %v3154_v48, %v641_v59 }
  0xef   :  { %v733_v30 = vpop.f32.mrf.mxu1  ;;  %v1217_v57 = vmul.f32 %v2686_v39, %v1216_v21  ;;  %v1703_v63 = vand.u32 2147483647, %v3632_v36  ;;  %v1705_v4 = vand.u32 2147483648, %v3632_v36  ;;  %2695 = vrcp.f32 %v3650_v29  ;;  %vm1221_vm3 = vmor %vm1219_vm0, %vm1220_vm1  ;;  %v2595_v21 = vld [vmem:[%s4799_s0 + $0x1d4] sm:$0xf0] }
  0xf0   :  { %vm3659_vm2 = vcmp.eq.f32.partialorder %v1223_v23, 8.507059e+37  ;;  %v3663_v6 = vadd.f32 1.0, %v2690_v43  ;;  %2697 = vpow2.f32 %v2512_v44  ;;  %v2481_v10 = vmul.f32 -1.442695, %v731_v1 }
  0xf1   :  { %603 = vmatmul.bf16.gmra.mxu0 %v2259_v0  ;;  %v2692_v47 = vpop.eup %2691  ;;  %v1218_v9 = vadd.f32 %v2686_v39, %v1217_v57  ;;  %v811_v11 = vadd.f32 %v810_v62, %v642_v2  ;;  %v565_v12 = vadd.f32 %v3154_v48, %v564_v54  ;;  %v1226_v14 = vor.u32 1.1754944e-38, %v1225_v34  ;;  %v2562_v34 = vld [vmem:[%s4799_s0 + $0xd4] sm:$0xf]  ;;  %v2260_v57 = vld [vmem:[%s4799_s0 + $0xd8] sm:$0xf0] }
  0xf2   :  { %v2694_v13 = vpop.eup %2693  ;;  %vm1699_vm4 = vweird.f32 %v3632_v36  ;;  %v1238_v18 = vand.u32 2147483647, %v3650_v29  ;;  %2699 = vrcp.f32 %v3663_v6  ;;  %vm3675_vm5 = vcmp.eq.f32.partialorder %v1703_v63, 8.507059e+37 }
  0xf3   :  { %v1222_v20 = vsel %vm1221_vm3, %v2686_v39, %v1218_v9  ;;  %v1695_v22 = vmul.f32 %v2694_v13, %v3632_v36  ;;  %v1706_v48 = vor.u32 1.1754944e-38, %v1705_v4  ;;  %v1240_v7 = vand.u32 2147483648, %v3650_v29  ;;  %v2386_v36 = vld [vmem:[%s4799_s0 + $0x1d0] sm:$0xf] }
  0xf4   :  { %v3672_v19 = vpop.f32.mrf.mxu2  ;;  %v1227_v25 = vsel %vm3659_vm2, %v1226_v14, %v1222_v20  ;;  %v1718_v8 = vand.u32 2147483647, %v3663_v6  ;;  %v3685_v26 = vadd.f32 1.0, %v2692_v47  ;;  %2701 = vpow2.f32 %v2481_v10 }
  0xf5   :  { %v3680_v24 = vpop.f32.mrf.mxu3  ;;  %v2696_v31 = vpop.eup %2695  ;;  %2090 = vst [vmem:[%s4800_s3 + $0x30] sm:$0xff] %v1227_v25  ;;  %v1696_v32 = vsub.f32 1.0, %v1695_v22  ;;  %v1720_v33 = vand.u32 2147483648, %v3663_v6  ;;  %v2513_v37 = vmul.f32 -1.442695, %v811_v11  ;;  %v734_v17 = vadd.f32 %v733_v30, %v565_v12 }
  0xf6   :  { %v3687_v28 = vpop.f32.mrf.mxu0  ;;  %v2698_v41 = vpop.eup %2697  ;;  %v1230_v42 = vmul.f32 %v2696_v31, %v3650_v29  ;;  %vm1234_vm6 = vweird.f32 %v3650_v29  ;;  %vm3697_vm7 = vcmp.eq.f32.partialorder %v1238_v18, 8.507059e+37  ;;  %2703 = vrcp.f32 %v3685_v26  ;;  %v2388_v25 = vld [vmem:[%s4799_s0 + $0x1d8] sm:$0xf0] }
  0xf7   :  { %v3693_v38 = vpop.f32.mrf.mxu1  ;;  %v1697_v46 = vmul.f32 %v2694_v13, %v1696_v32  ;;  %vm1700_vm8 = vweird.f32 %v2694_v13  ;;  %v1241_v49 = vor.u32 1.1754944e-38, %v1240_v7  ;;  %vm1714_vm9 = vweird.f32 %v3663_v6 }
  0xf8   :  { %v3703_v50 = vpop.eup %2699  ;;  %v1231_v51 = vsub.f32 1.0, %v1230_v42  ;;  %v3705_v52 = vadd.f32 1.0, %v2698_v41  ;;  %2705 = vpow2.f32 %v2513_v37  ;;  %v2482_v27 = vmul.f32 -1.442695, %v734_v17  ;;  %vm1701_vm12 = vmor %vm1699_vm4, %vm1700_vm8 }
  0xf9   :  { %v1698_v35 = vadd.f32 %v2694_v13, %v1697_v46  ;;  %vm1235_vm10 = vweird.f32 %v2696_v31  ;;  %v1710_v55 = vmul.f32 %v3703_v50, %v3663_v6  ;;  %vm3709_vm11 = vcmp.eq.f32.partialorder %v1718_v8, 8.507059e+37  ;;  %v2594_v6 = vld [vmem:[%s4799_s0 + $0x1d4] sm:$0xf] }
  0xfa   :  { %v1721_v40 = vor.u32 1.1754944e-38, %v1720_v33  ;;  %v2702_v56 = vpop.eup %2701  ;;  %v1232_v58 = vmul.f32 %v2696_v31, %v1231_v51  ;;  %v1253_v59 = vand.u32 2147483647, %v3685_v26  ;;  %v1255_v60 = vand.u32 2147483648, %v3685_v26  ;;  %vm1236_vm15 = vmor %vm1234_vm6, %vm1235_vm10  ;;  %v3819_v51 = vld [vmem:[%s4798_s2] ss:$0 sm:$0xff] }
  0xfb   :  { %2707 = vrcp.f32 %v3705_v52  ;;  %v1702_v62 = vsel %vm1701_vm12, %v2694_v13, %v1698_v35  ;;  %v1711_v0 = vsub.f32 1.0, %v1710_v55  ;;  %vm1715_vm13 = vweird.f32 %v3703_v50 }
  0xfc   :  { %v3718_v61 = vpop.f32.mrf.mxu2  ;;  %vm1249_vm14 = vweird.f32 %v3685_v26  ;;  %v3727_v16 = vpop.eup %2703  ;;  %v1707_v23 = vsel %vm3675_vm5, %v1706_v48, %v1702_v62  ;;  %v1233_v54 = vadd.f32 %v2696_v31, %v1232_v58  ;;  %v3731_v53 = vadd.f32 1.0, %v2702_v56  ;;  %vm1716_vm2 = vmor %vm1714_vm9, %vm1715_vm13  ;;  %v2396_v48 = vld [vmem:[%s4799_s0 + $0x1e8] sm:$0xf0] }
  0xfd   :  { %v3725_v15 = vpop.f32.mrf.mxu3  ;;  %2709 = vpow2.f32 %v2482_v27  ;;  %2122 = vst [vmem:[%s4800_s3 + $0x130] sm:$0xff] %v1707_v23  ;;  %v1712_v43 = vmul.f32 %v3703_v50, %v1711_v0  ;;  %v1245_v44 = vmul.f32 %v3727_v16, %v3685_v26  ;;  %v1733_v1 = vand.u32 2147483647, %v3705_v52 }
  0xfe   :  { %v3739_v30 = vpop.f32.mrf.mxu0  ;;  %v1735_v2 = vand.u32 2147483648, %v3705_v52  ;;  %v2706_v4 = vpop.eup %2705  ;;  %v1237_v5 = vsel %vm1236_vm15, %v2696_v31, %v1233_v54  ;;  %vm3757_vm0 = vcmp.eq.f32.partialorder %v1253_v59, 8.507059e+37  ;;  %v1256_v47 = vor.u32 1.1754944e-38, %v1255_v60 }
  0xff   :  { %v3755_v63 = vpop.f32.mrf.mxu1  ;;  %2711 = vrcp.f32 %v3731_v53  ;;  %v1242_v9 = vsel %vm3697_vm7, %v1241_v49, %v1237_v5  ;;  %v1713_v10 = vadd.f32 %v3703_v50, %v1712_v43  ;;  %v1246_v11 = vsub.f32 1.0, %v1245_v44  ;;  %v2402_v44 = vld [vmem:[%s4799_s0 + $0x1f0] sm:$0xf] }
 0x100   :  { %vm1729_vm1 = vweird.f32 %v3705_v52  ;;  %2091 = vst [vmem:[%s4800_s3 + $0x38] sm:$0xff] %v1242_v9  ;;  %vm1250_vm3 = vweird.f32 %v3727_v16  ;;  %v3776_v13 = vadd.f32 1.0, %v2706_v4  ;;  %v2387_v14 = vor.u32 %v2595_v21, %v2386_v36 }
 0x101   :  { %v3766_v12 = vpop.eup %2707  ;;  %v2263_v18 = vor.u32 %v2562_v34, %v2260_v57  ;;  %v1717_v20 = vsel %vm1716_vm2, %v3703_v50, %v1713_v10  ;;  %v1247_v22 = vmul.f32 %v3727_v16, %v1246_v11  ;;  %vm3782_vm4 = vcmp.eq.f32.partialorder %v1733_v1, 8.507059e+37  ;;  %vm1251_vm7 = vmor %vm1249_vm14, %vm1250_vm3  ;;  %v2266_v34 = vld [vmem:[%s4799_s0 + $0xe0] sm:$0xf] }
 0x102   :  { %v1725_v3 = vmul.f32 %v3766_v12, %v3705_v52  ;;  %v1736_v7 = vor.u32 1.1754944e-38, %v1735_v2  ;;  %v1722_v31 = vsel %vm3709_vm11, %v1721_v40, %v1717_v20  ;;  %v1268_v32 = vand.u32 2147483647, %v3731_v53  ;;  %683 = vmatmul.bf16.gmra.mxu2 %v2387_v14  ;;  %v2565_v52 = vld [vmem:[%s4799_s0 + $0xe4] sm:$0xf0] }
 0x103   :  { %v2710_v8 = vpop.eup %2709  ;;  %v1270_v33 = vand.u32 2147483648, %v3731_v53  ;;  %2713 = vrcp.f32 %v3776_v13  ;;  %772 = vmatmul.bf16.gmra.mxu1 %v2263_v18  ;;  %2123 = vst [vmem:[%s4800_s3 + $0x138] sm:$0xff] %v1722_v31  ;;  %v1248_v17 = vadd.f32 %v3727_v16, %v1247_v22  ;;  %vm1730_vm5 = vweird.f32 %v3766_v12  ;;  %v2394_v1 = vld [vmem:[%s4799_s0 + $0x1e0] sm:$0xf]  ;;  %v2597_v2 = vld [vmem:[%s4799_s0 + $0x1e4] sm:$0xf0] }
 0x104   :  { %v3797_v37 = vpop.f32.mrf.mxu2  ;;  %v1726_v41 = vsub.f32 1.0, %v1725_v3  ;;  %vm1264_vm6 = vweird.f32 %v3731_v53  ;;  %v1750_v46 = vand.u32 2147483648, %v3776_v13  ;;  %v3814_v49 = vadd.f32 1.0, %v2710_v8  ;;  %vm3851_vm11 = vmor %vm1729_vm1, %vm1730_vm5  ;;  %v2268_v14 = vld [vmem:[%s4799_s0 + $0xe8] sm:$0xf0] }
 0x105   :  { %v3805_v42 = vpop.f32.mrf.mxu3  ;;  %v3807_v45 = vpop.eup %2711  ;;  %v2391_v50 = vor.u32 %v2594_v6, %v2388_v25  ;;  %v645_v27 = vadd.f32 %v3819_v51, %v3672_v19  ;;  %v1252_v55 = vsel %vm1251_vm7, %v3727_v16, %v1248_v17  ;;  %v1748_v40 = vand.u32 2147483647, %v3776_v13  ;;  %v2596_v3 = vld [vmem:[%s4799_s0 + $0x1e4] sm:$0xf] }
 0x106   :  { %v3823_v35 = vpop.f32.mrf.mxu0  ;;  %v1727_v26 = vmul.f32 %v3766_v12, %v1726_v41  ;;  %v1260_v39 = vmul.f32 %v3807_v45, %v3731_v53  ;;  %v1257_v58 = vsel %vm3757_vm0, %v1256_v47, %v1252_v55  ;;  %vm3834_vm8 = vcmp.eq.f32.partialorder %v1268_v32, 8.507059e+37 }
 0x107   :  { %v3830_v56 = vpop.f32.mrf.mxu1  ;;  %v1271_v19 = vor.u32 1.1754944e-38, %v1270_v33  ;;  %2715 = vrcp.f32 %v3814_v49  ;;  %852 = vmatmul.bf16.gmra.mxu3 %v2391_v50  ;;  %2092 = vst [vmem:[%s4800_s3 + $0x40] sm:$0xff] %v1257_v58  ;;  %vm1265_vm9 = vweird.f32 %v3807_v45  ;;  %vm1744_vm10 = vweird.f32 %v3776_v13 }
 0x108   :  { %v1728_v60 = vadd.f32 %v3766_v12, %v1727_v26  ;;  %v1261_v62 = vsub.f32 1.0, %v1260_v39  ;;  %v1751_v16 = vor.u32 1.1754944e-38, %v1750_v46  ;;  %v814_v23 = vadd.f32 %v3680_v24, %v645_v27  ;;  %vm1266_vm15 = vmor %vm1264_vm6, %vm1265_vm9 }
 0x109   :  { %v3845_v0 = vpop.eup %2713  ;;  %v567_v54 = vadd.f32 %v3819_v51, %v3687_v28  ;;  %v647_v21 = vadd.f32 %v3819_v51, %v3718_v61  ;;  %vm3872_vm12 = vcmp.eq.f32.partialorder %v1748_v40, 8.507059e+37  ;;  %vm1279_vm13 = vweird.f32 %v3814_v49 }
 0x10a   :  { %v1732_v43 = vsel %vm3851_vm11, %v3766_v12, %v1728_v60  ;;  %v1262_v24 = vmul.f32 %v3807_v45, %v1261_v62  ;;  %v1740_v28 = vmul.f32 %v3845_v0, %v3776_v13  ;;  %v1283_v61 = vand.u32 2147483647, %v3814_v49  ;;  %v2564_v12 = vld [vmem:[%s4799_s0 + $0xe4] sm:$0xf] }
 0x10b   :  { %v1737_v57 = vsel %vm3782_vm4, %v1736_v7, %v1732_v43  ;;  %vm1745_vm14 = vweird.f32 %v3845_v0  ;;  %v1285_v4 = vand.u32 2147483648, %v3814_v49  ;;  %v2514_v5 = vmul.f32 -1.442695, %v814_v23  ;;  %v2274_v43 = vld [vmem:[%s4799_s0 + $0xf0] sm:$0xf] }
 0x10c   :  { %v651_v29 = vpop.f32.mrf.mxu2  ;;  %2124 = vst [vmem:[%s4800_s3 + $0x140] sm:$0xff] %v1737_v57  ;;  %v1263_v47 = vadd.f32 %v3807_v45, %v1262_v24  ;;  %v1741_v9 = vsub.f32 1.0, %v1740_v28  ;;  %v736_v10 = vadd.f32 %v3693_v38, %v567_v54  ;;  %v816_v11 = vadd.f32 %v3725_v15, %v647_v21  ;;  %vm1746_vm1 = vmor %vm1744_vm10, %vm1745_vm14  ;;  %v2567_v28 = vld [vmem:[%s4799_s0 + $0xf4] sm:$0xf0] }
 0x10d   :  { %v820_v18 = vpop.f32.mrf.mxu3  ;;  %v2716_v20 = vpop.eup %2715  ;;  %2717 = vpow2.f32 %v2514_v5  ;;  %v570_v38 = vadd.f32 %v3819_v51, %v3739_v30  ;;  %v2267_v15 = vor.u32 %v2565_v52, %v2266_v34  ;;  %v2395_v22 = vor.u32 %v2597_v2, %v2394_v1 }
 0x10e   :  { %v574_v7 = vpop.f32.mrf.mxu0  ;;  %v1267_v6 = vsel %vm1266_vm15, %v3807_v45, %v1263_v47  ;;  %v1742_v53 = vmul.f32 %v3845_v0, %v1741_v9  ;;  %v1275_v25 = vmul.f32 %v2716_v20, %v3814_v49  ;;  %vm1280_vm0 = vweird.f32 %v2716_v20  ;;  %v2276_v47 = vld [vmem:[%s4799_s0 + $0xf8] sm:$0xf0] }
 0x10f   :  { %v743_v8 = vpop.f32.mrf.mxu1  ;;  %v1272_v30 = vsel %vm3834_vm8, %v1271_v19, %v1267_v6  ;;  %v2483_v31 = vmul.f32 -1.442695, %v736_v10  ;;  %v2515_v32 = vmul.f32 -1.442695, %v816_v11  ;;  %v739_v33 = vadd.f32 %v3755_v63, %v570_v38  ;;  %608 = vmatmul.bf16.gmra.mxu0 %v2267_v15  ;;  %vm1281_vm2 = vmor %vm1279_vm13, %vm1280_vm0 }
 0x110   :  { %2093 = vst [vmem:[%s4800_s3 + $0x48] sm:$0xff] %v1272_v30  ;;  %v1743_v17 = vadd.f32 %v3845_v0, %v1742_v53  ;;  %v1276_v41 = vsub.f32 1.0, %v1275_v25  ;;  %v2271_v45 = vor.u32 %v2564_v12, %v2268_v14  ;;  %v2399_v46 = vor.u32 %v2596_v3, %v2396_v48 }
 0x111   :  { %2719 = vpow2.f32 %v2483_v31  ;;  %v2484_v50 = vmul.f32 -1.442695, %v739_v33  ;;  %v650_v63 = vadd.f32 %v3819_v51, %v3797_v37  ;;  %v572_v27 = vadd.f32 %v3819_v51, %v3823_v35 }
 0x112   :  { %v1747_v55 = vsel %vm1746_vm1, %v3845_v0, %v1743_v17  ;;  %v1277_v26 = vmul.f32 %v2716_v20, %v1276_v41  ;;  %2721 = vpow2.f32 %v2515_v32  ;;  %v652_v39 = vadd.f32 %v3819_v51, %v651_v29  ;;  %688 = vmatmul.bf16.gmra.mxu2 %v2395_v22  ;;  %v2566_v29 = vld [vmem:[%s4799_s0 + $0xf4] sm:$0xf] }
 0x113   :  { %v2718_v40 = vpop.eup %2717  ;;  %v1752_v58 = vsel %vm3872_vm12, %v1751_v16, %v1747_v55  ;;  %2723 = vpow2.f32 %v2484_v50  ;;  %777 = vmatmul.bf16.gmra.mxu1 %v2271_v45  ;;  %v819_v13 = vadd.f32 %v3805_v42, %v650_v63  ;;  %v741_v37 = vadd.f32 %v3830_v56, %v572_v27  ;;  %v2598_v63 = vld [vmem:[%s4799_s0 + $0x1f4] sm:$0xf]  ;;  %v2404_v27 = vld [vmem:[%s4799_s0 + $0x1f8] sm:$0xf0] }
 0x114   :  { %v3936_v59 = vpop.f32.mrf.mxu2  ;;  %2125 = vst [vmem:[%s4800_s3 + $0x148] sm:$0xff] %v1752_v58  ;;  %v1278_v35 = vadd.f32 %v2716_v20, %v1277_v26  ;;  %v3941_v19 = vadd.f32 1.0, %v2718_v40  ;;  %v821_v60 = vadd.f32 %v820_v18, %v652_v39  ;;  %v1286_v0 = vor.u32 1.1754944e-38, %v1285_v4  ;;  %v2599_v4 = vld [vmem:[%s4799_s0 + $0x1f4] sm:$0xf0] }
 0x115   :  { %v3943_v62 = vpop.f32.mrf.mxu3  ;;  %v2516_v42 = vmul.f32 -1.442695, %v819_v13  ;;  %v2485_v36 = vmul.f32 -1.442695, %v741_v37  ;;  %vm1284_vm3 = vcmp.eq.f32.partialorder %v1283_v61, 8.507059e+37  ;;  %v575_v23 = vadd.f32 %v3819_v51, %v574_v7 }
 0x116   :  { %v3948_v56 = vpop.f32.mrf.mxu0  ;;  %v1282_v16 = vsel %vm1281_vm2, %v2716_v20, %v1278_v35  ;;  %2725 = vrcp.f32 %v3941_v19  ;;  %v2517_v52 = vmul.f32 -1.442695, %v821_v60  ;;  %v1763_v1 = vand.u32 2147483647, %v3941_v19 }
 0x117   :  { %v3954_v54 = vpop.f32.mrf.mxu1  ;;  %v2720_v21 = vpop.eup %2719  ;;  %v1287_v34 = vsel %vm1284_vm3, %v1286_v0, %v1282_v16  ;;  %857 = vmatmul.bf16.gmra.mxu3 %v2399_v46  ;;  %2727 = vpow2.f32 %v2516_v42  ;;  %v1765_v2 = vand.u32 2147483648, %v3941_v19  ;;  %v744_v5 = vadd.f32 %v743_v8, %v575_v23 }
 0x118   :  { %v2722_v24 = vpop.eup %2721  ;;  %2094 = vst [vmem:[%s4800_s3 + $0x50] sm:$0xff] %v1287_v34  ;;  %v3962_v49 = vadd.f32 1.0, %v2720_v21  ;;  %2729 = vpow2.f32 %v2485_v36  ;;  %v2275_v9 = vor.u32 %v2567_v28, %v2274_v43  ;;  %vm1759_vm4 = vweird.f32 %v3941_v19 }
 0x119   :  { %v2724_v61 = vpop.eup %2723  ;;  %v3972_v57 = vadd.f32 1.0, %v2722_v24  ;;  %2731 = vpow2.f32 %v2517_v52  ;;  %v2403_v18 = vor.u32 %v2599_v4, %v2402_v44  ;;  %vm3997_vm5 = vcmp.eq.f32.partialorder %v1763_v1, 8.507059e+37 }
 0x11a   :  { %2733 = vrcp.f32 %v3962_v49  ;;  %v1300_v12 = vand.u32 2147483648, %v3962_v49  ;;  %v3991_v14 = vadd.f32 1.0, %v2724_v61  ;;  %v1766_v3 = vor.u32 1.1754944e-38, %v1765_v2 }
 0x11b   :  { %2735 = vrcp.f32 %v3972_v57  ;;  %v1298_v48 = vand.u32 2147483647, %v3962_v49  ;;  %v2279_v7 = vor.u32 %v2566_v29, %v2276_v47  ;;  %v1778_v25 = vand.u32 2147483647, %v3972_v57 }
 0x11c   :  { %v3985_v10 = vpop.f32.mrf.mxu2  ;;  %v3987_v11 = vpop.eup %2725  ;;  %v1780_v8 = vand.u32 2147483648, %v3972_v57  ;;  %2737 = vrcp.f32 %v3991_v14  ;;  %v2486_v30 = vmul.f32 -1.442695, %v744_v5  ;;  %vm1294_vm6 = vweird.f32 %v3962_v49 }
 0x11d   :  { %v3993_v20 = vpop.f32.mrf.mxu3  ;;  %v2728_v38 = vpop.eup %2727  ;;  %v1755_v15 = vmul.f32 %v3987_v11, %v3941_v19  ;;  %vm1760_vm7 = vweird.f32 %v3987_v11  ;;  %v1301_v46 = vor.u32 1.1754944e-38, %v1300_v12  ;;  %vm1774_vm8 = vweird.f32 %v3972_v57 }
 0x11e   :  { %v4002_v6 = vpop.f32.mrf.mxu0  ;;  %v2730_v53 = vpop.eup %2729  ;;  %v4008_v33 = vadd.f32 1.0, %v2728_v38  ;;  %v1315_v50 = vand.u32 2147483648, %v3991_v14  ;;  %vm4028_vm9 = vcmp.eq.f32.partialorder %v1298_v48, 8.507059e+37  ;;  %v1313_v58 = vand.u32 2147483647, %v3991_v14  ;;  %vm1761_vm11 = vmor %vm1759_vm4, %vm1760_vm7 }
 0x11f   :  { %v2732_v31 = vpop.eup %2731  ;;  %v1756_v32 = vsub.f32 1.0, %v1755_v15  ;;  %v4010_v17 = vadd.f32 1.0, %v2730_v53  ;;  %613 = vmatmul.bf16.gmra.mxu0 %v2275_v9  ;;  %v4012_v41 = vpop.f32.mrf.mxu1  ;;  %vm4035_vm10 = vcmp.eq.f32.partialorder %v1778_v25, 8.507059e+37  ;;  %v1781_v35 = vor.u32 1.1754944e-38, %v1780_v8 }
 0x120   :  { %v4014_v45 = vpop.eup %2733  ;;  %2739 = vrcp.f32 %v4008_v33  ;;  %v4039_v60 = vadd.f32 1.0, %v2732_v31  ;;  %v2407_v36 = vor.u32 %v2598_v63, %v2404_v27  ;;  %vm1309_vm12 = vweird.f32 %v3991_v14 }
 0x121   :  { %v2736_v55 = vpop.eup %2735  ;;  %v1757_v26 = vmul.f32 %v3987_v11, %v1756_v32  ;;  %v1290_v39 = vmul.f32 %v4014_v45, %v3962_v49  ;;  %2741 = vpow2.f32 %v2486_v30  ;;  %v1316_v34 = vor.u32 1.1754944e-38, %v1315_v50 }
 0x122   :  { %v1770_v13 = vmul.f32 %v2736_v55, %v3972_v57  ;;  %2743 = vrcp.f32 %v4010_v17  ;;  %693 = vmatmul.bf16.gmra.mxu2 %v2403_v18  ;;  %v2738_v23 = vpop.eup %2737  ;;  %v1793_v52 = vand.u32 2147483647, %v4008_v33  ;;  %vm1295_vm13 = vweird.f32 %v4014_v45 }
 0x123   :  { %v1758_v0 = vadd.f32 %v3987_v11, %v1757_v26  ;;  %v1291_v42 = vsub.f32 1.0, %v1290_v39  ;;  %782 = vmatmul.bf16.gmra.mxu1 %v2279_v7  ;;  %v1305_v28 = vmul.f32 %v2738_v23, %v3991_v14  ;;  %vm4055_vm14 = vcmp.eq.f32.partialorder %v1313_v58, 8.507059e+37  ;;  %vm1296_vm1 = vmor %vm1294_vm6, %vm1295_vm13 }
 0x124   :  { %v4043_v16 = vpop.f32.mrf.mxu2  ;;  %v1771_v21 = vsub.f32 1.0, %v1770_v13  ;;  %vm1775_vm15 = vweird.f32 %v2736_v55  ;;  %vm1789_vm0 = vweird.f32 %v4008_v33  ;;  %v1795_v47 = vand.u32 2147483648, %v4008_v33 }
 0x125   :  { %v1762_v43 = vsel %vm1761_vm11, %v3987_v11, %v1758_v0  ;;  %v1292_v24 = vmul.f32 %v4014_v45, %v1291_v42  ;;  %v4059_v19 = vpop.f32.mrf.mxu3  ;;  %v1306_v29 = vsub.f32 1.0, %v1305_v28  ;;  %2745 = vrcp.f32 %v4039_v60  ;;  %vm1776_vm4 = vmor %vm1774_vm8, %vm1775_vm15 }
 0x126   :  { %v4061_v61 = vpop.f32.mrf.mxu0  ;;  %v1767_v1 = vsel %vm3997_vm5, %v1766_v3, %v1762_v43  ;;  %v1772_v2 = vmul.f32 %v2736_v55, %v1771_v21  ;;  %v2740_v4 = vpop.eup %2739  ;;  %vm4077_vm2 = vcmp.eq.f32.partialorder %v1793_v52, 8.507059e+37  ;;  %vm1324_vm3 = vweird.f32 %v4010_v17 }
 0x127   :  { %2126 = vst [vmem:[%s4800_s3 + $0x150] sm:$0xff] %v1767_v1  ;;  %v1293_v5 = vadd.f32 %v4014_v45, %v1292_v24  ;;  %862 = vmatmul.bf16.gmra.mxu3 %v2407_v36  ;;  %v2742_v9 = vpop.eup %2741  ;;  %v1785_v12 = vmul.f32 %v2740_v4, %v4008_v33  ;;  %v1307_v22 = vmul.f32 %v2738_v23, %v1306_v29  ;;  %vm1310_vm5 = vweird.f32 %v2738_v23  ;;  %v4087_v3 = vpop.f32.mrf.mxu1 }
 0x128   :  { %v1773_v11 = vadd.f32 %v2736_v55, %v1772_v2  ;;  %v2744_v38 = vpop.eup %2743  ;;  %v1328_v49 = vand.u32 2147483647, %v4010_v17  ;;  %vm1790_vm6 = vweird.f32 %v2740_v4  ;;  %v1330_v30 = vand.u32 2147483648, %v4010_v17  ;;  %vm1311_vm7 = vmor %vm1309_vm12, %vm1310_vm5 }
 0x129   :  { %v1297_v15 = vsel %vm1296_vm1, %v4014_v45, %v1293_v5  ;;  %v1786_v53 = vsub.f32 1.0, %v1785_v12  ;;  %v1320_v25 = vmul.f32 %v2744_v38, %v4010_v17  ;;  %v1308_v8 = vadd.f32 %v2738_v23, %v1307_v22 }
 0x12a   :  { %v1302_v48 = vsel %vm4028_vm9, %v1301_v46, %v1297_v15  ;;  %v1777_v7 = vsel %vm1776_vm4, %v2736_v55, %v1773_v11  ;;  %vm1325_vm8 = vweird.f32 %v2744_v38  ;;  %v4103_v46 = vadd.f32 1.0, %v2742_v9  ;;  %vm1791_vm9 = vmor %vm1789_vm0, %vm1790_vm6 }
 0x12b   :  { %2095 = vst [vmem:[%s4800_s3 + $0x58] sm:$0xff] %v1302_v48  ;;  %v1782_v57 = vsel %vm4035_vm10, %v1781_v35, %v1777_v7  ;;  %v1787_v32 = vmul.f32 %v2740_v4, %v1786_v53  ;;  %v1321_v45 = vsub.f32 1.0, %v1320_v25  ;;  %v2746_v50 = vpop.eup %2745  ;;  %v1312_v63 = vsel %vm1311_vm7, %v2738_v23, %v1308_v8  ;;  %vm1326_vm11 = vmor %vm1324_vm3, %vm1325_vm8 }
 0x12c   :  { %v661_v31 = vpop.f32.mrf.mxu2  ;;  %2127 = vst [vmem:[%s4800_s3 + $0x158] sm:$0xff] %v1782_v57  ;;  %v655_v27 = vadd.f32 %v3819_v51, %v3936_v59  ;;  %v577_v55 = vadd.f32 %v3819_v51, %v3948_v56  ;;  %v657_v26 = vadd.f32 %v3819_v51, %v3985_v10  ;;  %v1317_v14 = vsel %vm4055_vm14, %v1316_v34, %v1312_v63 }
 0x12d   :  { %v1788_v40 = vadd.f32 %v2740_v4, %v1787_v32  ;;  %v1322_v58 = vmul.f32 %v2744_v38, %v1321_v45  ;;  %v1800_v13 = vmul.f32 %v2746_v50, %v4039_v60  ;;  %2096 = vst [vmem:[%s4800_s3 + $0x60] sm:$0xff] %v1317_v14  ;;  %v1796_v59 = vor.u32 1.1754944e-38, %v1795_v47  ;;  %v830_v37 = vpop.f32.mrf.mxu3 }
 0x12e   :  { %v584_v39 = vpop.f32.mrf.mxu0  ;;  %vm4120_vm10 = vcmp.eq.f32.partialorder %v1328_v49, 8.507059e+37  ;;  %v1331_v10 = vor.u32 1.1754944e-38, %v1330_v30  ;;  %2747 = vrcp.f32 %v4103_v46  ;;  %v1808_v36 = vand.u32 2147483647, %v4039_v60 }
 0x12f   :  { %v1792_v35 = vsel %vm1791_vm9, %v2740_v4, %v1788_v40  ;;  %v1323_v0 = vadd.f32 %v2744_v38, %v1322_v58  ;;  %v1801_v42 = vsub.f32 1.0, %v1800_v13  ;;  %v1810_v33 = vand.u32 2147483648, %v4039_v60  ;;  %v753_v1 = vpop.f32.mrf.mxu1 }
 0x130   :  { %v1797_v23 = vsel %vm4077_vm2, %v1796_v59, %v1792_v35  ;;  %v824_v21 = vadd.f32 %v3943_v62, %v655_v27  ;;  %v746_v34 = vadd.f32 %v3954_v54, %v577_v55  ;;  %vm1805_vm12 = vweird.f32 %v2746_v50 }
 0x131   :  { %2128 = vst [vmem:[%s4800_s3 + $0x160] sm:$0xff] %v1797_v23  ;;  %v1327_v52 = vsel %vm1326_vm11, %v2744_v38, %v1323_v0  ;;  %v1802_v43 = vmul.f32 %v2746_v50, %v1801_v42  ;;  %v826_v24 = vadd.f32 %v3993_v20, %v657_v26  ;;  %vm1804_vm13 = vweird.f32 %v4039_v60 }
 0x132   :  { %v1332_v28 = vsel %vm4120_vm10, %v1331_v10, %v1327_v52  ;;  %v2518_v17 = vmul.f32 -1.442695, %v824_v21  ;;  %v2487_v44 = vmul.f32 -1.442695, %v746_v34  ;;  %v580_v4 = vadd.f32 %v3819_v51, %v4002_v6  ;;  %vm1806_vm14 = vmor %vm1804_vm13, %vm1805_vm12 }
 0x133   :  { %2097 = vst [vmem:[%s4800_s3 + $0x68] sm:$0xff] %v1332_v28  ;;  %v1803_v54 = vadd.f32 %v2746_v50, %v1802_v43  ;;  %v2519_v2 = vmul.f32 -1.442695, %v826_v24  ;;  %v660_v20 = vadd.f32 %v3819_v51, %v4043_v16  ;;  %vm1809_vm15 = vcmp.eq.f32.partialorder %v1808_v36, 8.507059e+37 }
 0x134   :  { %v664_v62 = vpop.f32.mrf.mxu2  ;;  %v2748_v5 = vpop.eup %2747  ;;  %v1811_v60 = vor.u32 1.1754944e-38, %v1810_v33  ;;  %2749 = vpow2.f32 %v2518_v17  ;;  %v582_v29 = vadd.f32 %v3819_v51, %v4061_v61  ;;  %v662_v12 = vadd.f32 %v3819_v51, %v661_v31 }
 0x135   :  { %v1807_v9 = vsel %vm1806_vm14, %v2746_v50, %v1803_v54  ;;  %v1335_v11 = vmul.f32 %v2748_v5, %v4103_v46  ;;  %2751 = vpow2.f32 %v2487_v44  ;;  %v749_v6 = vadd.f32 %v4012_v41, %v580_v4  ;;  %v833_v41 = vpop.f32.mrf.mxu3 }
 0x136   :  { %v586_v47 = vpop.f32.mrf.mxu0  ;;  %v1812_v18 = vsel %vm1809_vm15, %v1811_v60, %v1807_v9  ;;  %2753 = vpow2.f32 %v2519_v2  ;;  %v829_v16 = vadd.f32 %v4059_v19, %v660_v20  ;;  %vm1339_vm0 = vweird.f32 %v4103_v46 }
 0x137   :  { %2129 = vst [vmem:[%s4800_s3 + $0x168] sm:$0xff] %v1812_v18  ;;  %v1336_v38 = vsub.f32 1.0, %v1335_v11  ;;  %v1343_v61 = vand.u32 2147483647, %v4103_v46  ;;  %v751_v15 = vadd.f32 %v4087_v3, %v582_v29  ;;  %v1345_v22 = vand.u32 2147483648, %v4103_v46  ;;  %v755_v55 = vpop.f32.mrf.mxu1 }
 0x138   :  { %v2488_v49 = vmul.f32 -1.442695, %v749_v6  ;;  %v2520_v48 = vmul.f32 -1.442695, %v829_v16  ;;  %v585_v7 = vadd.f32 %v3819_v51, %v584_v39  ;;  %vm1340_vm1 = vweird.f32 %v2748_v5 }
 0x139   :  { %v1337_v53 = vmul.f32 %v2748_v5, %v1336_v38  ;;  %v2489_v19 = vmul.f32 -1.442695, %v751_v15  ;;  %v665_v25 = vadd.f32 %v3819_v51, %v664_v62  ;;  %v831_v8 = vadd.f32 %v830_v37, %v662_v12  ;;  %vm1341_vm2 = vmor %vm1339_vm0, %vm1340_vm1 }
 0x13a   :  { %v2750_v57 = vpop.eup %2749  ;;  %2755 = vpow2.f32 %v2488_v49  ;;  %v587_v30 = vadd.f32 %v3819_v51, %v586_v47  ;;  %v1346_v50 = vor.u32 1.1754944e-38, %v1345_v22  ;;  %v754_v27 = vadd.f32 %v753_v1, %v585_v7 }
 0x13b   :  { %v2752_v31 = vpop.eup %2751  ;;  %v1338_v32 = vadd.f32 %v2748_v5, %v1337_v53  ;;  %v4164_v3 = vadd.f32 1.0, %v2750_v57  ;;  %2757 = vpow2.f32 %v2520_v48  ;;  %vm1344_vm3 = vcmp.eq.f32.partialorder %v1343_v61, 8.507059e+37 }
 0x13c   :  { %v2754_v45 = vpop.eup %2753  ;;  %v4168_v63 = vadd.f32 1.0, %v2752_v31  ;;  %2759 = vpow2.f32 %v2489_v19  ;;  %v666_v26 = vpop.f32.mrf.mxu2  ;;  %v834_v14 = vadd.f32 %v833_v41, %v665_v25  ;;  %v2521_v13 = vmul.f32 -1.442695, %v831_v8 }
 0x13d   :  { %v1342_v39 = vsel %vm1341_vm2, %v2748_v5, %v1338_v32  ;;  %2761 = vrcp.f32 %v4164_v3  ;;  %v756_v59 = vadd.f32 %v755_v55, %v587_v30  ;;  %v4175_v46 = vadd.f32 1.0, %v2754_v45  ;;  %v835_v24 = vpop.f32.mrf.mxu3 }
 0x13e   :  { %v589_v40 = vpop.f32.mrf.mxu0  ;;  %v1347_v58 = vsel %vm1344_vm3, %v1346_v50, %v1342_v39  ;;  %2763 = vrcp.f32 %v4168_v63  ;;  %v667_v56 = vadd.f32 %v3819_v51, %v666_v26  ;;  %v1823_v37 = vand.u32 2147483647, %v4164_v3 }
 0x13f   :  { %2098 = vst [vmem:[%s4800_s3 + $0x70] sm:$0xff] %v1347_v58  ;;  %v1825_v35 = vand.u32 2147483648, %v4164_v3  ;;  %v2490_v0 = vmul.f32 -1.442695, %v754_v27  ;;  %v1358_v36 = vand.u32 2147483647, %v4168_v63  ;;  %2765 = vrcp.f32 %v4175_v46  ;;  %v758_v11 = vpop.f32.mrf.mxu1 }
 0x140   :  { %v2756_v10 = vpop.eup %2755  ;;  %v1360_v23 = vand.u32 2147483648, %v4168_v63  ;;  %v4183_v33 = vmul.f32 -1.442695, %v834_v14  ;;  %2767 = vpow2.f32 %v2521_v13  ;;  %v4189_v43 = vmul.f32 -1.442695, %v756_v59 }
 0x141   :  { %v2758_v42 = vpop.eup %2757  ;;  %v4185_v34 = vadd.f32 1.0, %v2756_v10  ;;  %vm1819_vm4 = vweird.f32 %v4164_v3  ;;  %vm1354_vm5 = vweird.f32 %v4168_v63  ;;  %v836_v17 = vadd.f32 %v835_v24, %v667_v56 }
 0x142   :  { %v2760_v21 = vpop.eup %2759  ;;  %v4187_v52 = vadd.f32 1.0, %v2758_v42  ;;  %v590_v44 = vadd.f32 %v3819_v51, %v589_v40  ;;  %vm4195_vm6 = vcmp.eq.f32.partialorder %v1823_v37, 8.507059e+37  ;;  %v1826_v2 = vor.u32 1.1754944e-38, %v1825_v35 }
 0x143   :  { %v2762_v28 = vpop.eup %2761  ;;  %v1838_v4 = vand.u32 2147483647, %v4175_v46  ;;  %vm4201_vm7 = vcmp.eq.f32.partialorder %v1358_v36, 8.507059e+37  ;;  %v1361_v60 = vor.u32 1.1754944e-38, %v1360_v23  ;;  %v1840_v29 = vand.u32 2147483648, %v4175_v46 }
 0x144   :  { %v2764_v1 = vpop.eup %2763  ;;  %v1815_v62 = vmul.f32 %v2762_v28, %v4164_v3  ;;  %2769 = vrcp.f32 %v4185_v34  ;;  %vm1834_vm8 = vweird.f32 %v4175_v46  ;;  %v4209_v9 = vadd.f32 1.0, %v2760_v21  ;;  %v4223_v41 = vpop.f32.mrf.mxu2 }
 0x145   :  { %v1350_v20 = vmul.f32 %v2764_v1, %v4168_v63  ;;  %2771 = vrcp.f32 %v4187_v52  ;;  %v2766_v12 = vpop.eup %2765  ;;  %v4211_v6 = vmul.f32 -1.442695, %v836_v17  ;;  %v4213_v16 = vadd.f32 %v758_v11, %v590_v44  ;;  %v838_v59 = vpop.f32.mrf.mxu3 }
 0x146   :  { %v1816_v47 = vsub.f32 1.0, %v1815_v62  ;;  %2773 = vpow2.f32 %v2490_v0  ;;  %v4215_v38 = vpop.f32.mrf.mxu0  ;;  %v2768_v61 = vpop.eup %2767  ;;  %vm1820_vm9 = vweird.f32 %v2762_v28  ;;  %v1830_v22 = vmul.f32 %v2766_v12, %v4175_v46 }
 0x147   :  { %v1351_v18 = vsub.f32 1.0, %v1350_v20  ;;  %vm4218_vm10 = vcmp.eq.f32.partialorder %v1838_v4, 8.507059e+37  ;;  %vm1355_vm11 = vweird.f32 %v2764_v1  ;;  %v1841_v7 = vor.u32 1.1754944e-38, %v1840_v29  ;;  %vm1821_vm13 = vmor %vm1819_vm4, %vm1820_vm9  ;;  %v4272_v62 = vpop.f32.mrf.mxu1 }
 0x148   :  { %v1817_v15 = vmul.f32 %v2762_v28, %v1816_v47  ;;  %vm1369_vm12 = vweird.f32 %v4185_v34  ;;  %v1831_v19 = vsub.f32 1.0, %v1830_v22  ;;  %v1373_v25 = vand.u32 2147483647, %v4185_v34  ;;  %vm1356_vm14 = vmor %vm1354_vm5, %vm1355_vm11 }
 0x149   :  { %v1352_v48 = vmul.f32 %v2764_v1, %v1351_v18  ;;  %2775 = vrcp.f32 %v4209_v9  ;;  %v1375_v30 = vand.u32 2147483648, %v4185_v34  ;;  %v1853_v31 = vand.u32 2147483647, %v4187_v52 }
 0x14a   :  { %v1818_v53 = vadd.f32 %v2762_v28, %v1817_v15  ;;  %v2770_v57 = vpop.eup %2769  ;;  %v4231_v32 = vadd.f32 1.0, %v2768_v61  ;;  %v1832_v27 = vmul.f32 %v2766_v12, %v1831_v19  ;;  %vm1835_vm15 = vweird.f32 %v2766_v12 }
 0x14b   :  { %v1353_v8 = vadd.f32 %v2764_v1, %v1352_v48  ;;  %v2772_v45 = vpop.eup %2771  ;;  %v1365_v55 = vmul.f32 %v2770_v57, %v4185_v34  ;;  %vm1849_vm0 = vweird.f32 %v4187_v52  ;;  %v1855_v13 = vand.u32 2147483648, %v4187_v52  ;;  %vm1836_vm1 = vmor %vm1834_vm8, %vm1835_vm15 }
 0x14c   :  { %v1822_v50 = vsel %vm1821_vm13, %v2762_v28, %v1818_v53  ;;  %v2774_v26 = vpop.eup %2773  ;;  %v1845_v14 = vmul.f32 %v2772_v45, %v4187_v52  ;;  %v1833_v40 = vadd.f32 %v2766_v12, %v1832_v27  ;;  %vm4252_vm2 = vcmp.eq.f32.partialorder %v1373_v25, 8.507059e+37  ;;  %v671_v4 = vpop.f32.mrf.mxu2 }
 0x14d   :  { %v1827_v3 = vsel %vm4195_vm6, %v1826_v2, %v1822_v50  ;;  %v1357_v39 = vsel %vm1356_vm14, %v2764_v1, %v1353_v8  ;;  %v1366_v58 = vsub.f32 1.0, %v1365_v55  ;;  %v1376_v10 = vor.u32 1.1754944e-38, %v1375_v30  ;;  %v840_v48 = vpop.f32.mrf.mxu3 }
 0x14e   :  { %2130 = vst [vmem:[%s4800_s3 + $0x170] sm:$0xff] %v1827_v3  ;;  %v1362_v63 = vsel %vm4201_vm7, %v1361_v60, %v1357_v39  ;;  %v1846_v37 = vsub.f32 1.0, %v1845_v14  ;;  %2777 = vrcp.f32 %v4231_v32  ;;  %v1837_v0 = vsel %vm1836_vm1, %v2766_v12, %v1833_v40  ;;  %v4264_v24 = vpop.f32.mrf.mxu0 }
 0x14f   :  { %2099 = vst [vmem:[%s4800_s3 + $0x78] sm:$0xff] %v1362_v63  ;;  %v2776_v35 = vpop.eup %2775  ;;  %v1367_v42 = vmul.f32 %v2770_v57, %v1366_v58  ;;  %vm1370_vm3 = vweird.f32 %v2770_v57  ;;  %vm4257_vm4 = vcmp.eq.f32.partialorder %v1853_v31, 8.507059e+37  ;;  %v1842_v46 = vsel %vm4218_vm10, %v1841_v7, %v1837_v0 }
 0x150   :  { %v1847_v23 = vmul.f32 %v2772_v45, %v1846_v37  ;;  %vm1850_vm5 = vweird.f32 %v2772_v45  ;;  %v1380_v21 = vmul.f32 %v2776_v35, %v4209_v9  ;;  %2131 = vst [vmem:[%s4800_s3 + $0x178] sm:$0xff] %v1842_v46  ;;  %v1856_v17 = vor.u32 1.1754944e-38, %v1855_v13  ;;  %vm1371_vm6 = vmor %vm1369_vm12, %vm1370_vm3 }
 0x151   :  { %v1368_v28 = vadd.f32 %v2770_v57, %v1367_v42  ;;  %v1388_v44 = vand.u32 2147483647, %v4209_v9  ;;  %v4270_v1 = vadd.f32 1.0, %v2774_v26  ;;  %vm1384_vm7 = vweird.f32 %v4209_v9  ;;  %vm1851_vm8 = vmor %vm1849_vm0, %vm1850_vm5 }
 0x152   :  { %v1848_v54 = vadd.f32 %v2772_v45, %v1847_v23  ;;  %v1381_v2 = vsub.f32 1.0, %v1380_v21  ;;  %2779 = vpow2.f32 %v4183_v33  ;;  %vm1385_vm9 = vweird.f32 %v2776_v35 }
 0x153   :  { %v1372_v20 = vsel %vm1371_vm6, %v2770_v57, %v1368_v28  ;;  %v1390_v5 = vand.u32 2147483648, %v4209_v9  ;;  %2781 = vrcp.f32 %v4270_v1  ;;  %v2492_v11 = vmul.f32 -1.442695, %v4213_v16  ;;  %vm1386_vm11 = vmor %vm1384_vm7, %vm1385_vm9  ;;  %v4362_v28 = vld [vmem:[%s4798_s2] ss:$0 sm:$0xff] }
 0x154   :  { %v2778_v60 = vpop.eup %2777  ;;  %v1377_v34 = vsel %vm4252_vm2, %v1376_v10, %v1372_v20  ;;  %v1852_v29 = vsel %vm1851_vm8, %v2772_v45, %v1848_v54  ;;  %v1382_v47 = vmul.f32 %v2776_v35, %v1381_v2  ;;  %vm4291_vm10 = vcmp.eq.f32.partialorder %v1388_v44, 8.507059e+37  ;;  %v4333_v14 = vpop.f32.mrf.mxu2 }
 0x155   :  { %2100 = vst [vmem:[%s4800_s3 + $0x80] sm:$0xff] %v1377_v34  ;;  %v1857_v33 = vsel %vm4257_vm4, %v1856_v17, %v1852_v29  ;;  %v1860_v12 = vmul.f32 %v2778_v60, %v4231_v32  ;;  %v1868_v18 = vand.u32 2147483647, %v4231_v32  ;;  %v1870_v61 = vand.u32 2147483648, %v4231_v32  ;;  %v4366_v44 = vpop.f32.mrf.mxu3 }
 0x156   :  { %2132 = vst [vmem:[%s4800_s3 + $0x180] sm:$0xff] %v1857_v33  ;;  %v1383_v16 = vadd.f32 %v2776_v35, %v1382_v47  ;;  %2783 = vpow2.f32 %v4189_v43  ;;  %v670_v15 = vadd.f32 %v3819_v51, %v4223_v41  ;;  %v1391_v22 = vor.u32 1.1754944e-38, %v1390_v5  ;;  %v4323_v45 = vpop.f32.mrf.mxu0 }
 0x157   :  { %v1861_v49 = vsub.f32 1.0, %v1860_v12  ;;  %vm1864_vm12 = vweird.f32 %v4231_v32  ;;  %2785 = vpow2.f32 %v4211_v6  ;;  %vm1865_vm13 = vweird.f32 %v2778_v60 }
 0x158   :  { %v2780_v7 = vpop.eup %2779  ;;  %v1387_v53 = vsel %vm1386_vm11, %v2776_v35, %v1383_v16  ;;  %2787 = vpow2.f32 %v2492_v11  ;;  %v839_v19 = vadd.f32 %v838_v59, %v670_v15  ;;  %v592_v9 = vadd.f32 %v3819_v51, %v4215_v38  ;;  %v763_v38 = vpop.f32.mrf.mxu1  ;;  %vm1866_vm15 = vmor %vm1864_vm12, %vm1865_vm13 }
 0x159   :  { %v2782_v43 = vpop.eup %2781  ;;  %v1392_v41 = vsel %vm4291_vm10, %v1391_v22, %v1387_v53  ;;  %v1862_v25 = vmul.f32 %v2778_v60, %v1861_v49  ;;  %v4311_v57 = vadd.f32 1.0, %v2780_v7  ;;  %vm4318_vm14 = vcmp.eq.f32.partialorder %v1868_v18, 8.507059e+37 }
 0x15a   :  { %2101 = vst [vmem:[%s4800_s3 + $0x88] sm:$0xff] %v1392_v41  ;;  %v1871_v8 = vor.u32 1.1754944e-38, %v1870_v61  ;;  %v1395_v30 = vmul.f32 %v2782_v43, %v4270_v1  ;;  %v2524_v31 = vmul.f32 -1.442695, %v839_v19  ;;  %v1403_v27 = vand.u32 2147483647, %v4270_v1 }
 0x15b   :  { %v1863_v50 = vadd.f32 %v2778_v60, %v1862_v25  ;;  %v1405_v55 = vand.u32 2147483648, %v4270_v1  ;;  %2789 = vrcp.f32 %v4311_v57  ;;  %vm1399_vm0 = vweird.f32 %v4270_v1 }
 0x15c   :  { %v2784_v26 = vpop.eup %2783  ;;  %v1396_v3 = vsub.f32 1.0, %v1395_v30  ;;  %2791 = vpow2.f32 %v2524_v31  ;;  %v672_v39 = vadd.f32 %v3819_v51, %v671_v4  ;;  %vm1400_vm1 = vweird.f32 %v2782_v43 }
 0x15d   :  { %v2786_v63 = vpop.eup %2785  ;;  %v1867_v40 = vsel %vm1866_vm15, %v2778_v60, %v1863_v50  ;;  %v4335_v58 = vadd.f32 1.0, %v2784_v26  ;;  %v761_v13 = vadd.f32 %v4272_v62, %v592_v9  ;;  %v1883_v10 = vand.u32 2147483647, %v4311_v57  ;;  %vm1401_vm3 = vmor %vm1399_vm0, %vm1400_vm1 }
 0x15e   :  { %v2788_v59 = vpop.eup %2787  ;;  %v1872_v32 = vsel %vm4318_vm14, %v1871_v8, %v1867_v40  ;;  %v1397_v56 = vmul.f32 %v2782_v43, %v1396_v3  ;;  %v4341_v37 = vadd.f32 1.0, %v2786_v63  ;;  %vm4346_vm2 = vcmp.eq.f32.partialorder %v1403_v27, 8.507059e+37  ;;  %v4385_v33 = vpop.f32.mrf.mxu0 }
 0x15f   :  { %2133 = vst [vmem:[%s4800_s3 + $0x188] sm:$0xff] %v1872_v32  ;;  %v1406_v35 = vor.u32 1.1754944e-38, %v1405_v55  ;;  %2793 = vrcp.f32 %v4335_v58  ;;  %v1885_v42 = vand.u32 2147483648, %v4311_v57  ;;  %v841_v36 = vadd.f32 %v840_v48, %v672_v39  ;;  %v676_v48 = vpop.f32.mrf.mxu2  ;;  %v845_v39 = vpop.f32.mrf.mxu3 }
 0x160   :  { %v1398_v0 = vadd.f32 %v2782_v43, %v1397_v56  ;;  %2795 = vrcp.f32 %v4341_v37  ;;  %vm1879_vm4 = vweird.f32 %v4311_v57  ;;  %v4357_v23 = vadd.f32 1.0, %v2788_v59  ;;  %v765_v18 = vpop.f32.mrf.mxu1 }
 0x161   :  { %v2790_v46 = vpop.eup %2789  ;;  %v2493_v21 = vmul.f32 -1.442695, %v761_v13  ;;  %v595_v17 = vadd.f32 %v4362_v28, %v4264_v24  ;;  %vm4369_vm5 = vcmp.eq.f32.partialorder %v1883_v10, 8.507059e+37  ;;  %v1418_v4 = vand.u32 2147483647, %v4335_v58 }
 0x162   :  { %v2792_v62 = vpop.eup %2791  ;;  %v1402_v54 = vsel %vm1401_vm3, %v2782_v43, %v1398_v0  ;;  %v1875_v1 = vmul.f32 %v2790_v46, %v4311_v57  ;;  %v1420_v20 = vand.u32 2147483648, %v4335_v58  ;;  %v1898_v60 = vand.u32 2147483647, %v4341_v37 }
 0x163   :  { %v1407_v5 = vsel %vm4346_vm2, %v1406_v35, %v1402_v54  ;;  %v1900_v24 = vand.u32 2147483648, %v4341_v37  ;;  %2797 = vrcp.f32 %v4357_v23  ;;  %v1886_v29 = vor.u32 1.1754944e-38, %v1885_v42 }
 0x164   :  { %2102 = vst [vmem:[%s4800_s3 + $0x90] sm:$0xff] %v1407_v5  ;;  %v1876_v34 = vsub.f32 1.0, %v1875_v1  ;;  %v4383_v47 = vadd.f32 1.0, %v2792_v62  ;;  %v2525_v11 = vmul.f32 -1.442695, %v841_v36  ;;  %vm1414_vm6 = vweird.f32 %v4335_v58 }
 0x165   :  { %v2794_v52 = vpop.eup %2793  ;;  %vm1894_vm7 = vweird.f32 %v4341_v37  ;;  %2799 = vpow2.f32 %v2493_v21  ;;  %v764_v12 = vadd.f32 %v763_v38, %v595_v17  ;;  %vm1880_vm8 = vweird.f32 %v2790_v46 }
 0x166   :  { %v2796_v16 = vpop.eup %2795  ;;  %v1877_v61 = vmul.f32 %v2790_v46, %v1876_v34  ;;  %v1410_v15 = vmul.f32 %v2794_v52, %v4335_v58  ;;  %vm4390_vm9 = vcmp.eq.f32.partialorder %v1418_v4, 8.507059e+37  ;;  %v1421_v49 = vor.u32 1.1754944e-38, %v1420_v20  ;;  %vm1881_vm12 = vmor %vm1879_vm4, %vm1880_vm8  ;;  %v4430_v58 = vpop.f32.mrf.mxu0 }
 0x167   :  { %v1890_v7 = vmul.f32 %v2796_v16, %v4341_v37  ;;  %vm4395_vm10 = vcmp.eq.f32.partialorder %v1898_v60, 8.507059e+37  ;;  %v1901_v19 = vor.u32 1.1754944e-38, %v1900_v24  ;;  %vm1429_vm11 = vweird.f32 %v4357_v23  ;;  %v679_v54 = vpop.f32.mrf.mxu2 }
 0x168   :  { %2801 = vrcp.f32 %v4383_v47  ;;  %v1878_v43 = vadd.f32 %v2790_v46, %v1877_v61  ;;  %v1411_v41 = vsub.f32 1.0, %v1410_v15  ;;  %v1433_v25 = vand.u32 2147483647, %v4357_v23  ;;  %v768_v21 = vpop.f32.mrf.mxu1 }
 0x169   :  { %v1435_v9 = vand.u32 2147483648, %v4357_v23  ;;  %v2798_v6 = vpop.eup %2797  ;;  %v1891_v8 = vsub.f32 1.0, %v1890_v7  ;;  %2803 = vpow2.f32 %v2525_v11  ;;  %v2494_v30 = vmul.f32 -1.442695, %v764_v12 }
 0x16a   :  { %v675_v31 = vadd.f32 %v4362_v28, %v4333_v14  ;;  %v1882_v50 = vsel %vm1881_vm12, %v2790_v46, %v1878_v43  ;;  %v1412_v27 = vmul.f32 %v2794_v52, %v1411_v41  ;;  %vm1415_vm13 = vweird.f32 %v2794_v52 }
 0x16b   :  { %v1425_v55 = vmul.f32 %v2798_v6, %v4357_v23  ;;  %v2800_v38 = vpop.eup %2799  ;;  %v1887_v26 = vsel %vm4369_vm5, %v1886_v29, %v1882_v50  ;;  %v1892_v3 = vmul.f32 %v2796_v16, %v1891_v8  ;;  %vm1895_vm14 = vweird.f32 %v2796_v16  ;;  %vm1416_vm15 = vmor %vm1414_vm6, %vm1415_vm13 }
 0x16c   :  { %v597_v57 = vadd.f32 %v4362_v28, %v4323_v45  ;;  %2134 = vst [vmem:[%s4800_s3 + $0x190] sm:$0xff] %v1887_v26  ;;  %v1413_v14 = vadd.f32 %v2794_v52, %v1412_v27  ;;  %v4416_v40 = vadd.f32 1.0, %v2800_v38  ;;  %2805 = vpow2.f32 %v2494_v30  ;;  %vm1896_vm1 = vmor %vm1894_vm7, %vm1895_vm14 }
 0x16d   :  { %v1426_v63 = vsub.f32 1.0, %v1425_v55  ;;  %v1893_v59 = vadd.f32 %v2796_v16, %v1892_v3  ;;  %vm4420_vm0 = vcmp.eq.f32.partialorder %v1433_v25, 8.507059e+37  ;;  %v844_v45 = vadd.f32 %v4366_v44, %v675_v31  ;;  %v848_v22 = vpop.f32.mrf.mxu3 }
 0x16e   :  { %v2802_v13 = vpop.eup %2801  ;;  %v677_v56 = vadd.f32 %v4362_v28, %v676_v48  ;;  %v1417_v10 = vsel %vm1416_vm15, %v2794_v52, %v1413_v14  ;;  %vm1430_vm2 = vweird.f32 %v2798_v6  ;;  %v1915_v46 = vand.u32 2147483648, %v4383_v47  ;;  %v604_v41 = vpop.f32.mrf.mxu0 }
 0x16f   :  { %v1427_v51 = vmul.f32 %v2798_v6, %v1426_v63  ;;  %v1905_v35 = vmul.f32 %v2802_v13, %v4383_v47  ;;  %v2804_v0 = vpop.eup %2803  ;;  %v1422_v42 = vsel %vm4390_vm9, %v1421_v49, %v1417_v10  ;;  %v1897_v36 = vsel %vm1896_vm1, %v2796_v16, %v1893_v59  ;;  %vm1431_vm3 = vmor %vm1429_vm11, %vm1430_vm2  ;;  %v681_v55 = vpop.f32.mrf.mxu2 }
 0x170   :  { %2807 = vrcp.f32 %v4416_v40  ;;  %2103 = vst [vmem:[%s4800_s3 + $0x98] sm:$0xff] %v1422_v42  ;;  %v1902_v37 = vsel %vm4395_vm10, %v1901_v19, %v1897_v36  ;;  %v766_v62 = vadd.f32 %v765_v18, %v597_v57  ;;  %v1436_v1 = vor.u32 1.1754944e-38, %v1435_v9  ;;  %v770_v30 = vpop.f32.mrf.mxu1 }
 0x171   :  { %v1428_v17 = vadd.f32 %v2798_v6, %v1427_v51  ;;  %v1906_v44 = vsub.f32 1.0, %v1905_v35  ;;  %2135 = vst [vmem:[%s4800_s3 + $0x198] sm:$0xff] %v1902_v37  ;;  %v4447_v2 = vadd.f32 1.0, %v2804_v0  ;;  %v2526_v4 = vmul.f32 -1.442695, %v844_v45 }
 0x172   :  { %v846_v20 = vadd.f32 %v845_v39, %v677_v56  ;;  %v2806_v5 = vpop.eup %2805  ;;  %vm1910_vm4 = vweird.f32 %v2802_v13  ;;  %v1913_v34 = vand.u32 2147483647, %v4383_v47  ;;  %vm1909_vm5 = vweird.f32 %v4383_v47 }
 0x173   :  { %v1432_v60 = vsel %vm1431_vm3, %v2798_v6, %v1428_v17  ;;  %v1907_v24 = vmul.f32 %v2802_v13, %v1906_v44  ;;  %v1916_v11 = vor.u32 1.1754944e-38, %v1915_v46  ;;  %2809 = vrcp.f32 %v4447_v2  ;;  %vm1911_vm6 = vmor %vm1909_vm5, %vm1910_vm4 }
 0x174   :  { %v1437_v29 = vsel %vm4420_vm0, %v1436_v1, %v1432_v60  ;;  %v1448_v52 = vand.u32 2147483647, %v4416_v40  ;;  %v4458_v12 = vadd.f32 1.0, %v2806_v5  ;;  %v2495_v18 = vmul.f32 -1.442695, %v766_v62 }
 0x175   :  { %2104 = vst [vmem:[%s4800_s3 + $0xa0] sm:$0xff] %v1437_v29  ;;  %v1908_v23 = vadd.f32 %v2802_v13, %v1907_v24  ;;  %2811 = vpow2.f32 %v2526_v4  ;;  %v2527_v61 = vmul.f32 -1.442695, %v846_v20  ;;  %v600_v47 = vadd.f32 %v4362_v28, %v4385_v33  ;;  %v850_v36 = vpop.f32.mrf.mxu3 }
 0x176   :  { %v2808_v16 = vpop.eup %2807  ;;  %v680_v15 = vadd.f32 %v4362_v28, %v679_v54  ;;  %vm1914_vm7 = vcmp.eq.f32.partialorder %v1913_v34, 8.507059e+37  ;;  %v1450_v7 = vand.u32 2147483648, %v4416_v40  ;;  %v1928_v19 = vand.u32 2147483647, %v4447_v2  ;;  %v606_v20 = vpop.f32.mrf.mxu0 }
 0x177   :  { %v1912_v49 = vsel %vm1911_vm6, %v2802_v13, %v1908_v23  ;;  %v1440_v48 = vmul.f32 %v2808_v16, %v4416_v40  ;;  %2813 = vrcp.f32 %v4458_v12  ;;  %vm1444_vm8 = vweird.f32 %v4416_v40 }
 0x178   :  { %v1917_v53 = vsel %vm1914_vm7, %v1916_v11, %v1912_v49  ;;  %v1930_v33 = vand.u32 2147483648, %v4447_v2  ;;  %2815 = vpow2.f32 %v2495_v18  ;;  %vm4472_vm9 = vcmp.eq.f32.partialorder %v1448_v52, 8.507059e+37 }
 0x179   :  { %2136 = vst [vmem:[%s4800_s3 + $0x1a0] sm:$0xff] %v1917_v53  ;;  %v1441_v43 = vsub.f32 1.0, %v1440_v48  ;;  %v2810_v25 = vpop.eup %2809  ;;  %2817 = vpow2.f32 %v2527_v61  ;;  %v769_v6 = vadd.f32 %v768_v21, %v600_v47  ;;  %v849_v8 = vadd.f32 %v848_v22, %v680_v15 }
 0x17a   :  { %vm1445_vm10 = vweird.f32 %v2808_v16  ;;  %v1451_v50 = vor.u32 1.1754944e-38, %v1450_v7  ;;  %v1920_v27 = vmul.f32 %v2810_v25, %v4447_v2  ;;  %vm1924_vm11 = vweird.f32 %v4447_v2 }
 0x17b   :  { %v1442_v31 = vmul.f32 %v2808_v16, %v1441_v43  ;;  %v2812_v38 = vpop.eup %2811  ;;  %vm4478_vm12 = vcmp.eq.f32.partialorder %v1928_v19, 8.507059e+37  ;;  %v2496_v3 = vmul.f32 -1.442695, %v769_v6  ;;  %v602_v57 = vadd.f32 %v4362_v28, %v4430_v58  ;;  %vm1446_vm13 = vmor %vm1444_vm8, %vm1445_vm10 }
 0x17c   :  { %v1921_v14 = vsub.f32 1.0, %v1920_v27  ;;  %v1931_v63 = vor.u32 1.1754944e-38, %v1930_v33  ;;  %v4484_v13 = vadd.f32 1.0, %v2812_v38  ;;  %vm1459_vm14 = vweird.f32 %v4458_v12 }
 0x17d   :  { %v1443_v39 = vadd.f32 %v2808_v16, %v1442_v31  ;;  %v2814_v59 = vpop.eup %2813  ;;  %v1463_v32 = vand.u32 2147483647, %v4458_v12  ;;  %2819 = vpow2.f32 %v2496_v3  ;;  %v2528_v45 = vmul.f32 -1.442695, %v849_v8 }
 0x17e   :  { %v2816_v56 = vpop.eup %2815  ;;  %v1922_v51 = vmul.f32 %v2810_v25, %v1921_v14  ;;  %vm1925_vm15 = vweird.f32 %v2810_v25  ;;  %v1455_v35 = vmul.f32 %v2814_v59, %v4458_v12  ;;  %v1465_v42 = vand.u32 2147483648, %v4458_v12 }
 0x17f   :  { %v1447_v10 = vsel %vm1446_vm13, %v2808_v16, %v1443_v39  ;;  %v2818_v58 = vpop.eup %2817  ;;  %2821 = vrcp.f32 %v4484_v13  ;;  %v771_v40 = vadd.f32 %v770_v30, %v602_v57  ;;  %v4498_v37 = vadd.f32 1.0, %v2816_v56  ;;  %vm1926_vm0 = vmor %vm1924_vm11, %vm1925_vm15 }
 0x180   :  { %v1452_v0 = vsel %vm4472_vm9, %v1451_v50, %v1447_v10  ;;  %v1923_v46 = vadd.f32 %v2810_v25, %v1922_v51  ;;  %v1456_v21 = vsub.f32 1.0, %v1455_v35  ;;  %v682_v17 = vadd.f32 %v4362_v28, %v681_v55  ;;  %v773_v34 = vpop.f32.mrf.mxu1 }
 0x181   :  { %2105 = vst [vmem:[%s4800_s3 + $0xa8] sm:$0xff] %v1452_v0  ;;  %vm1460_vm1 = vweird.f32 %v2814_v59  ;;  %v1943_v44 = vand.u32 2147483647, %v4484_v13  ;;  %v4504_v62 = vadd.f32 1.0, %v2818_v58  ;;  %2823 = vpow2.f32 %v2528_v45 }
 0x182   :  { %v1927_v54 = vsel %vm1926_vm0, %v2810_v25, %v1923_v46  ;;  %v1457_v1 = vmul.f32 %v2814_v59, %v1456_v21  ;;  %v1945_v4 = vand.u32 2147483648, %v4484_v13  ;;  %2825 = vrcp.f32 %v4498_v37  ;;  %vm1461_vm3 = vmor %vm1459_vm14, %vm1460_vm1 }
 0x183   :  { %v2820_v5 = vpop.eup %2819  ;;  %v1932_v60 = vsel %vm4478_vm12, %v1931_v63, %v1927_v54  ;;  %vm4510_vm2 = vcmp.eq.f32.partialorder %v1463_v32, 8.507059e+37  ;;  %v1466_v24 = vor.u32 1.1754944e-38, %v1465_v42  ;;  %2827 = vrcp.f32 %v4504_v62 }
 0x184   :  { %2137 = vst [vmem:[%s4800_s3 + $0x1a8] sm:$0xff] %v1932_v60  ;;  %v1458_v29 = vadd.f32 %v2814_v59, %v1457_v1  ;;  %v2497_v11 = vmul.f32 -1.442695, %v771_v40  ;;  %v605_v23 = vadd.f32 %v4362_v28, %v604_v41  ;;  %vm1939_vm4 = vweird.f32 %v4484_v13 }
 0x185   :  { %v684_v52 = vpop.f32.mrf.mxu2  ;;  %v2822_v18 = vpop.eup %2821  ;;  %v4523_v16 = vadd.f32 1.0, %v2820_v5  ;;  %v851_v61 = vadd.f32 %v850_v36, %v682_v17  ;;  %v4526_v47 = vadd.f32 %v4362_v28, %v606_v20  ;;  %vm4529_vm5 = vcmp.eq.f32.partialorder %v1943_v44, 8.507059e+37 }
 0x186   :  { %v1462_v15 = vsel %vm1461_vm3, %v2814_v59, %v1458_v29  ;;  %v1935_v22 = vmul.f32 %v2822_v18, %v4484_v13  ;;  %v1946_v48 = vor.u32 1.1754944e-38, %v1945_v4  ;;  %v1478_v7 = vand.u32 2147483647, %v4498_v37 }
 0x187   :  { %v2824_v12 = vpop.eup %2823  ;;  %v1467_v53 = vsel %vm4510_vm2, %v1466_v24, %v1462_v15  ;;  %v1480_v19 = vand.u32 2147483648, %v4498_v37  ;;  %v1958_v43 = vand.u32 2147483647, %v4504_v62  ;;  %2829 = vrcp.f32 %v4523_v16 }
 0x188   :  { %v2826_v33 = vpop.eup %2825  ;;  %2106 = vst [vmem:[%s4800_s3 + $0xb0] sm:$0xff] %v1467_v53  ;;  %v1936_v41 = vsub.f32 1.0, %v1935_v22  ;;  %vm1474_vm6 = vweird.f32 %v4498_v37  ;;  %v1960_v25 = vand.u32 2147483648, %v4504_v62  ;;  %v4544_v9 = vadd.f32 1.0, %v2824_v12  ;;  %v775_v10 = vpop.f32.mrf.mxu1 }
 0x189   :  { %v1470_v6 = vmul.f32 %v2826_v33, %v4498_v37  ;;  %vm1954_vm7 = vweird.f32 %v4504_v62  ;;  %2831 = vpow2.f32 %v2497_v11  ;;  %v2529_v8 = vmul.f32 -1.442695, %v851_v61  ;;  %v2828_v31 = vpop.eup %2827 }
 0x18a   :  { %v853_v30 = vpop.f32.mrf.mxu3  ;;  %v1937_v50 = vmul.f32 %v2822_v18, %v1936_v41  ;;  %vm1940_vm8 = vweird.f32 %v2822_v18  ;;  %vm4548_vm9 = vcmp.eq.f32.partialorder %v1478_v7, 8.507059e+37  ;;  %2833 = vrcp.f32 %v4544_v9 }
 0x18b   :  { %v1471_v55 = vsub.f32 1.0, %v1470_v6  ;;  %v1481_v38 = vor.u32 1.1754944e-38, %v1480_v19  ;;  %v1950_v26 = vmul.f32 %v2828_v31, %v4504_v62  ;;  %vm4554_vm10 = vcmp.eq.f32.partialorder %v1958_v43, 8.507059e+37  ;;  %vm1941_vm12 = vmor %vm1939_vm4, %vm1940_vm8 }
 0x18c   :  { %v1938_v57 = vadd.f32 %v2822_v18, %v1937_v50  ;;  %vm1475_vm11 = vweird.f32 %v2826_v33  ;;  %v1961_v39 = vor.u32 1.1754944e-38, %v1960_v25  ;;  %2835 = vpow2.f32 %v2529_v8  ;;  %v4558_v14 = vpop.f32.mrf.mxu0 }
 0x18d   :  { %v2830_v63 = vpop.eup %2829  ;;  %v1472_v59 = vmul.f32 %v2826_v33, %v1471_v55  ;;  %v1951_v32 = vsub.f32 1.0, %v1950_v26  ;;  %v774_v45 = vadd.f32 %v773_v34, %v605_v23  ;;  %v685_v56 = vadd.f32 %v4362_v28, %v684_v52  ;;  %v686_v42 = vpop.f32.mrf.mxu2  ;;  %vm1476_vm14 = vmor %vm1474_vm6, %vm1475_vm11 }
 0x18e   :  { %v1942_v51 = vsel %vm1941_vm12, %v2822_v18, %v1938_v57  ;;  %v1485_v35 = vmul.f32 %v2830_v63, %v4523_v16  ;;  %v1493_v58 = vand.u32 2147483647, %v4523_v16  ;;  %v1495_v0 = vand.u32 2147483648, %v4523_v16 }
 0x18f   :  { %v2832_v40 = vpop.eup %2831  ;;  %v1947_v36 = vsel %vm4529_vm5, %v1946_v48, %v1942_v51  ;;  %v1473_v13 = vadd.f32 %v2826_v33, %v1472_v59  ;;  %v1952_v46 = vmul.f32 %v2828_v31, %v1951_v32  ;;  %vm1955_vm13 = vweird.f32 %v2828_v31 }
 0x190   :  { %v2834_v21 = vpop.eup %2833  ;;  %2138 = vst [vmem:[%s4800_s3 + $0x1b0] sm:$0xff] %v1947_v36  ;;  %v1486_v17 = vsub.f32 1.0, %v1485_v35  ;;  %vm1489_vm15 = vweird.f32 %v4523_v16  ;;  %v4575_v44 = vadd.f32 1.0, %v2832_v40  ;;  %v2498_v54 = vmul.f32 -1.442695, %v774_v45  ;;  %vm1956_vm0 = vmor %vm1954_vm7, %vm1955_vm13  ;;  %v778_v53 = vpop.f32.mrf.mxu1 }
 0x191   :  { %v1477_v1 = vsel %vm1476_vm14, %v2826_v33, %v1473_v13  ;;  %v1953_v4 = vadd.f32 %v2828_v31, %v1952_v46  ;;  %v1965_v20 = vmul.f32 %v2834_v21, %v4544_v9  ;;  %v854_v5 = vadd.f32 %v853_v30, %v685_v56 }
 0x192   :  { %v2836_v60 = vpop.eup %2835  ;;  %v1482_v2 = vsel %vm4548_vm9, %v1481_v38, %v1477_v1  ;;  %v1487_v37 = vmul.f32 %v2830_v63, %v1486_v17  ;;  %vm1490_vm1 = vweird.f32 %v2830_v63  ;;  %2837 = vrcp.f32 %v4575_v44  ;;  %v855_v23 = vpop.f32.mrf.mxu3 }
 0x193   :  { %2107 = vst [vmem:[%s4800_s3 + $0xb8] sm:$0xff] %v1482_v2  ;;  %v1957_v24 = vsel %vm1956_vm0, %v2828_v31, %v1953_v4  ;;  %v1496_v34 = vor.u32 1.1754944e-38, %v1495_v0  ;;  %v1966_v29 = vsub.f32 1.0, %v1965_v20  ;;  %v1975_v11 = vand.u32 2147483648, %v4544_v9  ;;  %vm1491_vm2 = vmor %vm1489_vm15, %vm1490_vm1 }
 0x194   :  { %v1962_v52 = vsel %vm4554_vm10, %v1961_v39, %v1957_v24  ;;  %v1488_v18 = vadd.f32 %v2830_v63, %v1487_v37  ;;  %v4589_v62 = vadd.f32 1.0, %v2836_v60  ;;  %2839 = vpow2.f32 %v2498_v54  ;;  %v611_v48 = vpop.f32.mrf.mxu0 }
 0x195   :  { %2139 = vst [vmem:[%s4800_s3 + $0x1b8] sm:$0xff] %v1962_v52  ;;  %v1967_v61 = vmul.f32 %v2834_v21, %v1966_v29  ;;  %vm1970_vm3 = vweird.f32 %v2834_v21  ;;  %v1973_v15 = vand.u32 2147483647, %v4544_v9  ;;  %v2530_v22 = vmul.f32 -1.442695, %v854_v5  ;;  %v689_v25 = vpop.f32.mrf.mxu2 }
 0x196   :  { %v1492_v49 = vsel %vm1491_vm2, %v2830_v63, %v1488_v18  ;;  %vm1494_vm4 = vcmp.eq.f32.partialorder %v1493_v58, 8.507059e+37  ;;  %2841 = vrcp.f32 %v4589_v62  ;;  %vm1969_vm5 = vweird.f32 %v4544_v9 }
 0x197   :  { %v1497_v7 = vsel %vm1494_vm4, %v1496_v34, %v1492_v49  ;;  %v1968_v12 = vadd.f32 %v2834_v21, %v1967_v61  ;;  %2843 = vpow2.f32 %v2530_v22  ;;  %vm1971_vm6 = vmor %vm1969_vm5, %vm1970_vm3  ;;  %v1976_v16 = vor.u32 1.1754944e-38, %v1975_v11 }
 0x198   :  { %v2838_v19 = vpop.eup %2837  ;;  %2108 = vst [vmem:[%s4800_s3 + $0xc0] sm:$0xff] %v1497_v7  ;;  %v776_v43 = vadd.f32 %v775_v10, %v4526_v47  ;;  %v687_v33 = vadd.f32 %v4362_v28, %v686_v42  ;;  %v610_v41 = vadd.f32 %v4362_v28, %v4558_v14  ;;  %vm1974_vm7 = vcmp.eq.f32.partialorder %v1973_v15, 8.507059e+37  ;;  %v780_v17 = vpop.f32.mrf.mxu1 }
 0x199   :  { %v1972_v6 = vsel %vm1971_vm6, %v2834_v21, %v1968_v12  ;;  %v1500_v9 = vmul.f32 %v2838_v19, %v4575_v44  ;;  %vm1504_vm8 = vweird.f32 %v4575_v44  ;;  %v1508_v55 = vand.u32 2147483647, %v4575_v44 }
 0x19a   :  { %v2840_v8 = vpop.eup %2839  ;;  %v1977_v30 = vsel %vm1974_vm7, %v1976_v16, %v1972_v6  ;;  %v2499_v31 = vmul.f32 -1.442695, %v776_v43  ;;  %v856_v50 = vadd.f32 %v855_v23, %v687_v33  ;;  %v779_v27 = vadd.f32 %v778_v53, %v610_v41  ;;  %v858_v45 = vpop.f32.mrf.mxu3 }
 0x19b   :  { %2140 = vst [vmem:[%s4800_s3 + $0x1c0] sm:$0xff] %v1977_v30  ;;  %v1501_v47 = vsub.f32 1.0, %v1500_v9  ;;  %v4612_v38 = vadd.f32 1.0, %v2840_v8  ;;  %v690_v26 = vadd.f32 %v4362_v28, %v689_v25  ;;  %v1510_v57 = vand.u32 2147483648, %v4575_v44 }
 0x19c   :  { %v2842_v3 = vpop.eup %2841  ;;  %v1988_v39 = vand.u32 2147483647, %v4589_v62  ;;  %2845 = vpow2.f32 %v2499_v31  ;;  %v2531_v14 = vmul.f32 -1.442695, %v856_v50  ;;  %vm1505_vm9 = vweird.f32 %v2838_v19  ;;  %v614_v36 = vpop.f32.mrf.mxu0 }
 0x19d   :  { %v2844_v63 = vpop.eup %2843  ;;  %v1502_v59 = vmul.f32 %v2838_v19, %v1501_v47  ;;  %v1980_v32 = vmul.f32 %v2842_v3, %v4589_v62  ;;  %2847 = vrcp.f32 %v4612_v38  ;;  %v1990_v56 = vand.u32 2147483648, %v4589_v62  ;;  %vm1506_vm10 = vmor %vm1504_vm8, %vm1505_vm9  ;;  %v691_v37 = vpop.f32.mrf.mxu2 }
 0x19e   :  { %v4620_v10 = vadd.f32 1.0, %v2844_v63  ;;  %v2500_v51 = vmul.f32 -1.442695, %v779_v27  ;;  %v612_v35 = vadd.f32 %v4362_v28, %v611_v48  ;;  %2849 = vpow2.f32 %v2531_v14 }
 0x19f   :  { %v1503_v58 = vadd.f32 %v2838_v19, %v1502_v59  ;;  %v1981_v0 = vsub.f32 1.0, %v1980_v32  ;;  %v859_v42 = vadd.f32 %v858_v45, %v690_v26  ;;  %vm1509_vm11 = vcmp.eq.f32.partialorder %v1508_v55, 8.507059e+37 }
 0x1a0   :  { %v1511_v40 = vor.u32 1.1754944e-38, %v1510_v57  ;;  %vm1984_vm12 = vweird.f32 %v4589_v62  ;;  %2851 = vrcp.f32 %v4620_v10  ;;  %vm1985_vm13 = vweird.f32 %v2842_v3 }
 0x1a1   :  { %v1507_v13 = vsel %vm1506_vm10, %v2838_v19, %v1503_v58  ;;  %v1982_v46 = vmul.f32 %v2842_v3, %v1981_v0  ;;  %vm4627_vm14 = vcmp.eq.f32.partialorder %v1988_v39, 8.507059e+37  ;;  %2853 = vpow2.f32 %v2500_v51  ;;  %vm1986_vm15 = vmor %vm1984_vm12, %vm1985_vm13 }
 0x1a2   :  { %v2846_v54 = vpop.eup %2845  ;;  %v1512_v1 = vsel %vm1509_vm11, %v1511_v40, %v1507_v13  ;;  %v2532_v44 = vmul.f32 -1.442695, %v859_v42  ;;  %v781_v4 = vadd.f32 %v780_v17, %v612_v35  ;;  %v1991_v60 = vor.u32 1.1754944e-38, %v1990_v56  ;;  %v860_v12 = vpop.f32.mrf.mxu3 }
 0x1a3   :  { %v2848_v20 = vpop.eup %2847  ;;  %2109 = vst [vmem:[%s4800_s3 + $0xc8] sm:$0xff] %v1512_v1  ;;  %v1983_v5 = vadd.f32 %v2842_v3, %v1982_v46  ;;  %v4634_v2 = vadd.f32 1.0, %v2846_v54  ;;  %v4637_v24 = vadd.f32 %v4362_v28, %v614_v36  ;;  %v1523_v29 = vand.u32 2147483647, %v4612_v38  ;;  %v783_v13 = vpop.f32.mrf.mxu1 }
 0x1a4   :  { %v1515_v34 = vmul.f32 %v2848_v20, %v4612_v38  ;;  %2855 = vpow2.f32 %v2532_v44  ;;  %v2501_v11 = vmul.f32 -1.442695, %v781_v4  ;;  %v2850_v23 = vpop.eup %2849  ;;  %v1525_v18 = vand.u32 2147483648, %v4612_v38 }
 0x1a5   :  { %v1987_v52 = vsel %vm1986_vm15, %v2842_v3, %v1983_v5  ;;  %v2003_v61 = vand.u32 2147483647, %v4620_v10  ;;  %2857 = vrcp.f32 %v4634_v2  ;;  %v2005_v49 = vand.u32 2147483648, %v4620_v10  ;;  %v694_v59 = vpop.f32.mrf.mxu2 }
 0x1a6   :  { %v2852_v15 = vpop.eup %2851  ;;  %v1992_v22 = vsel %vm4627_vm14, %v1991_v60, %v1987_v52  ;;  %v1516_v62 = vsub.f32 1.0, %v1515_v34  ;;  %v4650_v48 = vadd.f32 1.0, %v2850_v23  ;;  %vm1519_vm0 = vweird.f32 %v4612_v38 }
 0x1a7   :  { %2141 = vst [vmem:[%s4800_s3 + $0x1c8] sm:$0xff] %v1992_v22  ;;  %vm1520_vm1 = vweird.f32 %v2848_v20  ;;  %v1995_v7 = vmul.f32 %v2852_v15, %v4620_v10  ;;  %2859 = vpow2.f32 %v2501_v11  ;;  %v2854_v53 = vpop.eup %2853  ;;  %v1538_v16 = vand.u32 2147483647, %v4634_v2 }
 0x1a8   :  { %v1517_v19 = vmul.f32 %v2848_v20, %v1516_v62  ;;  %v1540_v43 = vand.u32 2147483648, %v4634_v2  ;;  %2861 = vrcp.f32 %v4650_v48  ;;  %vm4660_vm2 = vcmp.eq.f32.partialorder %v1523_v29, 8.507059e+37  ;;  %vm1521_vm5 = vmor %vm1519_vm0, %vm1520_vm1  ;;  %v616_v62 = vpop.f32.mrf.mxu0 }
 0x1a9   :  { %v1526_v41 = vor.u32 1.1754944e-38, %v1525_v18  ;;  %v1996_v25 = vsub.f32 1.0, %v1995_v7  ;;  %v4664_v6 = vadd.f32 1.0, %v2854_v53  ;;  %vm1999_vm3 = vweird.f32 %v4620_v10 }
 0x1aa   :  { %v2856_v9 = vpop.eup %2855  ;;  %v1518_v8 = vadd.f32 %v2848_v20, %v1517_v19  ;;  %vm4667_vm4 = vcmp.eq.f32.partialorder %v2003_v61, 8.507059e+37  ;;  %v2006_v31 = vor.u32 1.1754944e-38, %v2005_v49  ;;  %vm2000_vm6 = vweird.f32 %v2852_v15  ;;  %v863_v44 = vpop.f32.mrf.mxu3 }
 0x1ab   :  { %v2858_v50 = vpop.eup %2857  ;;  %v1997_v27 = vmul.f32 %v2852_v15, %v1996_v25  ;;  %vm1534_vm7 = vweird.f32 %v4634_v2  ;;  %2863 = vrcp.f32 %v4664_v6  ;;  %vm4677_vm8 = vcmp.eq.f32.partialorder %v1538_v16, 8.507059e+37  ;;  %vm2001_vm10 = vmor %vm1999_vm3, %vm2000_vm6  ;;  %v785_v30 = vpop.f32.mrf.mxu1 }
 0x1ac   :  { %v1522_v47 = vsel %vm1521_vm5, %v2848_v20, %v1518_v8  ;;  %v1530_v55 = vmul.f32 %v2858_v50, %v4634_v2  ;;  %v1541_v3 = vor.u32 1.1754944e-38, %v1540_v43  ;;  %vm2014_vm9 = vweird.f32 %v4650_v48 }
 0x1ad   :  { %v2860_v57 = vpop.eup %2859  ;;  %v1527_v39 = vsel %vm4660_vm2, %v1526_v41, %v1522_v47  ;;  %v1998_v38 = vadd.f32 %v2852_v15, %v1997_v27  ;;  %v2018_v14 = vand.u32 2147483647, %v4650_v48  ;;  %v692_v63 = vadd.f32 %v4362_v28, %v691_v37  ;;  %v696_v53 = vpop.f32.mrf.mxu2 }
 0x1ae   :  { %v2862_v32 = vpop.eup %2861  ;;  %2110 = vst [vmem:[%s4800_s3 + $0xd0] sm:$0xff] %v1527_v39  ;;  %v1531_v45 = vsub.f32 1.0, %v1530_v55  ;;  %v2020_v56 = vand.u32 2147483648, %v4650_v48  ;;  %v4693_v51 = vadd.f32 1.0, %v2856_v9  ;;  %v4695_v35 = vadd.f32 1.0, %v2860_v57 }
 0x1af   :  { %v2002_v58 = vsel %vm2001_vm10, %v2852_v15, %v1998_v38  ;;  %vm1535_vm11 = vweird.f32 %v2858_v50  ;;  %v2010_v0 = vmul.f32 %v2862_v32, %v4650_v48  ;;  %v1553_v42 = vand.u32 2147483647, %v4664_v6 }
 0x1b0   :  { %v2007_v40 = vsel %vm4667_vm4, %v2006_v31, %v2002_v58  ;;  %v1532_v36 = vmul.f32 %v2858_v50, %v1531_v45  ;;  %v1555_v10 = vand.u32 2147483648, %v4664_v6  ;;  %2865 = vrcp.f32 %v4693_v51  ;;  %vm1536_vm13 = vmor %vm1534_vm7, %vm1535_vm11 }
 0x1b1   :  { %v2864_v46 = vpop.eup %2863  ;;  %2142 = vst [vmem:[%s4800_s3 + $0x1d0] sm:$0xff] %v2007_v40  ;;  %v2011_v21 = vsub.f32 1.0, %v2010_v0  ;;  %v861_v17 = vadd.f32 %v860_v12, %v692_v63  ;;  %v784_v54 = vadd.f32 %v783_v13, %v4637_v24  ;;  %v695_v1 = vadd.f32 %v4362_v28, %v694_v59 }
 0x1b2   :  { %v1533_v4 = vadd.f32 %v2858_v50, %v1532_v36  ;;  %vm4708_vm12 = vcmp.eq.f32.partialorder %v2018_v14, 8.507059e+37  ;;  %v1545_v5 = vmul.f32 %v2864_v46, %v4664_v6  ;;  %2867 = vrcp.f32 %v4695_v35  ;;  %v865_v55 = vpop.f32.mrf.mxu3 }
 0x1b3   :  { %v2012_v60 = vmul.f32 %v2862_v32, %v2011_v21  ;;  %vm2015_vm14 = vweird.f32 %v2862_v32  ;;  %v2021_v37 = vor.u32 1.1754944e-38, %v2020_v56  ;;  %vm1549_vm15 = vweird.f32 %v4664_v6 }
 0x1b4   :  { %v1537_v24 = vsel %vm1536_vm13, %v2858_v50, %v1533_v4  ;;  %v1546_v34 = vsub.f32 1.0, %v1545_v5  ;;  %vm4718_vm0 = vcmp.eq.f32.partialorder %v1553_v42, 8.507059e+37  ;;  %v1556_v11 = vor.u32 1.1754944e-38, %v1555_v10  ;;  %vm2016_vm1 = vmor %vm2014_vm9, %vm2015_vm14 }
 0x1b5   :  { %v1542_v23 = vsel %vm4677_vm8, %v1541_v3, %v1537_v24  ;;  %v2013_v52 = vadd.f32 %v2862_v32, %v2012_v60  ;;  %v2533_v18 = vmul.f32 -1.442695, %v861_v17  ;;  %v2502_v61 = vmul.f32 -1.442695, %v784_v54 }
 0x1b6   :  { %v2866_v2 = vpop.eup %2865  ;;  %2111 = vst [vmem:[%s4800_s3 + $0xd8] sm:$0xff] %v1542_v23  ;;  %v1547_v15 = vmul.f32 %v2864_v46, %v1546_v34  ;;  %vm1550_vm2 = vweird.f32 %v2864_v46  ;;  %vm2029_vm3 = vweird.f32 %v4693_v51  ;;  %v864_v22 = vadd.f32 %v863_v44, %v695_v1 }
 0x1b7   :  { %v2017_v49 = vsel %vm2016_vm1, %v2862_v32, %v2013_v52  ;;  %v2025_v7 = vmul.f32 %v2866_v2, %v4693_v51  ;;  %v2033_v12 = vand.u32 2147483647, %v4693_v51  ;;  %2869 = vpow2.f32 %v2533_v18  ;;  %vm1551_vm4 = vmor %vm1549_vm15, %vm1550_vm2 }
 0x1b8   :  { %v2868_v19 = vpop.eup %2867  ;;  %v2022_v16 = vsel %vm4708_vm12, %v2021_v37, %v2017_v49  ;;  %v1548_v43 = vadd.f32 %v2864_v46, %v1547_v15  ;;  %2871 = vpow2.f32 %v2502_v61  ;;  %v2534_v48 = vmul.f32 -1.442695, %v864_v22 }
 0x1b9   :  { %2143 = vst [vmem:[%s4800_s3 + $0x1d8] sm:$0xff] %v2022_v16  ;;  %v2026_v33 = vsub.f32 1.0, %v2025_v7  ;;  %v2035_v41 = vand.u32 2147483648, %v4693_v51  ;;  %v1560_v25 = vmul.f32 %v2868_v19, %v4695_v35  ;;  %v617_v9 = vadd.f32 %v4362_v28, %v616_v62 }
 0x1ba   :  { %v1552_v8 = vsel %vm1551_vm4, %v2864_v46, %v1548_v43  ;;  %vm2030_vm5 = vweird.f32 %v2866_v2  ;;  %2873 = vpow2.f32 %v2534_v48  ;;  %v697_v31 = vadd.f32 %v4362_v28, %v696_v53 }
 0x1bb   :  { %v1557_v50 = vsel %vm4718_vm0, %v1556_v11, %v1552_v8  ;;  %v2027_v27 = vmul.f32 %v2866_v2, %v2026_v33  ;;  %v1561_v47 = vsub.f32 1.0, %v1560_v25  ;;  %v786_v6 = vadd.f32 %v785_v30, %v617_v9  ;;  %vm2031_vm8 = vmor %vm2029_vm3, %vm2030_vm5 }
 0x1bc   :  { %2112 = vst [vmem:[%s4800_s3 + $0xe0] sm:$0xff] %v1557_v50  ;;  %vm4749_vm6 = vcmp.eq.f32.partialorder %v2033_v12, 8.507059e+37  ;;  %v1568_v3 = vand.u32 2147483647, %v4695_v35  ;;  %v1570_v57 = vand.u32 2147483648, %v4695_v35  ;;  %v866_v28 = vadd.f32 %v865_v55, %v697_v31 }
 0x1bd   :  { %v2870_v39 = vpop.eup %2869  ;;  %v2028_v38 = vadd.f32 %v2866_v2, %v2027_v27  ;;  %v1562_v14 = vmul.f32 %v2868_v19, %v1561_v47  ;;  %vm1565_vm7 = vweird.f32 %v2868_v19  ;;  %v2503_v63 = vmul.f32 -1.442695, %v786_v6 }
 0x1be   :  { %v2872_v59 = vpop.eup %2871  ;;  %v2036_v32 = vor.u32 1.1754944e-38, %v2035_v41  ;;  %vm1564_vm9 = vweird.f32 %v4695_v35  ;;  %v1121_v45 = vadd.f32 1.0, %v2870_v39  ;;  %v2535_v56 = vmul.f32 -1.442695, %v866_v28 }
 0x1bf   :  { %v2032_v58 = vsel %vm2031_vm8, %v2866_v2, %v2028_v38  ;;  %v1563_v0 = vadd.f32 %v2868_v19, %v1562_v14  ;;  %v1090_v42 = vadd.f32 1.0, %v2872_v59  ;;  %2875 = vpow2.f32 %v2503_v63  ;;  %vm1566_vm10 = vmor %vm1564_vm9, %vm1565_vm7 }
 0x1c0   :  { %v2874_v40 = vpop.eup %2873  ;;  %v2037_v36 = vsel %vm4749_vm6, %v2036_v32, %v2032_v58  ;;  %v1571_v10 = vor.u32 1.1754944e-38, %v1570_v57  ;;  %2877 = vrcp.f32 %v1121_v45  ;;  %vm1569_vm11 = vcmp.eq.f32.partialorder %v1568_v3, 8.507059e+37 }
 0x1c1   :  { %2144 = vst [vmem:[%s4800_s3 + $0x1e0] sm:$0xff] %v2037_v36  ;;  %v1567_v51 = vsel %vm1566_vm10, %v2868_v19, %v1563_v0  ;;  %2879 = vrcp.f32 %v1090_v42  ;;  %v1122_v13 = vadd.f32 1.0, %v2874_v40  ;;  %v2048_v5 = vand.u32 2147483647, %v1121_v45 }
 0x1c2   :  { %v1572_v35 = vsel %vm1569_vm11, %v1571_v10, %v1567_v51  ;;  %2881 = vpow2.f32 %v2535_v56  ;;  %v2050_v60 = vand.u32 2147483648, %v1121_v45  ;;  %v1583_v24 = vand.u32 2147483647, %v1090_v42 }
 0x1c3   :  { %2113 = vst [vmem:[%s4800_s3 + $0xe8] sm:$0xff] %v1572_v35  ;;  %2883 = vrcp.f32 %v1122_v13  ;;  %v1585_v34 = vand.u32 2147483648, %v1090_v42  ;;  %vm1579_vm13 = vweird.f32 %v1090_v42  ;;  %vm2044_vm15 = vweird.f32 %v1121_v45 }
 0x1c4   :  { %vm2049_vm0 = vcmp.eq.f32.partialorder %v2048_v5, 8.507059e+37  ;;  %v2051_v2 = vor.u32 1.1754944e-38, %v2050_v60  ;;  %vm1584_vm2 = vcmp.eq.f32.partialorder %v1583_v24, 8.507059e+37  ;;  %v2063_v12 = vand.u32 2147483647, %v1122_v13 }
 0x1c5   :  { %v2876_v46 = vpop.eup %2875  ;;  %v1586_v62 = vor.u32 1.1754944e-38, %v1585_v34  ;;  %v2065_v53 = vand.u32 2147483648, %v1122_v13  ;;  %vm2059_vm5 = vweird.f32 %v1122_v13 }
 0x1c6   :  { %v2878_v21 = vpop.eup %2877  ;;  %v4767_v17 = vadd.f32 1.0, %v2876_v46  ;;  %vm2064_vm8 = vcmp.eq.f32.partialorder %v2063_v12, 8.507059e+37 }
 0x1c7   :  { %v2880_v54 = vpop.eup %2879  ;;  %v2040_v1 = vmul.f32 %v2878_v21, %v1121_v45  ;;  %vm2045_vm12 = vweird.f32 %v2878_v21  ;;  %v2066_v31 = vor.u32 1.1754944e-38, %v2065_v53 }
 0x1c8   :  { %v1575_v44 = vmul.f32 %v2880_v54, %v1090_v42  ;;  %2885 = vrcp.f32 %v4767_v17  ;;  %v2882_v4 = vpop.eup %2881  ;;  %vm1580_vm14 = vweird.f32 %v2880_v54  ;;  %vm2046_vm1 = vmor %vm2044_vm15, %vm2045_vm12  ;;  %v1598_v8 = vand.u32 2147483647, %v4767_v17 }
 0x1c9   :  { %v2041_v20 = vsub.f32 1.0, %v2040_v1  ;;  %v4770_v29 = vadd.f32 1.0, %v2882_v4  ;;  %v2884_v11 = vpop.eup %2883  ;;  %vm1581_vm3 = vmor %vm1579_vm13, %vm1580_vm14  ;;  %v1600_v30 = vand.u32 2147483648, %v4767_v17  ;;  %vm1594_vm9 = vweird.f32 %v4767_v17 }
 0x1ca   :  { %v1576_v37 = vsub.f32 1.0, %v1575_v44  ;;  %v2055_v18 = vmul.f32 %v2884_v11, %v1122_v13  ;;  %vm2060_vm4 = vweird.f32 %v2884_v11  ;;  %vm1599_vm11 = vcmp.eq.f32.partialorder %v1598_v8, 8.507059e+37 }
 0x1cb   :  { %v2042_v23 = vmul.f32 %v2878_v21, %v2041_v20  ;;  %2887 = vrcp.f32 %v4770_v29  ;;  %vm2061_vm6 = vmor %vm2059_vm5, %vm2060_vm4  ;;  %v1601_v3 = vor.u32 1.1754944e-38, %v1600_v30  ;;  %v2080_v57 = vand.u32 2147483648, %v4770_v29 }
 0x1cc   :  { %v1577_v52 = vmul.f32 %v2880_v54, %v1576_v37  ;;  %v2056_v49 = vsub.f32 1.0, %v2055_v18  ;;  %v2078_v38 = vand.u32 2147483647, %v4770_v29  ;;  %vm2074_vm13 = vweird.f32 %v4770_v29 }
 0x1cd   :  { %v2043_v61 = vadd.f32 %v2878_v21, %v2042_v23  ;;  %v2081_v59 = vor.u32 1.1754944e-38, %v2080_v57 }
 0x1ce   :  { %v2886_v15 = vpop.eup %2885  ;;  %v1578_v22 = vadd.f32 %v2880_v54, %v1577_v52  ;;  %v2057_v48 = vmul.f32 %v2884_v11, %v2056_v49  ;;  %vm2079_vm15 = vcmp.eq.f32.partialorder %v2078_v38, 8.507059e+37 }
 0x1cf   :  { %v2047_v7 = vsel %vm2046_vm1, %v2878_v21, %v2043_v61  ;;  %v1590_v19 = vmul.f32 %v2886_v15, %v4767_v17  ;;  %vm1595_vm7 = vweird.f32 %v2886_v15 }
 0x1d0   :  { %v2052_v16 = vsel %vm2049_vm0, %v2051_v2, %v2047_v7  ;;  %v1582_v43 = vsel %vm1581_vm3, %v2880_v54, %v1578_v22  ;;  %v2058_v9 = vadd.f32 %v2884_v11, %v2057_v48  ;;  %vm1596_vm10 = vmor %vm1594_vm9, %vm1595_vm7 }
 0x1d1   :  { %2145 = vst [vmem:[%s4800_s3 + $0x1e8] sm:$0xff] %v2052_v16  ;;  %v1587_v33 = vsel %vm1584_vm2, %v1586_v62, %v1582_v43  ;;  %v1591_v41 = vsub.f32 1.0, %v1590_v19  ;;  %v2888_v25 = vpop.eup %2887 }
 0x1d2   :  { %2114 = vst [vmem:[%s4800_s3 + $0xf0] sm:$0xff] %v1587_v33  ;;  %v2070_v27 = vmul.f32 %v2888_v25, %v4770_v29  ;;  %v2062_v47 = vsel %vm2061_vm6, %v2884_v11, %v2058_v9  ;;  %vm2075_vm12 = vweird.f32 %v2888_v25 }
 0x1d3   :  { %v1592_v50 = vmul.f32 %v2886_v15, %v1591_v41  ;;  %v2067_v6 = vsel %vm2064_vm8, %v2066_v31, %v2062_v47  ;;  %vm2076_vm14 = vmor %vm2074_vm13, %vm2075_vm12 }
 0x1d4   :  { %v2071_v26 = vsub.f32 1.0, %v2070_v27  ;;  %2146 = vst [vmem:[%s4800_s3 + $0x1f0] sm:$0xff] %v2067_v6 }
 0x1d5   :  { %v1593_v55 = vadd.f32 %v2886_v15, %v1592_v50 }
 0x1d6   :  { %v2072_v39 = vmul.f32 %v2888_v25, %v2071_v26 }
 0x1d7   :  { %v1597_v28 = vsel %vm1596_vm10, %v2886_v15, %v1593_v55 }
 0x1d8   :  { %v1602_v14 = vsel %vm1599_vm11, %v1601_v3, %v1597_v28  ;;  %v2073_v63 = vadd.f32 %v2888_v25, %v2072_v39 }
 0x1d9   :  { %2115 = vst [vmem:[%s4800_s3 + $0xf8] sm:$0xff] %v1602_v14 }
 0x1da   :  { %v2077_v32 = vsel %vm2076_vm14, %v2888_v25, %v2073_v63 }
 0x1db   :  { %v2082_v45 = vsel %vm2079_vm15, %v2081_v59, %v2077_v32 }
 0x1dc   :  { %2147 = vst [vmem:[%s4800_s3 + $0x1f8] sm:$0xff] %v2082_v45 }

</bundles_post_ra>
